<compile_context>
chip_gen: v5e
topology: v5e:2x2
jax: 0.10.0
libtpu: 0.0.40
codegen_flags: <defaults>
</compile_context>

<pallas_src>
import math
import jax
import jax.numpy as jnp
from jax.experimental import pallas as pl
from jax.experimental.pallas import tpu as pltpu

# ----------------------------- synthetic small config -----------------------------
VOCAB        = 64
D_MODEL      = 32
D_KV         = 8
N_HEADS      = 4                 # inner dim = N_HEADS * D_KV = 32
D_FF         = 64
N_LAYERS     = 2
NUM_BUCKETS  = 32
MAX_DISTANCE = 128
EPS          = 1e-6
PAD_ID       = 0                 # pad_token_id == decoder_start_token_id for T5
NEG_INF      = -1e9
INNER        = N_HEADS * D_KV


# ------------------------------ in-kernel helpers (f32) ----------------------------
def _rms(x, w):
    # T5 RMS LayerNorm: no mean subtraction, scale only.
    var = jnp.mean(x * x, axis=-1, keepdims=True)
    return x * jax.lax.rsqrt(var + EPS) * w


def _softmax_rows(s):
    m = jnp.max(s, axis=-1, keepdims=True)
    p = jnp.exp(s - m)
    return p * pl.reciprocal(jnp.sum(p, axis=-1, keepdims=True), approx=True)


# ----------------------------------- fused kernel ----------------------------------
def _t5_kernel(enc_ids_ref, dec_ids_ref, labels_ref, enc_kbias_ref,
               embed_ref, enc_pos_bias_ref, dec_pos_bias_ref,
               e_ln1, e_wqkv, e_wo, e_ln2, e_wi0, e_wi1, e_woff, e_fln,
               d_ln1, d_wqkv, d_wo, d_ln2, d_cq, d_ckv, d_co,
               d_ln3, d_wi0, d_wi1, d_woff, d_fln, lm_w,
               logits_ref, loss_sum_ref, cnt_ref):
    # One grid step == one batch element, end to end.
    Te = enc_ids_ref.shape[1]
    Td = dec_ids_ref.shape[1]
    emb = embed_ref[...]                                            # (V, D) f32

    def embed_tokens(ids_col):                                      # (T, 1) i32 -> (T, D) f32
        T = ids_col.shape[0]
        onehot = (jax.lax.broadcasted_iota(jnp.int32, (T, VOCAB), 1)
                  == ids_col).astype(jnp.float32)
        return jnp.dot(onehot, emb, preferred_element_type=jnp.float32)

    def attend(q, k, v, bias, wo_w):
        # bias: (H, Tq, Tk), fully pre-combined (position + causal + key padding).
        # No 1/sqrt(d_kv) scaling (T5 folds it into init).
        ctxs = []
        for hh in range(N_HEADS):
            sl = slice(hh * D_KV, (hh + 1) * D_KV)
            s = jax.lax.dot_general(q[:, sl].astype(jnp.bfloat16),
                                    k[:, sl].astype(jnp.bfloat16),
                                    (((1,), (1,)), ((), ())),
                                    preferred_element_type=jnp.float32)   # (Tq, Tk)
            p_ = _softmax_rows(s + bias[hh])
            ctxs.append(jnp.dot(p_.astype(jnp.bfloat16), v[:, sl].astype(jnp.bfloat16),
                                preferred_element_type=jnp.float32))      # (Tq, D_KV)
        ctx = jnp.concatenate(ctxs, axis=-1)                              # (Tq, INNER)
        # single fused output projection over all heads
        return jnp.dot(ctx.astype(jnp.bfloat16), wo_w, preferred_element_type=jnp.float32)

    def gated_ffn(x, ln_w, wi0_w, wi1_w, wo_w):
        # T5DenseGatedActDense: x + (gelu_new(xn @ wi_0) * (xn @ wi_1)) @ wo
        xn = _rms(x, ln_w).astype(jnp.bfloat16)
        g = jax.nn.gelu(jnp.dot(xn, wi0_w, preferred_element_type=jnp.float32),
                        approximate=True)
        lin = jnp.dot(xn, wi1_w, preferred_element_type=jnp.float32)
        return x + jnp.dot((g * lin).astype(jnp.bfloat16), wo_w,
                           preferred_element_type=jnp.float32)

    # ---- biases: built ONCE, shared across all layers (T5 shares layer-0 bias) ----
    kbias = enc_kbias_ref[...].reshape(1, Te)                       # (1, Te) pad key bias
    enc_bias = enc_pos_bias_ref[...] + kbias[None, :, :]            # (H, Te, Te)
    dec_bias = dec_pos_bias_ref[...]                                # (H, Td, Td) (causal folded in)
    cross_bias = jnp.broadcast_to(kbias.reshape(1, 1, Te), (N_HEADS, Td, Te))

    # --------------------------------- encoder -------------------------------------
    h = embed_tokens(enc_ids_ref[...].reshape(Te, 1))               # (Te, D) f32
    for l in range(N_LAYERS):
        xn = _rms(h, e_ln1[l]).astype(jnp.bfloat16)
        qkv = jnp.dot(xn, e_wqkv[l], preferred_element_type=jnp.float32)   # (Te, 3*INNER)
        h = h + attend(qkv[:, :INNER], qkv[:, INNER:2 * INNER], qkv[:, 2 * INNER:],
                       enc_bias, e_wo[l])
        h = gated_ffn(h, e_ln2[l], e_wi0[l], e_wi1[l], e_woff[l])
    enc_out_bf = _rms(h, e_fln[...]).astype(jnp.bfloat16)           # final encoder RMSNorm

    # --------------------------------- decoder -------------------------------------
    h = embed_tokens(dec_ids_ref[...].reshape(Td, 1))
    for l in range(N_LAYERS):
        # self attention (causal + relative position bias)
        xn = _rms(h, d_ln1[l]).astype(jnp.bfloat16)
        qkv = jnp.dot(xn, d_wqkv[l], preferred_element_type=jnp.float32)
        h = h + attend(qkv[:, :INNER], qkv[:, INNER:2 * INNER], qkv[:, 2 * INNER:],
                       dec_bias, d_wo[l])
        # cross attention (K/V from final-normed encoder output, no position bias)
        xn = _rms(h, d_ln2[l]).astype(jnp.bfloat16)
        q = jnp.dot(xn, d_cq[l], preferred_element_type=jnp.float32)
        kv = jnp.dot(enc_out_bf, d_ckv[l], preferred_element_type=jnp.float32)
        h = h + attend(q, kv[:, :INNER], kv[:, INNER:], cross_bias, d_co[l])
        # gated FFN
        h = gated_ffn(h, d_ln3[l], d_wi0[l], d_wi1[l], d_woff[l])

    # --------------- final RMSNorm -> lm_head -> cross-entropy partials -------------
    xn = _rms(h, d_fln[...]).astype(jnp.bfloat16)
    logits = jnp.dot(xn, lm_w[...], preferred_element_type=jnp.float32)     # (Td, V)
    logits_ref[...] = logits.reshape(1, Td, VOCAB)

    labels = labels_ref[...].reshape(Td, 1)                                  # (Td, 1) i32
    m = jnp.max(logits, axis=-1, keepdims=True)
    lse = jnp.log(jnp.sum(jnp.exp(logits - m), axis=-1, keepdims=True)) + m
    classes = jax.lax.broadcasted_iota(jnp.int32, logits.shape, 1)
    tgt = jnp.sum(logits * (classes == labels).astype(jnp.float32), axis=-1, keepdims=True)
    valid = (labels != -100).astype(jnp.float32)
    loss_sum_ref[...] = jnp.sum((lse - tgt) * valid, axis=0, keepdims=True).reshape(1, 1, 1)
    cnt_ref[...] = jnp.sum(valid, axis=0, keepdims=True).reshape(1, 1, 1)


# ---------------------------------- kernel wrapper ----------------------------------
def shift_right(labels):
    start = jnp.full((labels.shape[0], 1), PAD_ID, labels.dtype)
    shifted = jnp.concatenate([start, labels[:, :-1]], axis=1)
    return jnp.where(shifted == -100, PAD_ID, shifted)


def t5_forward(p, input_ids, labels):
    B, Te = input_ids.shape
    Td = labels.shape[1]
    # attention_mask = input_ids.ne(pad_token_id).float()   <-- module's forward
    attention_mask = (input_ids != PAD_ID).astype(jnp.float32)
    dec_ids = shift_right(labels)

    # Per-batch inputs carry the token axis on the sublane dim (trailing dims full ->
    # satisfies the (8,128)/full-dim block constraint, no in-kernel relayout).
    enc_ids_c = input_ids.astype(jnp.int32).reshape(B, Te, 1)
    dec_ids_c = dec_ids.astype(jnp.int32).reshape(B, Td, 1)
    labels_c  = labels.astype(jnp.int32).reshape(B, Td, 1)
    enc_kbias = ((1.0 - attention_mask) * NEG_INF).reshape(B, 1, Te)

    per_batch = (enc_ids_c, dec_ids_c, labels_c, enc_kbias)
    shared = (p["shared_embed"], p["enc_pos_bias"], p["dec_pos_bias"],
              p["e_ln1"], p["e_wqkv"], p["e_wo"], p["e_ln2"],
              p["e_wi0"], p["e_wi1"], p["e_woff"], p["e_fln"],
              p["d_ln1"], p["d_wqkv"], p["d_wo"], p["d_ln2"],
              p["d_cq"], p["d_ckv"], p["d_co"], p["d_ln3"],
              p["d_wi0"], p["d_wi1"], p["d_woff"], p["d_fln"], p["lm_head"])

    def _pb_spec(x):     # one batch element per grid step
        return pl.BlockSpec((1,) + x.shape[1:], lambda b: (b, 0, 0))

    def _sh_spec(x):     # weights / bias tables: VMEM-resident, same block every step
        if x.ndim == 2:
            return pl.BlockSpec(x.shape, lambda b: (0, 0))
        return pl.BlockSpec(x.shape, lambda b: (0, 0, 0))

    in_specs = [_pb_spec(x) for x in per_batch] + [_sh_spec(x) for x in shared]

    logits, loss_sum, cnt = pl.pallas_call(
        _t5_kernel,
        grid=(B,),
        out_shape=(jax.ShapeDtypeStruct((B, Td, VOCAB), jnp.float32),
                   jax.ShapeDtypeStruct((B, 1, 1), jnp.float32),
                   jax.ShapeDtypeStruct((B, 1, 1), jnp.float32)),
        in_specs=in_specs,
        out_specs=(pl.BlockSpec((1, Td, VOCAB), lambda b: (b, 0, 0)),
                   pl.BlockSpec((1, 1, 1), lambda b: (b, 0, 0)),
                   pl.BlockSpec((1, 1, 1), lambda b: (b, 0, 0))),
        compiler_params=pltpu.CompilerParams(dimension_semantics=("parallel",)),
    )(*per_batch, *shared)

    # PyTorch CrossEntropyLoss(ignore_index=-100, reduction='mean'): sum over valid / count.
    loss = jnp.sum(loss_sum) / jnp.sum(cnt)
    return loss, logits


# ----------------------- position bias (precomputed outside the jit) -----------------
def relative_position_bucket(rel_pos, bidirectional):
    num_buckets = NUM_BUCKETS
    rb = jnp.zeros_like(rel_pos)
    if bidirectional:
        num_buckets //= 2
        rb = rb + (rel_pos > 0).astype(jnp.int32) * num_buckets
        rel_pos = jnp.abs(rel_pos)
    else:
        rel_pos = -jnp.minimum(rel_pos, 0)
    max_exact = num_buckets // 2
    is_small = rel_pos < max_exact
    rel_large = max_exact + (
        jnp.log(jnp.maximum(rel_pos, 1).astype(jnp.float32) / max_exact)
        / math.log(MAX_DISTANCE / max_exact) * (num_buckets - max_exact)
    ).astype(jnp.int32)
    rel_large = jnp.minimum(rel_large, num_buckets - 1)
    return rb + jnp.where(is_small, rel_pos, rel_large)


def compute_position_bias(table, tq, tk, bidirectional):
    ctx = jnp.arange(tq)[:, None]
    mem = jnp.arange(tk)[None, :]
    buckets = relative_position_bucket(mem - ctx, bidirectional)    # (tq, tk)
    vals = jnp.take(table, buckets, axis=0)                         # (tq, tk, H)
    return jnp.transpose(vals, (2, 0, 1))                           # (H, tq, tk)


def add_position_bias(p, t_enc, t_dec):
    # Depends only on the fixed bias tables and static seq lengths -> computed once.
    enc_pos = compute_position_bias(p["enc_rel_bias"], t_enc, t_enc, bidirectional=True)
    dec_pos = compute_position_bias(p["dec_rel_bias"], t_dec, t_dec, bidirectional=False)
    causal = (jnp.arange(t_dec)[None, :] <= jnp.arange(t_dec)[:, None]).astype(jnp.float32)
    p = dict(p)
    p["enc_pos_bias"] = enc_pos                                      # (H, Te, Te)
    p["dec_pos_bias"] = dec_pos + (1.0 - causal)[None, :, :] * NEG_INF
    return p


# ------------------------------------ params init ----------------------------------
def init_params(key):
    keys = iter(jax.random.split(key, 32))

    def w(shape, scale=0.05, dtype=jnp.bfloat16):
        return (scale * jax.random.normal(next(keys), shape, jnp.float32)).astype(dtype)

    ones_ln = jnp.ones((N_LAYERS, 1, D_MODEL), jnp.float32)
    return dict(
        shared_embed=w((VOCAB, D_MODEL), 1.0, jnp.float32),
        lm_head=w((D_MODEL, VOCAB)),
        enc_rel_bias=w((NUM_BUCKETS, N_HEADS), 0.05, jnp.float32),
        dec_rel_bias=w((NUM_BUCKETS, N_HEADS), 0.05, jnp.float32),
        e_fln=jnp.ones((1, D_MODEL), jnp.float32),
        d_fln=jnp.ones((1, D_MODEL), jnp.float32),
        # encoder stacks (L, ...)
        e_ln1=ones_ln, e_ln2=ones_ln,
        e_wqkv=w((N_LAYERS, D_MODEL, 3 * INNER)),     # fused Q | K | V
        e_wo=w((N_LAYERS, INNER, D_MODEL)),
        e_wi0=w((N_LAYERS, D_MODEL, D_FF)),
        e_wi1=w((N_LAYERS, D_MODEL, D_FF)),
        e_woff=w((N_LAYERS, D_FF, D_MODEL)),
        # decoder stacks (L, ...)
        d_ln1=ones_ln, d_ln2=ones_ln, d_ln3=ones_ln,
        d_wqkv=w((N_LAYERS, D_MODEL, 3 * INNER)),     # fused self Q | K | V
        d_wo=w((N_LAYERS, INNER, D_MODEL)),
        d_cq=w((N_LAYERS, D_MODEL, INNER)),
        d_ckv=w((N_LAYERS, D_MODEL, 2 * INNER)),      # fused cross K | V
        d_co=w((N_LAYERS, INNER, D_MODEL)),
        d_wi0=w((N_LAYERS, D_MODEL, D_FF)),
        d_wi1=w((N_LAYERS, D_MODEL, D_FF)),
        d_woff=w((N_LAYERS, D_FF, D_MODEL)),
    )


# --------------------------------------- main ---------------------------------------
if __name__ == "__main__":
    key = jax.random.PRNGKey(0)
    pkey, ikey, lkey = jax.random.split(key, 3)

    B, T_ENC, T_DEC = 2, 8, 8
    params = init_params(pkey)
    params = add_position_bias(params, T_ENC, T_DEC)   # once, outside the per-step jit

    input_ids = jax.random.randint(ikey, (B, T_ENC), 1, VOCAB, dtype=jnp.int32)
    input_ids = input_ids.at[:, -2:].set(PAD_ID)       # trailing pads exercise the mask
    labels = jax.random.randint(lkey, (B, T_DEC), 1, VOCAB, dtype=jnp.int32)

    # TODO(synk): tokenizer / pretrained-weight loading are runtime preprocessing; inputs
    # here are synthetic token ids and synthetic weights with matching architecture.
    loss, logits = jax.jit(t5_forward)(params, input_ids, labels)
    jax.block_until_ready((loss, logits))
    assert logits.shape == (B, T_DEC, VOCAB) and loss.shape == ()
    assert bool(jnp.isfinite(loss))
    print("KERNEL_OK")
</pallas_src>

<mosaic_0001>
module attributes {stable_mosaic.version = 11 : i64} {
  func.func @_t5_kernel(%arg0: i32, %arg1: memref<1x8x1xi32, #tpu.memory_space<vmem>>, %arg2: memref<1x8x1xi32, #tpu.memory_space<vmem>>, %arg3: memref<1x8x1xi32, #tpu.memory_space<vmem>>, %arg4: memref<1x1x8xf32, #tpu.memory_space<vmem>>, %arg5: memref<64x32xf32, #tpu.memory_space<vmem>>, %arg6: memref<4x8x8xf32, #tpu.memory_space<vmem>>, %arg7: memref<4x8x8xf32, #tpu.memory_space<vmem>>, %arg8: memref<2x1x32xf32, #tpu.memory_space<vmem>>, %arg9: memref<2x32x96xbf16, #tpu.memory_space<vmem>>, %arg10: memref<2x32x32xbf16, #tpu.memory_space<vmem>>, %arg11: memref<2x1x32xf32, #tpu.memory_space<vmem>>, %arg12: memref<2x32x64xbf16, #tpu.memory_space<vmem>>, %arg13: memref<2x32x64xbf16, #tpu.memory_space<vmem>>, %arg14: memref<2x64x32xbf16, #tpu.memory_space<vmem>>, %arg15: memref<1x32xf32, #tpu.memory_space<vmem>>, %arg16: memref<2x1x32xf32, #tpu.memory_space<vmem>>, %arg17: memref<2x32x96xbf16, #tpu.memory_space<vmem>>, %arg18: memref<2x32x32xbf16, #tpu.memory_space<vmem>>, %arg19: memref<2x1x32xf32, #tpu.memory_space<vmem>>, %arg20: memref<2x32x32xbf16, #tpu.memory_space<vmem>>, %arg21: memref<2x32x64xbf16, #tpu.memory_space<vmem>>, %arg22: memref<2x32x32xbf16, #tpu.memory_space<vmem>>, %arg23: memref<2x1x32xf32, #tpu.memory_space<vmem>>, %arg24: memref<2x32x64xbf16, #tpu.memory_space<vmem>>, %arg25: memref<2x32x64xbf16, #tpu.memory_space<vmem>>, %arg26: memref<2x64x32xbf16, #tpu.memory_space<vmem>>, %arg27: memref<1x32xf32, #tpu.memory_space<vmem>>, %arg28: memref<32x64xbf16, #tpu.memory_space<vmem>>, %arg29: memref<1x8x64xf32, #tpu.memory_space<vmem>>, %arg30: memref<1x1x1xf32, #tpu.memory_space<vmem>>, %arg31: memref<1x1x1xf32, #tpu.memory_space<vmem>>) attributes {dimension_semantics = [#tpu.dimension_semantics<parallel>], iteration_bounds = array<i64: 2>, scalar_prefetch = 0 : i64, scratch_operands = 0 : i64, tpu.core_type = #tpu.core_type<tc>, window_params = [{transform_indices = @transform_0, window_bounds = array<i64: 1, 8, 1>}, {transform_indices = @transform_1, window_bounds = array<i64: 1, 8, 1>}, {transform_indices = @transform_2, window_bounds = array<i64: 1, 8, 1>}, {transform_indices = @transform_3, window_bounds = array<i64: 1, 1, 8>}, {pipeline_mode = #tpu.pipeline_mode<synchronous>, transform_indices = @transform_4, window_bounds = array<i64: 64, 32>}, {pipeline_mode = #tpu.pipeline_mode<synchronous>, transform_indices = @transform_5, window_bounds = array<i64: 4, 8, 8>}, {pipeline_mode = #tpu.pipeline_mode<synchronous>, transform_indices = @transform_6, window_bounds = array<i64: 4, 8, 8>}, {pipeline_mode = #tpu.pipeline_mode<synchronous>, transform_indices = @transform_7, window_bounds = array<i64: 2, 1, 32>}, {pipeline_mode = #tpu.pipeline_mode<synchronous>, transform_indices = @transform_8, window_bounds = array<i64: 2, 32, 96>}, {pipeline_mode = #tpu.pipeline_mode<synchronous>, transform_indices = @transform_9, window_bounds = array<i64: 2, 32, 32>}, {pipeline_mode = #tpu.pipeline_mode<synchronous>, transform_indices = @transform_10, window_bounds = array<i64: 2, 1, 32>}, {pipeline_mode = #tpu.pipeline_mode<synchronous>, transform_indices = @transform_11, window_bounds = array<i64: 2, 32, 64>}, {pipeline_mode = #tpu.pipeline_mode<synchronous>, transform_indices = @transform_12, window_bounds = array<i64: 2, 32, 64>}, {pipeline_mode = #tpu.pipeline_mode<synchronous>, transform_indices = @transform_13, window_bounds = array<i64: 2, 64, 32>}, {pipeline_mode = #tpu.pipeline_mode<synchronous>, transform_indices = @transform_14, window_bounds = array<i64: 1, 32>}, {pipeline_mode = #tpu.pipeline_mode<synchronous>, transform_indices = @transform_15, window_bounds = array<i64: 2, 1, 32>}, {pipeline_mode = #tpu.pipeline_mode<synchronous>, transform_indices = @transform_16, window_bounds = array<i64: 2, 32, 96>}, {pipeline_mode = #tpu.pipeline_mode<synchronous>, transform_indices = @transform_17, window_bounds = array<i64: 2, 32, 32>}, {pipeline_mode = #tpu.pipeline_mode<synchronous>, transform_indices = @transform_18, window_bounds = array<i64: 2, 1, 32>}, {pipeline_mode = #tpu.pipeline_mode<synchronous>, transform_indices = @transform_19, window_bounds = array<i64: 2, 32, 32>}, {pipeline_mode = #tpu.pipeline_mode<synchronous>, transform_indices = @transform_20, window_bounds = array<i64: 2, 32, 64>}, {pipeline_mode = #tpu.pipeline_mode<synchronous>, transform_indices = @transform_21, window_bounds = array<i64: 2, 32, 32>}, {pipeline_mode = #tpu.pipeline_mode<synchronous>, transform_indices = @transform_22, window_bounds = array<i64: 2, 1, 32>}, {pipeline_mode = #tpu.pipeline_mode<synchronous>, transform_indices = @transform_23, window_bounds = array<i64: 2, 32, 64>}, {pipeline_mode = #tpu.pipeline_mode<synchronous>, transform_indices = @transform_24, window_bounds = array<i64: 2, 32, 64>}, {pipeline_mode = #tpu.pipeline_mode<synchronous>, transform_indices = @transform_25, window_bounds = array<i64: 2, 64, 32>}, {pipeline_mode = #tpu.pipeline_mode<synchronous>, transform_indices = @transform_26, window_bounds = array<i64: 1, 32>}, {pipeline_mode = #tpu.pipeline_mode<synchronous>, transform_indices = @transform_27, window_bounds = array<i64: 32, 64>}, {transform_indices = @transform_28, window_bounds = array<i64: 1, 8, 64>}, {transform_indices = @transform_29, window_bounds = array<i64: 1, 1, 1>}, {transform_indices = @transform_30, window_bounds = array<i64: 1, 1, 1>}]} {
    %c0 = arith.constant 0 : index
    %c0_0 = arith.constant 0 : index
    %0 = vector.load %arg5[%c0, %c0_0] : memref<64x32xf32, #tpu.memory_space<vmem>>, vector<64x32xf32>
    %c0_1 = arith.constant 0 : index
    %c0_2 = arith.constant 0 : index
    %c0_3 = arith.constant 0 : index
    %1 = vector.load %arg4[%c0_1, %c0_2, %c0_3] : memref<1x1x8xf32, #tpu.memory_space<vmem>>, vector<1x1x8xf32>
    %2 = vector.shape_cast %1 : vector<1x1x8xf32> to vector<1x8xf32>
    %c0_4 = arith.constant 0 : index
    %c0_5 = arith.constant 0 : index
    %c0_6 = arith.constant 0 : index
    %3 = vector.load %arg6[%c0_4, %c0_5, %c0_6] : memref<4x8x8xf32, #tpu.memory_space<vmem>>, vector<4x8x8xf32>
    %4 = vector.shape_cast %2 : vector<1x8xf32> to vector<1x1x8xf32>
    %5 = vector.broadcast %4 : vector<1x1x8xf32> to vector<4x8x8xf32>
    %6 = arith.addf %3, %5 : vector<4x8x8xf32>
    %c0_7 = arith.constant 0 : index
    %c0_8 = arith.constant 0 : index
    %c0_9 = arith.constant 0 : index
    %7 = vector.load %arg7[%c0_7, %c0_8, %c0_9] : memref<4x8x8xf32, #tpu.memory_space<vmem>>, vector<4x8x8xf32>
    %8 = vector.shape_cast %2 : vector<1x8xf32> to vector<1x1x8xf32>
    %9 = vector.shape_cast %8 : vector<1x1x8xf32> to vector<1x1x8xf32>
    %10 = vector.broadcast %9 : vector<1x1x8xf32> to vector<4x8x8xf32>
    %c0_10 = arith.constant 0 : index
    %c0_11 = arith.constant 0 : index
    %c0_12 = arith.constant 0 : index
    %11 = vector.load %arg1[%c0_10, %c0_11, %c0_12] : memref<1x8x1xi32, #tpu.memory_space<vmem>>, vector<1x8x1xi32>
    %12 = vector.shape_cast %11 : vector<1x8x1xi32> to vector<8x1xi32>
    %13 = tpu.iota {dimensions = array<i32: 1>} : vector<8x64xi32>
    %14 = vector.broadcast %12 : vector<8x1xi32> to vector<8x64xi32>
    %15 = arith.cmpi eq, %13, %14 : vector<8x64xi32>
    %16 = arith.extui %15 : vector<8x64xi1> to vector<8x64xi32>
    %17 = arith.sitofp %16 : vector<8x64xi32> to vector<8x64xf32>
    %cst = arith.constant dense<0.000000e+00> : vector<8x32xf32>
    %18 = tpu.matmul %17, %0, %cst {dimension_numbers = #tpu.dot_dimension_numbers<[1], [0], [0], [1], [0, 0, 1, 1], [], []>} : vector<8x64xf32>, vector<64x32xf32>, vector<8x32xf32> -> vector<8x32xf32>
    %c0_13 = arith.constant 0 : index
    %c0_14 = arith.constant 0 : index
    %c0_15 = arith.constant 0 : index
    %19 = vector.load %arg8[%c0_13, %c0_14, %c0_15] : memref<2x1x32xf32, #tpu.memory_space<vmem>>, vector<1x1x32xf32>
    %20 = vector.shape_cast %19 : vector<1x1x32xf32> to vector<1x32xf32>
    %21 = arith.mulf %18, %18 : vector<8x32xf32>
    %cst_16 = arith.constant dense<0.000000e+00> : vector<8xf32>
    %22 = vector.multi_reduction <add>, %21, %cst_16 [1] : vector<8x32xf32> to vector<8xf32>
    %23 = vector.shape_cast %22 : vector<8xf32> to vector<8x1xf32>
    %cst_17 = arith.constant 3.200000e+01 : f32
    %24 = vector.broadcast %cst_17 : f32 to vector<8x1xf32>
    %25 = arith.divf %23, %24 : vector<8x1xf32>
    %cst_18 = arith.constant 9.99999997E-7 : f32
    %26 = vector.broadcast %cst_18 : f32 to vector<8x1xf32>
    %27 = arith.addf %25, %26 : vector<8x1xf32>
    %28 = math.rsqrt %27 : vector<8x1xf32>
    %29 = vector.broadcast %28 : vector<8x1xf32> to vector<8x32xf32>
    %30 = arith.mulf %18, %29 : vector<8x32xf32>
    %31 = vector.broadcast %20 : vector<1x32xf32> to vector<8x32xf32>
    %32 = arith.mulf %30, %31 : vector<8x32xf32>
    %33 = arith.truncf %32 : vector<8x32xf32> to vector<8x32xbf16>
    %c0_19 = arith.constant 0 : index
    %c0_20 = arith.constant 0 : index
    %c0_21 = arith.constant 0 : index
    %34 = vector.load %arg9[%c0_19, %c0_20, %c0_21] : memref<2x32x96xbf16, #tpu.memory_space<vmem>>, vector<1x32x96xbf16>
    %35 = vector.shape_cast %34 : vector<1x32x96xbf16> to vector<32x96xbf16>
    %cst_22 = arith.constant dense<0.000000e+00> : vector<8x96xf32>
    %36 = tpu.matmul %33, %35, %cst_22 {dimension_numbers = #tpu.dot_dimension_numbers<[1], [0], [0], [1], [0, 0, 1, 1], [], []>} : vector<8x32xbf16>, vector<32x96xbf16>, vector<8x96xf32> -> vector<8x96xf32>
    %37 = vector.extract_strided_slice %36 {offsets = [0, 0], sizes = [8, 32], strides = [1, 1]} : vector<8x96xf32> to vector<8x32xf32>
    %38 = vector.extract_strided_slice %36 {offsets = [0, 32], sizes = [8, 32], strides = [1, 1]} : vector<8x96xf32> to vector<8x32xf32>
    %39 = vector.extract_strided_slice %36 {offsets = [0, 64], sizes = [8, 32], strides = [1, 1]} : vector<8x96xf32> to vector<8x32xf32>
    %c0_23 = arith.constant 0 : index
    %c0_24 = arith.constant 0 : index
    %c0_25 = arith.constant 0 : index
    %40 = vector.load %arg10[%c0_23, %c0_24, %c0_25] : memref<2x32x32xbf16, #tpu.memory_space<vmem>>, vector<1x32x32xbf16>
    %41 = vector.shape_cast %40 : vector<1x32x32xbf16> to vector<32x32xbf16>
    %42 = vector.extract_strided_slice %37 {offsets = [0, 0], sizes = [8, 8], strides = [1, 1]} : vector<8x32xf32> to vector<8x8xf32>
    %43 = arith.truncf %42 : vector<8x8xf32> to vector<8x8xbf16>
    %44 = vector.extract_strided_slice %38 {offsets = [0, 0], sizes = [8, 8], strides = [1, 1]} : vector<8x32xf32> to vector<8x8xf32>
    %45 = arith.truncf %44 : vector<8x8xf32> to vector<8x8xbf16>
    %cst_26 = arith.constant dense<0.000000e+00> : vector<8x8xf32>
    %46 = tpu.matmul %43, %45, %cst_26 {dimension_numbers = #tpu.dot_dimension_numbers<[1], [1], [0], [0], [0, 0, 1, 0], [], []>} : vector<8x8xbf16>, vector<8x8xbf16>, vector<8x8xf32> -> vector<8x8xf32>
    %47 = vector.extract_strided_slice %6 {offsets = [0, 0, 0], sizes = [1, 8, 8], strides = [1, 1, 1]} : vector<4x8x8xf32> to vector<1x8x8xf32>
    %48 = vector.shape_cast %47 : vector<1x8x8xf32> to vector<8x8xf32>
    %49 = arith.addf %46, %48 : vector<8x8xf32>
    %cst_27 = arith.constant dense<0xFF800000> : vector<8xf32>
    %50 = vector.multi_reduction <maximumf>, %49, %cst_27 [1] : vector<8x8xf32> to vector<8xf32>
    %51 = vector.shape_cast %50 : vector<8xf32> to vector<8x1xf32>
    %52 = vector.broadcast %51 : vector<8x1xf32> to vector<8x8xf32>
    %53 = arith.subf %49, %52 : vector<8x8xf32>
    %54 = math.exp %53 : vector<8x8xf32>
    %cst_28 = arith.constant dense<0.000000e+00> : vector<8xf32>
    %55 = vector.multi_reduction <add>, %54, %cst_28 [1] : vector<8x8xf32> to vector<8xf32>
    %56 = vector.shape_cast %55 : vector<8xf32> to vector<8x1xf32>
    %57 = tpu.reciprocal %56 {approx = true} : vector<8x1xf32> -> vector<8x1xf32>
    %58 = vector.broadcast %57 : vector<8x1xf32> to vector<8x8xf32>
    %59 = arith.mulf %54, %58 : vector<8x8xf32>
    %60 = arith.truncf %59 : vector<8x8xf32> to vector<8x8xbf16>
    %61 = vector.extract_strided_slice %39 {offsets = [0, 0], sizes = [8, 8], strides = [1, 1]} : vector<8x32xf32> to vector<8x8xf32>
    %62 = arith.truncf %61 : vector<8x8xf32> to vector<8x8xbf16>
    %cst_29 = arith.constant dense<0.000000e+00> : vector<8x8xf32>
    %63 = tpu.matmul %60, %62, %cst_29 {dimension_numbers = #tpu.dot_dimension_numbers<[1], [0], [0], [1], [0, 0, 1, 1], [], []>} : vector<8x8xbf16>, vector<8x8xbf16>, vector<8x8xf32> -> vector<8x8xf32>
    %64 = vector.extract_strided_slice %37 {offsets = [0, 8], sizes = [8, 8], strides = [1, 1]} : vector<8x32xf32> to vector<8x8xf32>
    %65 = arith.truncf %64 : vector<8x8xf32> to vector<8x8xbf16>
    %66 = vector.extract_strided_slice %38 {offsets = [0, 8], sizes = [8, 8], strides = [1, 1]} : vector<8x32xf32> to vector<8x8xf32>
    %67 = arith.truncf %66 : vector<8x8xf32> to vector<8x8xbf16>
    %cst_30 = arith.constant dense<0.000000e+00> : vector<8x8xf32>
    %68 = tpu.matmul %65, %67, %cst_30 {dimension_numbers = #tpu.dot_dimension_numbers<[1], [1], [0], [0], [0, 0, 1, 0], [], []>} : vector<8x8xbf16>, vector<8x8xbf16>, vector<8x8xf32> -> vector<8x8xf32>
    %69 = vector.extract_strided_slice %6 {offsets = [1, 0, 0], sizes = [1, 8, 8], strides = [1, 1, 1]} : vector<4x8x8xf32> to vector<1x8x8xf32>
    %70 = vector.shape_cast %69 : vector<1x8x8xf32> to vector<8x8xf32>
    %71 = arith.addf %68, %70 : vector<8x8xf32>
    %cst_31 = arith.constant dense<0xFF800000> : vector<8xf32>
    %72 = vector.multi_reduction <maximumf>, %71, %cst_31 [1] : vector<8x8xf32> to vector<8xf32>
    %73 = vector.shape_cast %72 : vector<8xf32> to vector<8x1xf32>
    %74 = vector.broadcast %73 : vector<8x1xf32> to vector<8x8xf32>
    %75 = arith.subf %71, %74 : vector<8x8xf32>
    %76 = math.exp %75 : vector<8x8xf32>
    %cst_32 = arith.constant dense<0.000000e+00> : vector<8xf32>
    %77 = vector.multi_reduction <add>, %76, %cst_32 [1] : vector<8x8xf32> to vector<8xf32>
    %78 = vector.shape_cast %77 : vector<8xf32> to vector<8x1xf32>
    %79 = tpu.reciprocal %78 {approx = true} : vector<8x1xf32> -> vector<8x1xf32>
    %80 = vector.broadcast %79 : vector<8x1xf32> to vector<8x8xf32>
    %81 = arith.mulf %76, %80 : vector<8x8xf32>
    %82 = arith.truncf %81 : vector<8x8xf32> to vector<8x8xbf16>
    %83 = vector.extract_strided_slice %39 {offsets = [0, 8], sizes = [8, 8], strides = [1, 1]} : vector<8x32xf32> to vector<8x8xf32>
    %84 = arith.truncf %83 : vector<8x8xf32> to vector<8x8xbf16>
    %cst_33 = arith.constant dense<0.000000e+00> : vector<8x8xf32>
    %85 = tpu.matmul %82, %84, %cst_33 {dimension_numbers = #tpu.dot_dimension_numbers<[1], [0], [0], [1], [0, 0, 1, 1], [], []>} : vector<8x8xbf16>, vector<8x8xbf16>, vector<8x8xf32> -> vector<8x8xf32>
    %86 = vector.extract_strided_slice %37 {offsets = [0, 16], sizes = [8, 8], strides = [1, 1]} : vector<8x32xf32> to vector<8x8xf32>
    %87 = arith.truncf %86 : vector<8x8xf32> to vector<8x8xbf16>
    %88 = vector.extract_strided_slice %38 {offsets = [0, 16], sizes = [8, 8], strides = [1, 1]} : vector<8x32xf32> to vector<8x8xf32>
    %89 = arith.truncf %88 : vector<8x8xf32> to vector<8x8xbf16>
    %cst_34 = arith.constant dense<0.000000e+00> : vector<8x8xf32>
    %90 = tpu.matmul %87, %89, %cst_34 {dimension_numbers = #tpu.dot_dimension_numbers<[1], [1], [0], [0], [0, 0, 1, 0], [], []>} : vector<8x8xbf16>, vector<8x8xbf16>, vector<8x8xf32> -> vector<8x8xf32>
    %91 = vector.extract_strided_slice %6 {offsets = [2, 0, 0], sizes = [1, 8, 8], strides = [1, 1, 1]} : vector<4x8x8xf32> to vector<1x8x8xf32>
    %92 = vector.shape_cast %91 : vector<1x8x8xf32> to vector<8x8xf32>
    %93 = arith.addf %90, %92 : vector<8x8xf32>
    %cst_35 = arith.constant dense<0xFF800000> : vector<8xf32>
    %94 = vector.multi_reduction <maximumf>, %93, %cst_35 [1] : vector<8x8xf32> to vector<8xf32>
    %95 = vector.shape_cast %94 : vector<8xf32> to vector<8x1xf32>
    %96 = vector.broadcast %95 : vector<8x1xf32> to vector<8x8xf32>
    %97 = arith.subf %93, %96 : vector<8x8xf32>
    %98 = math.exp %97 : vector<8x8xf32>
    %cst_36 = arith.constant dense<0.000000e+00> : vector<8xf32>
    %99 = vector.multi_reduction <add>, %98, %cst_36 [1] : vector<8x8xf32> to vector<8xf32>
    %100 = vector.shape_cast %99 : vector<8xf32> to vector<8x1xf32>
    %101 = tpu.reciprocal %100 {approx = true} : vector<8x1xf32> -> vector<8x1xf32>
    %102 = vector.broadcast %101 : vector<8x1xf32> to vector<8x8xf32>
    %103 = arith.mulf %98, %102 : vector<8x8xf32>
    %104 = arith.truncf %103 : vector<8x8xf32> to vector<8x8xbf16>
    %105 = vector.extract_strided_slice %39 {offsets = [0, 16], sizes = [8, 8], strides = [1, 1]} : vector<8x32xf32> to vector<8x8xf32>
    %106 = arith.truncf %105 : vector<8x8xf32> to vector<8x8xbf16>
    %cst_37 = arith.constant dense<0.000000e+00> : vector<8x8xf32>
    %107 = tpu.matmul %104, %106, %cst_37 {dimension_numbers = #tpu.dot_dimension_numbers<[1], [0], [0], [1], [0, 0, 1, 1], [], []>} : vector<8x8xbf16>, vector<8x8xbf16>, vector<8x8xf32> -> vector<8x8xf32>
    %108 = vector.extract_strided_slice %37 {offsets = [0, 24], sizes = [8, 8], strides = [1, 1]} : vector<8x32xf32> to vector<8x8xf32>
    %109 = arith.truncf %108 : vector<8x8xf32> to vector<8x8xbf16>
    %110 = vector.extract_strided_slice %38 {offsets = [0, 24], sizes = [8, 8], strides = [1, 1]} : vector<8x32xf32> to vector<8x8xf32>
    %111 = arith.truncf %110 : vector<8x8xf32> to vector<8x8xbf16>
    %cst_38 = arith.constant dense<0.000000e+00> : vector<8x8xf32>
    %112 = tpu.matmul %109, %111, %cst_38 {dimension_numbers = #tpu.dot_dimension_numbers<[1], [1], [0], [0], [0, 0, 1, 0], [], []>} : vector<8x8xbf16>, vector<8x8xbf16>, vector<8x8xf32> -> vector<8x8xf32>
    %113 = vector.extract_strided_slice %6 {offsets = [3, 0, 0], sizes = [1, 8, 8], strides = [1, 1, 1]} : vector<4x8x8xf32> to vector<1x8x8xf32>
    %114 = vector.shape_cast %113 : vector<1x8x8xf32> to vector<8x8xf32>
    %115 = arith.addf %112, %114 : vector<8x8xf32>
    %cst_39 = arith.constant dense<0xFF800000> : vector<8xf32>
    %116 = vector.multi_reduction <maximumf>, %115, %cst_39 [1] : vector<8x8xf32> to vector<8xf32>
    %117 = vector.shape_cast %116 : vector<8xf32> to vector<8x1xf32>
    %118 = vector.broadcast %117 : vector<8x1xf32> to vector<8x8xf32>
    %119 = arith.subf %115, %118 : vector<8x8xf32>
    %120 = math.exp %119 : vector<8x8xf32>
    %cst_40 = arith.constant dense<0.000000e+00> : vector<8xf32>
    %121 = vector.multi_reduction <add>, %120, %cst_40 [1] : vector<8x8xf32> to vector<8xf32>
    %122 = vector.shape_cast %121 : vector<8xf32> to vector<8x1xf32>
    %123 = tpu.reciprocal %122 {approx = true} : vector<8x1xf32> -> vector<8x1xf32>
    %124 = vector.broadcast %123 : vector<8x1xf32> to vector<8x8xf32>
    %125 = arith.mulf %120, %124 : vector<8x8xf32>
    %126 = arith.truncf %125 : vector<8x8xf32> to vector<8x8xbf16>
    %127 = vector.extract_strided_slice %39 {offsets = [0, 24], sizes = [8, 8], strides = [1, 1]} : vector<8x32xf32> to vector<8x8xf32>
    %128 = arith.truncf %127 : vector<8x8xf32> to vector<8x8xbf16>
    %cst_41 = arith.constant dense<0.000000e+00> : vector<8x8xf32>
    %129 = tpu.matmul %126, %128, %cst_41 {dimension_numbers = #tpu.dot_dimension_numbers<[1], [0], [0], [1], [0, 0, 1, 1], [], []>} : vector<8x8xbf16>, vector<8x8xbf16>, vector<8x8xf32> -> vector<8x8xf32>
    %130 = tpu.concatenate %63, %85, %107, %129 in 1 : vector<8x8xf32>, vector<8x8xf32>, vector<8x8xf32>, vector<8x8xf32> -> vector<8x32xf32>
    %131 = arith.truncf %130 : vector<8x32xf32> to vector<8x32xbf16>
    %cst_42 = arith.constant dense<0.000000e+00> : vector<8x32xf32>
    %132 = tpu.matmul %131, %41, %cst_42 {dimension_numbers = #tpu.dot_dimension_numbers<[1], [0], [0], [1], [0, 0, 1, 1], [], []>} : vector<8x32xbf16>, vector<32x32xbf16>, vector<8x32xf32> -> vector<8x32xf32>
    %133 = arith.addf %18, %132 : vector<8x32xf32>
    %c0_43 = arith.constant 0 : index
    %c0_44 = arith.constant 0 : index
    %c0_45 = arith.constant 0 : index
    %134 = vector.load %arg11[%c0_43, %c0_44, %c0_45] : memref<2x1x32xf32, #tpu.memory_space<vmem>>, vector<1x1x32xf32>
    %135 = vector.shape_cast %134 : vector<1x1x32xf32> to vector<1x32xf32>
    %c0_46 = arith.constant 0 : index
    %c0_47 = arith.constant 0 : index
    %c0_48 = arith.constant 0 : index
    %136 = vector.load %arg12[%c0_46, %c0_47, %c0_48] : memref<2x32x64xbf16, #tpu.memory_space<vmem>>, vector<1x32x64xbf16>
    %137 = vector.shape_cast %136 : vector<1x32x64xbf16> to vector<32x64xbf16>
    %c0_49 = arith.constant 0 : index
    %c0_50 = arith.constant 0 : index
    %c0_51 = arith.constant 0 : index
    %138 = vector.load %arg13[%c0_49, %c0_50, %c0_51] : memref<2x32x64xbf16, #tpu.memory_space<vmem>>, vector<1x32x64xbf16>
    %139 = vector.shape_cast %138 : vector<1x32x64xbf16> to vector<32x64xbf16>
    %c0_52 = arith.constant 0 : index
    %c0_53 = arith.constant 0 : index
    %c0_54 = arith.constant 0 : index
    %140 = vector.load %arg14[%c0_52, %c0_53, %c0_54] : memref<2x64x32xbf16, #tpu.memory_space<vmem>>, vector<1x64x32xbf16>
    %141 = vector.shape_cast %140 : vector<1x64x32xbf16> to vector<64x32xbf16>
    %142 = arith.mulf %133, %133 : vector<8x32xf32>
    %cst_55 = arith.constant dense<0.000000e+00> : vector<8xf32>
    %143 = vector.multi_reduction <add>, %142, %cst_55 [1] : vector<8x32xf32> to vector<8xf32>
    %144 = vector.shape_cast %143 : vector<8xf32> to vector<8x1xf32>
    %cst_56 = arith.constant 3.200000e+01 : f32
    %145 = vector.broadcast %cst_56 : f32 to vector<8x1xf32>
    %146 = arith.divf %144, %145 : vector<8x1xf32>
    %cst_57 = arith.constant 9.99999997E-7 : f32
    %147 = vector.broadcast %cst_57 : f32 to vector<8x1xf32>
    %148 = arith.addf %146, %147 : vector<8x1xf32>
    %149 = math.rsqrt %148 : vector<8x1xf32>
    %150 = vector.broadcast %149 : vector<8x1xf32> to vector<8x32xf32>
    %151 = arith.mulf %133, %150 : vector<8x32xf32>
    %152 = vector.broadcast %135 : vector<1x32xf32> to vector<8x32xf32>
    %153 = arith.mulf %151, %152 : vector<8x32xf32>
    %154 = arith.truncf %153 : vector<8x32xf32> to vector<8x32xbf16>
    %cst_58 = arith.constant dense<0.000000e+00> : vector<8x64xf32>
    %155 = tpu.matmul %154, %137, %cst_58 {dimension_numbers = #tpu.dot_dimension_numbers<[1], [0], [0], [1], [0, 0, 1, 1], [], []>} : vector<8x32xbf16>, vector<32x64xbf16>, vector<8x64xf32> -> vector<8x64xf32>
    %156 = arith.mulf %155, %155 : vector<8x64xf32>
    %157 = arith.mulf %155, %156 : vector<8x64xf32>
    %cst_59 = arith.constant 4.471500e-02 : f32
    %158 = vector.broadcast %cst_59 : f32 to vector<8x64xf32>
    %159 = arith.mulf %158, %157 : vector<8x64xf32>
    %160 = arith.addf %155, %159 : vector<8x64xf32>
    %cst_60 = arith.constant 0.797884583 : f32
    %161 = vector.broadcast %cst_60 : f32 to vector<8x64xf32>
    %162 = arith.mulf %161, %160 : vector<8x64xf32>
    %163 = math.tanh %162 : vector<8x64xf32>
    %cst_61 = arith.constant 1.000000e+00 : f32
    %164 = vector.broadcast %cst_61 : f32 to vector<8x64xf32>
    %165 = arith.addf %164, %163 : vector<8x64xf32>
    %cst_62 = arith.constant 5.000000e-01 : f32
    %166 = vector.broadcast %cst_62 : f32 to vector<8x64xf32>
    %167 = arith.mulf %166, %165 : vector<8x64xf32>
    %168 = arith.mulf %155, %167 : vector<8x64xf32>
    %cst_63 = arith.constant dense<0.000000e+00> : vector<8x64xf32>
    %169 = tpu.matmul %154, %139, %cst_63 {dimension_numbers = #tpu.dot_dimension_numbers<[1], [0], [0], [1], [0, 0, 1, 1], [], []>} : vector<8x32xbf16>, vector<32x64xbf16>, vector<8x64xf32> -> vector<8x64xf32>
    %170 = arith.mulf %168, %169 : vector<8x64xf32>
    %171 = arith.truncf %170 : vector<8x64xf32> to vector<8x64xbf16>
    %cst_64 = arith.constant dense<0.000000e+00> : vector<8x32xf32>
    %172 = tpu.matmul %171, %141, %cst_64 {dimension_numbers = #tpu.dot_dimension_numbers<[1], [0], [0], [1], [0, 0, 1, 1], [], []>} : vector<8x64xbf16>, vector<64x32xbf16>, vector<8x32xf32> -> vector<8x32xf32>
    %173 = arith.addf %133, %172 : vector<8x32xf32>
    %c1 = arith.constant 1 : index
    %c0_65 = arith.constant 0 : index
    %c0_66 = arith.constant 0 : index
    %174 = vector.load %arg8[%c1, %c0_65, %c0_66] : memref<2x1x32xf32, #tpu.memory_space<vmem>>, vector<1x1x32xf32>
    %175 = vector.shape_cast %174 : vector<1x1x32xf32> to vector<1x32xf32>
    %176 = arith.mulf %173, %173 : vector<8x32xf32>
    %cst_67 = arith.constant dense<0.000000e+00> : vector<8xf32>
    %177 = vector.multi_reduction <add>, %176, %cst_67 [1] : vector<8x32xf32> to vector<8xf32>
    %178 = vector.shape_cast %177 : vector<8xf32> to vector<8x1xf32>
    %cst_68 = arith.constant 3.200000e+01 : f32
    %179 = vector.broadcast %cst_68 : f32 to vector<8x1xf32>
    %180 = arith.divf %178, %179 : vector<8x1xf32>
    %cst_69 = arith.constant 9.99999997E-7 : f32
    %181 = vector.broadcast %cst_69 : f32 to vector<8x1xf32>
    %182 = arith.addf %180, %181 : vector<8x1xf32>
    %183 = math.rsqrt %182 : vector<8x1xf32>
    %184 = vector.broadcast %183 : vector<8x1xf32> to vector<8x32xf32>
    %185 = arith.mulf %173, %184 : vector<8x32xf32>
    %186 = vector.broadcast %175 : vector<1x32xf32> to vector<8x32xf32>
    %187 = arith.mulf %185, %186 : vector<8x32xf32>
    %188 = arith.truncf %187 : vector<8x32xf32> to vector<8x32xbf16>
    %c1_70 = arith.constant 1 : index
    %c0_71 = arith.constant 0 : index
    %c0_72 = arith.constant 0 : index
    %189 = vector.load %arg9[%c1_70, %c0_71, %c0_72] : memref<2x32x96xbf16, #tpu.memory_space<vmem>>, vector<1x32x96xbf16>
    %190 = vector.shape_cast %189 : vector<1x32x96xbf16> to vector<32x96xbf16>
    %cst_73 = arith.constant dense<0.000000e+00> : vector<8x96xf32>
    %191 = tpu.matmul %188, %190, %cst_73 {dimension_numbers = #tpu.dot_dimension_numbers<[1], [0], [0], [1], [0, 0, 1, 1], [], []>} : vector<8x32xbf16>, vector<32x96xbf16>, vector<8x96xf32> -> vector<8x96xf32>
    %192 = vector.extract_strided_slice %191 {offsets = [0, 0], sizes = [8, 32], strides = [1, 1]} : vector<8x96xf32> to vector<8x32xf32>
    %193 = vector.extract_strided_slice %191 {offsets = [0, 32], sizes = [8, 32], strides = [1, 1]} : vector<8x96xf32> to vector<8x32xf32>
    %194 = vector.extract_strided_slice %191 {offsets = [0, 64], sizes = [8, 32], strides = [1, 1]} : vector<8x96xf32> to vector<8x32xf32>
    %c1_74 = arith.constant 1 : index
    %c0_75 = arith.constant 0 : index
    %c0_76 = arith.constant 0 : index
    %195 = vector.load %arg10[%c1_74, %c0_75, %c0_76] : memref<2x32x32xbf16, #tpu.memory_space<vmem>>, vector<1x32x32xbf16>
    %196 = vector.shape_cast %195 : vector<1x32x32xbf16> to vector<32x32xbf16>
    %197 = vector.extract_strided_slice %192 {offsets = [0, 0], sizes = [8, 8], strides = [1, 1]} : vector<8x32xf32> to vector<8x8xf32>
    %198 = arith.truncf %197 : vector<8x8xf32> to vector<8x8xbf16>
    %199 = vector.extract_strided_slice %193 {offsets = [0, 0], sizes = [8, 8], strides = [1, 1]} : vector<8x32xf32> to vector<8x8xf32>
    %200 = arith.truncf %199 : vector<8x8xf32> to vector<8x8xbf16>
    %cst_77 = arith.constant dense<0.000000e+00> : vector<8x8xf32>
    %201 = tpu.matmul %198, %200, %cst_77 {dimension_numbers = #tpu.dot_dimension_numbers<[1], [1], [0], [0], [0, 0, 1, 0], [], []>} : vector<8x8xbf16>, vector<8x8xbf16>, vector<8x8xf32> -> vector<8x8xf32>
    %202 = vector.extract_strided_slice %6 {offsets = [0, 0, 0], sizes = [1, 8, 8], strides = [1, 1, 1]} : vector<4x8x8xf32> to vector<1x8x8xf32>
    %203 = vector.shape_cast %202 : vector<1x8x8xf32> to vector<8x8xf32>
    %204 = arith.addf %201, %203 : vector<8x8xf32>
    %cst_78 = arith.constant dense<0xFF800000> : vector<8xf32>
    %205 = vector.multi_reduction <maximumf>, %204, %cst_78 [1] : vector<8x8xf32> to vector<8xf32>
    %206 = vector.shape_cast %205 : vector<8xf32> to vector<8x1xf32>
    %207 = vector.broadcast %206 : vector<8x1xf32> to vector<8x8xf32>
    %208 = arith.subf %204, %207 : vector<8x8xf32>
    %209 = math.exp %208 : vector<8x8xf32>
    %cst_79 = arith.constant dense<0.000000e+00> : vector<8xf32>
    %210 = vector.multi_reduction <add>, %209, %cst_79 [1] : vector<8x8xf32> to vector<8xf32>
    %211 = vector.shape_cast %210 : vector<8xf32> to vector<8x1xf32>
    %212 = tpu.reciprocal %211 {approx = true} : vector<8x1xf32> -> vector<8x1xf32>
    %213 = vector.broadcast %212 : vector<8x1xf32> to vector<8x8xf32>
    %214 = arith.mulf %209, %213 : vector<8x8xf32>
    %215 = arith.truncf %214 : vector<8x8xf32> to vector<8x8xbf16>
    %216 = vector.extract_strided_slice %194 {offsets = [0, 0], sizes = [8, 8], strides = [1, 1]} : vector<8x32xf32> to vector<8x8xf32>
    %217 = arith.truncf %216 : vector<8x8xf32> to vector<8x8xbf16>
    %cst_80 = arith.constant dense<0.000000e+00> : vector<8x8xf32>
    %218 = tpu.matmul %215, %217, %cst_80 {dimension_numbers = #tpu.dot_dimension_numbers<[1], [0], [0], [1], [0, 0, 1, 1], [], []>} : vector<8x8xbf16>, vector<8x8xbf16>, vector<8x8xf32> -> vector<8x8xf32>
    %219 = vector.extract_strided_slice %192 {offsets = [0, 8], sizes = [8, 8], strides = [1, 1]} : vector<8x32xf32> to vector<8x8xf32>
    %220 = arith.truncf %219 : vector<8x8xf32> to vector<8x8xbf16>
    %221 = vector.extract_strided_slice %193 {offsets = [0, 8], sizes = [8, 8], strides = [1, 1]} : vector<8x32xf32> to vector<8x8xf32>
    %222 = arith.truncf %221 : vector<8x8xf32> to vector<8x8xbf16>
    %cst_81 = arith.constant dense<0.000000e+00> : vector<8x8xf32>
    %223 = tpu.matmul %220, %222, %cst_81 {dimension_numbers = #tpu.dot_dimension_numbers<[1], [1], [0], [0], [0, 0, 1, 0], [], []>} : vector<8x8xbf16>, vector<8x8xbf16>, vector<8x8xf32> -> vector<8x8xf32>
    %224 = vector.extract_strided_slice %6 {offsets = [1, 0, 0], sizes = [1, 8, 8], strides = [1, 1, 1]} : vector<4x8x8xf32> to vector<1x8x8xf32>
    %225 = vector.shape_cast %224 : vector<1x8x8xf32> to vector<8x8xf32>
    %226 = arith.addf %223, %225 : vector<8x8xf32>
    %cst_82 = arith.constant dense<0xFF800000> : vector<8xf32>
    %227 = vector.multi_reduction <maximumf>, %226, %cst_82 [1] : vector<8x8xf32> to vector<8xf32>
    %228 = vector.shape_cast %227 : vector<8xf32> to vector<8x1xf32>
    %229 = vector.broadcast %228 : vector<8x1xf32> to vector<8x8xf32>
    %230 = arith.subf %226, %229 : vector<8x8xf32>
    %231 = math.exp %230 : vector<8x8xf32>
    %cst_83 = arith.constant dense<0.000000e+00> : vector<8xf32>
    %232 = vector.multi_reduction <add>, %231, %cst_83 [1] : vector<8x8xf32> to vector<8xf32>
    %233 = vector.shape_cast %232 : vector<8xf32> to vector<8x1xf32>
    %234 = tpu.reciprocal %233 {approx = true} : vector<8x1xf32> -> vector<8x1xf32>
    %235 = vector.broadcast %234 : vector<8x1xf32> to vector<8x8xf32>
    %236 = arith.mulf %231, %235 : vector<8x8xf32>
    %237 = arith.truncf %236 : vector<8x8xf32> to vector<8x8xbf16>
    %238 = vector.extract_strided_slice %194 {offsets = [0, 8], sizes = [8, 8], strides = [1, 1]} : vector<8x32xf32> to vector<8x8xf32>
    %239 = arith.truncf %238 : vector<8x8xf32> to vector<8x8xbf16>
    %cst_84 = arith.constant dense<0.000000e+00> : vector<8x8xf32>
    %240 = tpu.matmul %237, %239, %cst_84 {dimension_numbers = #tpu.dot_dimension_numbers<[1], [0], [0], [1], [0, 0, 1, 1], [], []>} : vector<8x8xbf16>, vector<8x8xbf16>, vector<8x8xf32> -> vector<8x8xf32>
    %241 = vector.extract_strided_slice %192 {offsets = [0, 16], sizes = [8, 8], strides = [1, 1]} : vector<8x32xf32> to vector<8x8xf32>
    %242 = arith.truncf %241 : vector<8x8xf32> to vector<8x8xbf16>
    %243 = vector.extract_strided_slice %193 {offsets = [0, 16], sizes = [8, 8], strides = [1, 1]} : vector<8x32xf32> to vector<8x8xf32>
    %244 = arith.truncf %243 : vector<8x8xf32> to vector<8x8xbf16>
    %cst_85 = arith.constant dense<0.000000e+00> : vector<8x8xf32>
    %245 = tpu.matmul %242, %244, %cst_85 {dimension_numbers = #tpu.dot_dimension_numbers<[1], [1], [0], [0], [0, 0, 1, 0], [], []>} : vector<8x8xbf16>, vector<8x8xbf16>, vector<8x8xf32> -> vector<8x8xf32>
    %246 = vector.extract_strided_slice %6 {offsets = [2, 0, 0], sizes = [1, 8, 8], strides = [1, 1, 1]} : vector<4x8x8xf32> to vector<1x8x8xf32>
    %247 = vector.shape_cast %246 : vector<1x8x8xf32> to vector<8x8xf32>
    %248 = arith.addf %245, %247 : vector<8x8xf32>
    %cst_86 = arith.constant dense<0xFF800000> : vector<8xf32>
    %249 = vector.multi_reduction <maximumf>, %248, %cst_86 [1] : vector<8x8xf32> to vector<8xf32>
    %250 = vector.shape_cast %249 : vector<8xf32> to vector<8x1xf32>
    %251 = vector.broadcast %250 : vector<8x1xf32> to vector<8x8xf32>
    %252 = arith.subf %248, %251 : vector<8x8xf32>
    %253 = math.exp %252 : vector<8x8xf32>
    %cst_87 = arith.constant dense<0.000000e+00> : vector<8xf32>
    %254 = vector.multi_reduction <add>, %253, %cst_87 [1] : vector<8x8xf32> to vector<8xf32>
    %255 = vector.shape_cast %254 : vector<8xf32> to vector<8x1xf32>
    %256 = tpu.reciprocal %255 {approx = true} : vector<8x1xf32> -> vector<8x1xf32>
    %257 = vector.broadcast %256 : vector<8x1xf32> to vector<8x8xf32>
    %258 = arith.mulf %253, %257 : vector<8x8xf32>
    %259 = arith.truncf %258 : vector<8x8xf32> to vector<8x8xbf16>
    %260 = vector.extract_strided_slice %194 {offsets = [0, 16], sizes = [8, 8], strides = [1, 1]} : vector<8x32xf32> to vector<8x8xf32>
    %261 = arith.truncf %260 : vector<8x8xf32> to vector<8x8xbf16>
    %cst_88 = arith.constant dense<0.000000e+00> : vector<8x8xf32>
    %262 = tpu.matmul %259, %261, %cst_88 {dimension_numbers = #tpu.dot_dimension_numbers<[1], [0], [0], [1], [0, 0, 1, 1], [], []>} : vector<8x8xbf16>, vector<8x8xbf16>, vector<8x8xf32> -> vector<8x8xf32>
    %263 = vector.extract_strided_slice %192 {offsets = [0, 24], sizes = [8, 8], strides = [1, 1]} : vector<8x32xf32> to vector<8x8xf32>
    %264 = arith.truncf %263 : vector<8x8xf32> to vector<8x8xbf16>
    %265 = vector.extract_strided_slice %193 {offsets = [0, 24], sizes = [8, 8], strides = [1, 1]} : vector<8x32xf32> to vector<8x8xf32>
    %266 = arith.truncf %265 : vector<8x8xf32> to vector<8x8xbf16>
    %cst_89 = arith.constant dense<0.000000e+00> : vector<8x8xf32>
    %267 = tpu.matmul %264, %266, %cst_89 {dimension_numbers = #tpu.dot_dimension_numbers<[1], [1], [0], [0], [0, 0, 1, 0], [], []>} : vector<8x8xbf16>, vector<8x8xbf16>, vector<8x8xf32> -> vector<8x8xf32>
    %268 = vector.extract_strided_slice %6 {offsets = [3, 0, 0], sizes = [1, 8, 8], strides = [1, 1, 1]} : vector<4x8x8xf32> to vector<1x8x8xf32>
    %269 = vector.shape_cast %268 : vector<1x8x8xf32> to vector<8x8xf32>
    %270 = arith.addf %267, %269 : vector<8x8xf32>
    %cst_90 = arith.constant dense<0xFF800000> : vector<8xf32>
    %271 = vector.multi_reduction <maximumf>, %270, %cst_90 [1] : vector<8x8xf32> to vector<8xf32>
    %272 = vector.shape_cast %271 : vector<8xf32> to vector<8x1xf32>
    %273 = vector.broadcast %272 : vector<8x1xf32> to vector<8x8xf32>
    %274 = arith.subf %270, %273 : vector<8x8xf32>
    %275 = math.exp %274 : vector<8x8xf32>
    %cst_91 = arith.constant dense<0.000000e+00> : vector<8xf32>
    %276 = vector.multi_reduction <add>, %275, %cst_91 [1] : vector<8x8xf32> to vector<8xf32>
    %277 = vector.shape_cast %276 : vector<8xf32> to vector<8x1xf32>
    %278 = tpu.reciprocal %277 {approx = true} : vector<8x1xf32> -> vector<8x1xf32>
    %279 = vector.broadcast %278 : vector<8x1xf32> to vector<8x8xf32>
    %280 = arith.mulf %275, %279 : vector<8x8xf32>
    %281 = arith.truncf %280 : vector<8x8xf32> to vector<8x8xbf16>
    %282 = vector.extract_strided_slice %194 {offsets = [0, 24], sizes = [8, 8], strides = [1, 1]} : vector<8x32xf32> to vector<8x8xf32>
    %283 = arith.truncf %282 : vector<8x8xf32> to vector<8x8xbf16>
    %cst_92 = arith.constant dense<0.000000e+00> : vector<8x8xf32>
    %284 = tpu.matmul %281, %283, %cst_92 {dimension_numbers = #tpu.dot_dimension_numbers<[1], [0], [0], [1], [0, 0, 1, 1], [], []>} : vector<8x8xbf16>, vector<8x8xbf16>, vector<8x8xf32> -> vector<8x8xf32>
    %285 = tpu.concatenate %218, %240, %262, %284 in 1 : vector<8x8xf32>, vector<8x8xf32>, vector<8x8xf32>, vector<8x8xf32> -> vector<8x32xf32>
    %286 = arith.truncf %285 : vector<8x32xf32> to vector<8x32xbf16>
    %cst_93 = arith.constant dense<0.000000e+00> : vector<8x32xf32>
    %287 = tpu.matmul %286, %196, %cst_93 {dimension_numbers = #tpu.dot_dimension_numbers<[1], [0], [0], [1], [0, 0, 1, 1], [], []>} : vector<8x32xbf16>, vector<32x32xbf16>, vector<8x32xf32> -> vector<8x32xf32>
    %288 = arith.addf %173, %287 : vector<8x32xf32>
    %c1_94 = arith.constant 1 : index
    %c0_95 = arith.constant 0 : index
    %c0_96 = arith.constant 0 : index
    %289 = vector.load %arg11[%c1_94, %c0_95, %c0_96] : memref<2x1x32xf32, #tpu.memory_space<vmem>>, vector<1x1x32xf32>
    %290 = vector.shape_cast %289 : vector<1x1x32xf32> to vector<1x32xf32>
    %c1_97 = arith.constant 1 : index
    %c0_98 = arith.constant 0 : index
    %c0_99 = arith.constant 0 : index
    %291 = vector.load %arg12[%c1_97, %c0_98, %c0_99] : memref<2x32x64xbf16, #tpu.memory_space<vmem>>, vector<1x32x64xbf16>
    %292 = vector.shape_cast %291 : vector<1x32x64xbf16> to vector<32x64xbf16>
    %c1_100 = arith.constant 1 : index
    %c0_101 = arith.constant 0 : index
    %c0_102 = arith.constant 0 : index
    %293 = vector.load %arg13[%c1_100, %c0_101, %c0_102] : memref<2x32x64xbf16, #tpu.memory_space<vmem>>, vector<1x32x64xbf16>
    %294 = vector.shape_cast %293 : vector<1x32x64xbf16> to vector<32x64xbf16>
    %c1_103 = arith.constant 1 : index
    %c0_104 = arith.constant 0 : index
    %c0_105 = arith.constant 0 : index
    %295 = vector.load %arg14[%c1_103, %c0_104, %c0_105] : memref<2x64x32xbf16, #tpu.memory_space<vmem>>, vector<1x64x32xbf16>
    %296 = vector.shape_cast %295 : vector<1x64x32xbf16> to vector<64x32xbf16>
    %297 = arith.mulf %288, %288 : vector<8x32xf32>
    %cst_106 = arith.constant dense<0.000000e+00> : vector<8xf32>
    %298 = vector.multi_reduction <add>, %297, %cst_106 [1] : vector<8x32xf32> to vector<8xf32>
    %299 = vector.shape_cast %298 : vector<8xf32> to vector<8x1xf32>
    %cst_107 = arith.constant 3.200000e+01 : f32
    %300 = vector.broadcast %cst_107 : f32 to vector<8x1xf32>
    %301 = arith.divf %299, %300 : vector<8x1xf32>
    %cst_108 = arith.constant 9.99999997E-7 : f32
    %302 = vector.broadcast %cst_108 : f32 to vector<8x1xf32>
    %303 = arith.addf %301, %302 : vector<8x1xf32>
    %304 = math.rsqrt %303 : vector<8x1xf32>
    %305 = vector.broadcast %304 : vector<8x1xf32> to vector<8x32xf32>
    %306 = arith.mulf %288, %305 : vector<8x32xf32>
    %307 = vector.broadcast %290 : vector<1x32xf32> to vector<8x32xf32>
    %308 = arith.mulf %306, %307 : vector<8x32xf32>
    %309 = arith.truncf %308 : vector<8x32xf32> to vector<8x32xbf16>
    %cst_109 = arith.constant dense<0.000000e+00> : vector<8x64xf32>
    %310 = tpu.matmul %309, %292, %cst_109 {dimension_numbers = #tpu.dot_dimension_numbers<[1], [0], [0], [1], [0, 0, 1, 1], [], []>} : vector<8x32xbf16>, vector<32x64xbf16>, vector<8x64xf32> -> vector<8x64xf32>
    %311 = arith.mulf %310, %310 : vector<8x64xf32>
    %312 = arith.mulf %310, %311 : vector<8x64xf32>
    %cst_110 = arith.constant 4.471500e-02 : f32
    %313 = vector.broadcast %cst_110 : f32 to vector<8x64xf32>
    %314 = arith.mulf %313, %312 : vector<8x64xf32>
    %315 = arith.addf %310, %314 : vector<8x64xf32>
    %cst_111 = arith.constant 0.797884583 : f32
    %316 = vector.broadcast %cst_111 : f32 to vector<8x64xf32>
    %317 = arith.mulf %316, %315 : vector<8x64xf32>
    %318 = math.tanh %317 : vector<8x64xf32>
    %cst_112 = arith.constant 1.000000e+00 : f32
    %319 = vector.broadcast %cst_112 : f32 to vector<8x64xf32>
    %320 = arith.addf %319, %318 : vector<8x64xf32>
    %cst_113 = arith.constant 5.000000e-01 : f32
    %321 = vector.broadcast %cst_113 : f32 to vector<8x64xf32>
    %322 = arith.mulf %321, %320 : vector<8x64xf32>
    %323 = arith.mulf %310, %322 : vector<8x64xf32>
    %cst_114 = arith.constant dense<0.000000e+00> : vector<8x64xf32>
    %324 = tpu.matmul %309, %294, %cst_114 {dimension_numbers = #tpu.dot_dimension_numbers<[1], [0], [0], [1], [0, 0, 1, 1], [], []>} : vector<8x32xbf16>, vector<32x64xbf16>, vector<8x64xf32> -> vector<8x64xf32>
    %325 = arith.mulf %323, %324 : vector<8x64xf32>
    %326 = arith.truncf %325 : vector<8x64xf32> to vector<8x64xbf16>
    %cst_115 = arith.constant dense<0.000000e+00> : vector<8x32xf32>
    %327 = tpu.matmul %326, %296, %cst_115 {dimension_numbers = #tpu.dot_dimension_numbers<[1], [0], [0], [1], [0, 0, 1, 1], [], []>} : vector<8x64xbf16>, vector<64x32xbf16>, vector<8x32xf32> -> vector<8x32xf32>
    %328 = arith.addf %288, %327 : vector<8x32xf32>
    %c0_116 = arith.constant 0 : index
    %c0_117 = arith.constant 0 : index
    %329 = vector.load %arg15[%c0_116, %c0_117] : memref<1x32xf32, #tpu.memory_space<vmem>>, vector<1x32xf32>
    %330 = arith.mulf %328, %328 : vector<8x32xf32>
    %cst_118 = arith.constant dense<0.000000e+00> : vector<8xf32>
    %331 = vector.multi_reduction <add>, %330, %cst_118 [1] : vector<8x32xf32> to vector<8xf32>
    %332 = vector.shape_cast %331 : vector<8xf32> to vector<8x1xf32>
    %cst_119 = arith.constant 3.200000e+01 : f32
    %333 = vector.broadcast %cst_119 : f32 to vector<8x1xf32>
    %334 = arith.divf %332, %333 : vector<8x1xf32>
    %cst_120 = arith.constant 9.99999997E-7 : f32
    %335 = vector.broadcast %cst_120 : f32 to vector<8x1xf32>
    %336 = arith.addf %334, %335 : vector<8x1xf32>
    %337 = math.rsqrt %336 : vector<8x1xf32>
    %338 = vector.broadcast %337 : vector<8x1xf32> to vector<8x32xf32>
    %339 = arith.mulf %328, %338 : vector<8x32xf32>
    %340 = vector.broadcast %329 : vector<1x32xf32> to vector<8x32xf32>
    %341 = arith.mulf %339, %340 : vector<8x32xf32>
    %342 = arith.truncf %341 : vector<8x32xf32> to vector<8x32xbf16>
    %c0_121 = arith.constant 0 : index
    %c0_122 = arith.constant 0 : index
    %c0_123 = arith.constant 0 : index
    %343 = vector.load %arg2[%c0_121, %c0_122, %c0_123] : memref<1x8x1xi32, #tpu.memory_space<vmem>>, vector<1x8x1xi32>
    %344 = vector.shape_cast %343 : vector<1x8x1xi32> to vector<8x1xi32>
    %345 = tpu.iota {dimensions = array<i32: 1>} : vector<8x64xi32>
    %346 = vector.broadcast %344 : vector<8x1xi32> to vector<8x64xi32>
    %347 = arith.cmpi eq, %345, %346 : vector<8x64xi32>
    %348 = arith.extui %347 : vector<8x64xi1> to vector<8x64xi32>
    %349 = arith.sitofp %348 : vector<8x64xi32> to vector<8x64xf32>
    %cst_124 = arith.constant dense<0.000000e+00> : vector<8x32xf32>
    %350 = tpu.matmul %349, %0, %cst_124 {dimension_numbers = #tpu.dot_dimension_numbers<[1], [0], [0], [1], [0, 0, 1, 1], [], []>} : vector<8x64xf32>, vector<64x32xf32>, vector<8x32xf32> -> vector<8x32xf32>
    %c0_125 = arith.constant 0 : index
    %c0_126 = arith.constant 0 : index
    %c0_127 = arith.constant 0 : index
    %351 = vector.load %arg16[%c0_125, %c0_126, %c0_127] : memref<2x1x32xf32, #tpu.memory_space<vmem>>, vector<1x1x32xf32>
    %352 = vector.shape_cast %351 : vector<1x1x32xf32> to vector<1x32xf32>
    %353 = arith.mulf %350, %350 : vector<8x32xf32>
    %cst_128 = arith.constant dense<0.000000e+00> : vector<8xf32>
    %354 = vector.multi_reduction <add>, %353, %cst_128 [1] : vector<8x32xf32> to vector<8xf32>
    %355 = vector.shape_cast %354 : vector<8xf32> to vector<8x1xf32>
    %cst_129 = arith.constant 3.200000e+01 : f32
    %356 = vector.broadcast %cst_129 : f32 to vector<8x1xf32>
    %357 = arith.divf %355, %356 : vector<8x1xf32>
    %cst_130 = arith.constant 9.99999997E-7 : f32
    %358 = vector.broadcast %cst_130 : f32 to vector<8x1xf32>
    %359 = arith.addf %357, %358 : vector<8x1xf32>
    %360 = math.rsqrt %359 : vector<8x1xf32>
    %361 = vector.broadcast %360 : vector<8x1xf32> to vector<8x32xf32>
    %362 = arith.mulf %350, %361 : vector<8x32xf32>
    %363 = vector.broadcast %352 : vector<1x32xf32> to vector<8x32xf32>
    %364 = arith.mulf %362, %363 : vector<8x32xf32>
    %365 = arith.truncf %364 : vector<8x32xf32> to vector<8x32xbf16>
    %c0_131 = arith.constant 0 : index
    %c0_132 = arith.constant 0 : index
    %c0_133 = arith.constant 0 : index
    %366 = vector.load %arg17[%c0_131, %c0_132, %c0_133] : memref<2x32x96xbf16, #tpu.memory_space<vmem>>, vector<1x32x96xbf16>
    %367 = vector.shape_cast %366 : vector<1x32x96xbf16> to vector<32x96xbf16>
    %cst_134 = arith.constant dense<0.000000e+00> : vector<8x96xf32>
    %368 = tpu.matmul %365, %367, %cst_134 {dimension_numbers = #tpu.dot_dimension_numbers<[1], [0], [0], [1], [0, 0, 1, 1], [], []>} : vector<8x32xbf16>, vector<32x96xbf16>, vector<8x96xf32> -> vector<8x96xf32>
    %369 = vector.extract_strided_slice %368 {offsets = [0, 0], sizes = [8, 32], strides = [1, 1]} : vector<8x96xf32> to vector<8x32xf32>
    %370 = vector.extract_strided_slice %368 {offsets = [0, 32], sizes = [8, 32], strides = [1, 1]} : vector<8x96xf32> to vector<8x32xf32>
    %371 = vector.extract_strided_slice %368 {offsets = [0, 64], sizes = [8, 32], strides = [1, 1]} : vector<8x96xf32> to vector<8x32xf32>
    %c0_135 = arith.constant 0 : index
    %c0_136 = arith.constant 0 : index
    %c0_137 = arith.constant 0 : index
    %372 = vector.load %arg18[%c0_135, %c0_136, %c0_137] : memref<2x32x32xbf16, #tpu.memory_space<vmem>>, vector<1x32x32xbf16>
    %373 = vector.shape_cast %372 : vector<1x32x32xbf16> to vector<32x32xbf16>
    %374 = vector.extract_strided_slice %369 {offsets = [0, 0], sizes = [8, 8], strides = [1, 1]} : vector<8x32xf32> to vector<8x8xf32>
    %375 = arith.truncf %374 : vector<8x8xf32> to vector<8x8xbf16>
    %376 = vector.extract_strided_slice %370 {offsets = [0, 0], sizes = [8, 8], strides = [1, 1]} : vector<8x32xf32> to vector<8x8xf32>
    %377 = arith.truncf %376 : vector<8x8xf32> to vector<8x8xbf16>
    %cst_138 = arith.constant dense<0.000000e+00> : vector<8x8xf32>
    %378 = tpu.matmul %375, %377, %cst_138 {dimension_numbers = #tpu.dot_dimension_numbers<[1], [1], [0], [0], [0, 0, 1, 0], [], []>} : vector<8x8xbf16>, vector<8x8xbf16>, vector<8x8xf32> -> vector<8x8xf32>
    %379 = vector.extract_strided_slice %7 {offsets = [0, 0, 0], sizes = [1, 8, 8], strides = [1, 1, 1]} : vector<4x8x8xf32> to vector<1x8x8xf32>
    %380 = vector.shape_cast %379 : vector<1x8x8xf32> to vector<8x8xf32>
    %381 = arith.addf %378, %380 : vector<8x8xf32>
    %cst_139 = arith.constant dense<0xFF800000> : vector<8xf32>
    %382 = vector.multi_reduction <maximumf>, %381, %cst_139 [1] : vector<8x8xf32> to vector<8xf32>
    %383 = vector.shape_cast %382 : vector<8xf32> to vector<8x1xf32>
    %384 = vector.broadcast %383 : vector<8x1xf32> to vector<8x8xf32>
    %385 = arith.subf %381, %384 : vector<8x8xf32>
    %386 = math.exp %385 : vector<8x8xf32>
    %cst_140 = arith.constant dense<0.000000e+00> : vector<8xf32>
    %387 = vector.multi_reduction <add>, %386, %cst_140 [1] : vector<8x8xf32> to vector<8xf32>
    %388 = vector.shape_cast %387 : vector<8xf32> to vector<8x1xf32>
    %389 = tpu.reciprocal %388 {approx = true} : vector<8x1xf32> -> vector<8x1xf32>
    %390 = vector.broadcast %389 : vector<8x1xf32> to vector<8x8xf32>
    %391 = arith.mulf %386, %390 : vector<8x8xf32>
    %392 = arith.truncf %391 : vector<8x8xf32> to vector<8x8xbf16>
    %393 = vector.extract_strided_slice %371 {offsets = [0, 0], sizes = [8, 8], strides = [1, 1]} : vector<8x32xf32> to vector<8x8xf32>
    %394 = arith.truncf %393 : vector<8x8xf32> to vector<8x8xbf16>
    %cst_141 = arith.constant dense<0.000000e+00> : vector<8x8xf32>
    %395 = tpu.matmul %392, %394, %cst_141 {dimension_numbers = #tpu.dot_dimension_numbers<[1], [0], [0], [1], [0, 0, 1, 1], [], []>} : vector<8x8xbf16>, vector<8x8xbf16>, vector<8x8xf32> -> vector<8x8xf32>
    %396 = vector.extract_strided_slice %369 {offsets = [0, 8], sizes = [8, 8], strides = [1, 1]} : vector<8x32xf32> to vector<8x8xf32>
    %397 = arith.truncf %396 : vector<8x8xf32> to vector<8x8xbf16>
    %398 = vector.extract_strided_slice %370 {offsets = [0, 8], sizes = [8, 8], strides = [1, 1]} : vector<8x32xf32> to vector<8x8xf32>
    %399 = arith.truncf %398 : vector<8x8xf32> to vector<8x8xbf16>
    %cst_142 = arith.constant dense<0.000000e+00> : vector<8x8xf32>
    %400 = tpu.matmul %397, %399, %cst_142 {dimension_numbers = #tpu.dot_dimension_numbers<[1], [1], [0], [0], [0, 0, 1, 0], [], []>} : vector<8x8xbf16>, vector<8x8xbf16>, vector<8x8xf32> -> vector<8x8xf32>
    %401 = vector.extract_strided_slice %7 {offsets = [1, 0, 0], sizes = [1, 8, 8], strides = [1, 1, 1]} : vector<4x8x8xf32> to vector<1x8x8xf32>
    %402 = vector.shape_cast %401 : vector<1x8x8xf32> to vector<8x8xf32>
    %403 = arith.addf %400, %402 : vector<8x8xf32>
    %cst_143 = arith.constant dense<0xFF800000> : vector<8xf32>
    %404 = vector.multi_reduction <maximumf>, %403, %cst_143 [1] : vector<8x8xf32> to vector<8xf32>
    %405 = vector.shape_cast %404 : vector<8xf32> to vector<8x1xf32>
    %406 = vector.broadcast %405 : vector<8x1xf32> to vector<8x8xf32>
    %407 = arith.subf %403, %406 : vector<8x8xf32>
    %408 = math.exp %407 : vector<8x8xf32>
    %cst_144 = arith.constant dense<0.000000e+00> : vector<8xf32>
    %409 = vector.multi_reduction <add>, %408, %cst_144 [1] : vector<8x8xf32> to vector<8xf32>
    %410 = vector.shape_cast %409 : vector<8xf32> to vector<8x1xf32>
    %411 = tpu.reciprocal %410 {approx = true} : vector<8x1xf32> -> vector<8x1xf32>
    %412 = vector.broadcast %411 : vector<8x1xf32> to vector<8x8xf32>
    %413 = arith.mulf %408, %412 : vector<8x8xf32>
    %414 = arith.truncf %413 : vector<8x8xf32> to vector<8x8xbf16>
    %415 = vector.extract_strided_slice %371 {offsets = [0, 8], sizes = [8, 8], strides = [1, 1]} : vector<8x32xf32> to vector<8x8xf32>
    %416 = arith.truncf %415 : vector<8x8xf32> to vector<8x8xbf16>
    %cst_145 = arith.constant dense<0.000000e+00> : vector<8x8xf32>
    %417 = tpu.matmul %414, %416, %cst_145 {dimension_numbers = #tpu.dot_dimension_numbers<[1], [0], [0], [1], [0, 0, 1, 1], [], []>} : vector<8x8xbf16>, vector<8x8xbf16>, vector<8x8xf32> -> vector<8x8xf32>
    %418 = vector.extract_strided_slice %369 {offsets = [0, 16], sizes = [8, 8], strides = [1, 1]} : vector<8x32xf32> to vector<8x8xf32>
    %419 = arith.truncf %418 : vector<8x8xf32> to vector<8x8xbf16>
    %420 = vector.extract_strided_slice %370 {offsets = [0, 16], sizes = [8, 8], strides = [1, 1]} : vector<8x32xf32> to vector<8x8xf32>
    %421 = arith.truncf %420 : vector<8x8xf32> to vector<8x8xbf16>
    %cst_146 = arith.constant dense<0.000000e+00> : vector<8x8xf32>
    %422 = tpu.matmul %419, %421, %cst_146 {dimension_numbers = #tpu.dot_dimension_numbers<[1], [1], [0], [0], [0, 0, 1, 0], [], []>} : vector<8x8xbf16>, vector<8x8xbf16>, vector<8x8xf32> -> vector<8x8xf32>
    %423 = vector.extract_strided_slice %7 {offsets = [2, 0, 0], sizes = [1, 8, 8], strides = [1, 1, 1]} : vector<4x8x8xf32> to vector<1x8x8xf32>
    %424 = vector.shape_cast %423 : vector<1x8x8xf32> to vector<8x8xf32>
    %425 = arith.addf %422, %424 : vector<8x8xf32>
    %cst_147 = arith.constant dense<0xFF800000> : vector<8xf32>
    %426 = vector.multi_reduction <maximumf>, %425, %cst_147 [1] : vector<8x8xf32> to vector<8xf32>
    %427 = vector.shape_cast %426 : vector<8xf32> to vector<8x1xf32>
    %428 = vector.broadcast %427 : vector<8x1xf32> to vector<8x8xf32>
    %429 = arith.subf %425, %428 : vector<8x8xf32>
    %430 = math.exp %429 : vector<8x8xf32>
    %cst_148 = arith.constant dense<0.000000e+00> : vector<8xf32>
    %431 = vector.multi_reduction <add>, %430, %cst_148 [1] : vector<8x8xf32> to vector<8xf32>
    %432 = vector.shape_cast %431 : vector<8xf32> to vector<8x1xf32>
    %433 = tpu.reciprocal %432 {approx = true} : vector<8x1xf32> -> vector<8x1xf32>
    %434 = vector.broadcast %433 : vector<8x1xf32> to vector<8x8xf32>
    %435 = arith.mulf %430, %434 : vector<8x8xf32>
    %436 = arith.truncf %435 : vector<8x8xf32> to vector<8x8xbf16>
    %437 = vector.extract_strided_slice %371 {offsets = [0, 16], sizes = [8, 8], strides = [1, 1]} : vector<8x32xf32> to vector<8x8xf32>
    %438 = arith.truncf %437 : vector<8x8xf32> to vector<8x8xbf16>
    %cst_149 = arith.constant dense<0.000000e+00> : vector<8x8xf32>
    %439 = tpu.matmul %436, %438, %cst_149 {dimension_numbers = #tpu.dot_dimension_numbers<[1], [0], [0], [1], [0, 0, 1, 1], [], []>} : vector<8x8xbf16>, vector<8x8xbf16>, vector<8x8xf32> -> vector<8x8xf32>
    %440 = vector.extract_strided_slice %369 {offsets = [0, 24], sizes = [8, 8], strides = [1, 1]} : vector<8x32xf32> to vector<8x8xf32>
    %441 = arith.truncf %440 : vector<8x8xf32> to vector<8x8xbf16>
    %442 = vector.extract_strided_slice %370 {offsets = [0, 24], sizes = [8, 8], strides = [1, 1]} : vector<8x32xf32> to vector<8x8xf32>
    %443 = arith.truncf %442 : vector<8x8xf32> to vector<8x8xbf16>
    %cst_150 = arith.constant dense<0.000000e+00> : vector<8x8xf32>
    %444 = tpu.matmul %441, %443, %cst_150 {dimension_numbers = #tpu.dot_dimension_numbers<[1], [1], [0], [0], [0, 0, 1, 0], [], []>} : vector<8x8xbf16>, vector<8x8xbf16>, vector<8x8xf32> -> vector<8x8xf32>
    %445 = vector.extract_strided_slice %7 {offsets = [3, 0, 0], sizes = [1, 8, 8], strides = [1, 1, 1]} : vector<4x8x8xf32> to vector<1x8x8xf32>
    %446 = vector.shape_cast %445 : vector<1x8x8xf32> to vector<8x8xf32>
    %447 = arith.addf %444, %446 : vector<8x8xf32>
    %cst_151 = arith.constant dense<0xFF800000> : vector<8xf32>
    %448 = vector.multi_reduction <maximumf>, %447, %cst_151 [1] : vector<8x8xf32> to vector<8xf32>
    %449 = vector.shape_cast %448 : vector<8xf32> to vector<8x1xf32>
    %450 = vector.broadcast %449 : vector<8x1xf32> to vector<8x8xf32>
    %451 = arith.subf %447, %450 : vector<8x8xf32>
    %452 = math.exp %451 : vector<8x8xf32>
    %cst_152 = arith.constant dense<0.000000e+00> : vector<8xf32>
    %453 = vector.multi_reduction <add>, %452, %cst_152 [1] : vector<8x8xf32> to vector<8xf32>
    %454 = vector.shape_cast %453 : vector<8xf32> to vector<8x1xf32>
    %455 = tpu.reciprocal %454 {approx = true} : vector<8x1xf32> -> vector<8x1xf32>
    %456 = vector.broadcast %455 : vector<8x1xf32> to vector<8x8xf32>
    %457 = arith.mulf %452, %456 : vector<8x8xf32>
    %458 = arith.truncf %457 : vector<8x8xf32> to vector<8x8xbf16>
    %459 = vector.extract_strided_slice %371 {offsets = [0, 24], sizes = [8, 8], strides = [1, 1]} : vector<8x32xf32> to vector<8x8xf32>
    %460 = arith.truncf %459 : vector<8x8xf32> to vector<8x8xbf16>
    %cst_153 = arith.constant dense<0.000000e+00> : vector<8x8xf32>
    %461 = tpu.matmul %458, %460, %cst_153 {dimension_numbers = #tpu.dot_dimension_numbers<[1], [0], [0], [1], [0, 0, 1, 1], [], []>} : vector<8x8xbf16>, vector<8x8xbf16>, vector<8x8xf32> -> vector<8x8xf32>
    %462 = tpu.concatenate %395, %417, %439, %461 in 1 : vector<8x8xf32>, vector<8x8xf32>, vector<8x8xf32>, vector<8x8xf32> -> vector<8x32xf32>
    %463 = arith.truncf %462 : vector<8x32xf32> to vector<8x32xbf16>
    %cst_154 = arith.constant dense<0.000000e+00> : vector<8x32xf32>
    %464 = tpu.matmul %463, %373, %cst_154 {dimension_numbers = #tpu.dot_dimension_numbers<[1], [0], [0], [1], [0, 0, 1, 1], [], []>} : vector<8x32xbf16>, vector<32x32xbf16>, vector<8x32xf32> -> vector<8x32xf32>
    %465 = arith.addf %350, %464 : vector<8x32xf32>
    %c0_155 = arith.constant 0 : index
    %c0_156 = arith.constant 0 : index
    %c0_157 = arith.constant 0 : index
    %466 = vector.load %arg19[%c0_155, %c0_156, %c0_157] : memref<2x1x32xf32, #tpu.memory_space<vmem>>, vector<1x1x32xf32>
    %467 = vector.shape_cast %466 : vector<1x1x32xf32> to vector<1x32xf32>
    %468 = arith.mulf %465, %465 : vector<8x32xf32>
    %cst_158 = arith.constant dense<0.000000e+00> : vector<8xf32>
    %469 = vector.multi_reduction <add>, %468, %cst_158 [1] : vector<8x32xf32> to vector<8xf32>
    %470 = vector.shape_cast %469 : vector<8xf32> to vector<8x1xf32>
    %cst_159 = arith.constant 3.200000e+01 : f32
    %471 = vector.broadcast %cst_159 : f32 to vector<8x1xf32>
    %472 = arith.divf %470, %471 : vector<8x1xf32>
    %cst_160 = arith.constant 9.99999997E-7 : f32
    %473 = vector.broadcast %cst_160 : f32 to vector<8x1xf32>
    %474 = arith.addf %472, %473 : vector<8x1xf32>
    %475 = math.rsqrt %474 : vector<8x1xf32>
    %476 = vector.broadcast %475 : vector<8x1xf32> to vector<8x32xf32>
    %477 = arith.mulf %465, %476 : vector<8x32xf32>
    %478 = vector.broadcast %467 : vector<1x32xf32> to vector<8x32xf32>
    %479 = arith.mulf %477, %478 : vector<8x32xf32>
    %480 = arith.truncf %479 : vector<8x32xf32> to vector<8x32xbf16>
    %c0_161 = arith.constant 0 : index
    %c0_162 = arith.constant 0 : index
    %c0_163 = arith.constant 0 : index
    %481 = vector.load %arg20[%c0_161, %c0_162, %c0_163] : memref<2x32x32xbf16, #tpu.memory_space<vmem>>, vector<1x32x32xbf16>
    %482 = vector.shape_cast %481 : vector<1x32x32xbf16> to vector<32x32xbf16>
    %cst_164 = arith.constant dense<0.000000e+00> : vector<8x32xf32>
    %483 = tpu.matmul %480, %482, %cst_164 {dimension_numbers = #tpu.dot_dimension_numbers<[1], [0], [0], [1], [0, 0, 1, 1], [], []>} : vector<8x32xbf16>, vector<32x32xbf16>, vector<8x32xf32> -> vector<8x32xf32>
    %c0_165 = arith.constant 0 : index
    %c0_166 = arith.constant 0 : index
    %c0_167 = arith.constant 0 : index
    %484 = vector.load %arg21[%c0_165, %c0_166, %c0_167] : memref<2x32x64xbf16, #tpu.memory_space<vmem>>, vector<1x32x64xbf16>
    %485 = vector.shape_cast %484 : vector<1x32x64xbf16> to vector<32x64xbf16>
    %cst_168 = arith.constant dense<0.000000e+00> : vector<8x64xf32>
    %486 = tpu.matmul %342, %485, %cst_168 {dimension_numbers = #tpu.dot_dimension_numbers<[1], [0], [0], [1], [0, 0, 1, 1], [], []>} : vector<8x32xbf16>, vector<32x64xbf16>, vector<8x64xf32> -> vector<8x64xf32>
    %487 = vector.extract_strided_slice %486 {offsets = [0, 0], sizes = [8, 32], strides = [1, 1]} : vector<8x64xf32> to vector<8x32xf32>
    %488 = vector.extract_strided_slice %486 {offsets = [0, 32], sizes = [8, 32], strides = [1, 1]} : vector<8x64xf32> to vector<8x32xf32>
    %c0_169 = arith.constant 0 : index
    %c0_170 = arith.constant 0 : index
    %c0_171 = arith.constant 0 : index
    %489 = vector.load %arg22[%c0_169, %c0_170, %c0_171] : memref<2x32x32xbf16, #tpu.memory_space<vmem>>, vector<1x32x32xbf16>
    %490 = vector.shape_cast %489 : vector<1x32x32xbf16> to vector<32x32xbf16>
    %491 = vector.extract_strided_slice %483 {offsets = [0, 0], sizes = [8, 8], strides = [1, 1]} : vector<8x32xf32> to vector<8x8xf32>
    %492 = arith.truncf %491 : vector<8x8xf32> to vector<8x8xbf16>
    %493 = vector.extract_strided_slice %487 {offsets = [0, 0], sizes = [8, 8], strides = [1, 1]} : vector<8x32xf32> to vector<8x8xf32>
    %494 = arith.truncf %493 : vector<8x8xf32> to vector<8x8xbf16>
    %cst_172 = arith.constant dense<0.000000e+00> : vector<8x8xf32>
    %495 = tpu.matmul %492, %494, %cst_172 {dimension_numbers = #tpu.dot_dimension_numbers<[1], [1], [0], [0], [0, 0, 1, 0], [], []>} : vector<8x8xbf16>, vector<8x8xbf16>, vector<8x8xf32> -> vector<8x8xf32>
    %496 = vector.extract_strided_slice %10 {offsets = [0, 0, 0], sizes = [1, 8, 8], strides = [1, 1, 1]} : vector<4x8x8xf32> to vector<1x8x8xf32>
    %497 = vector.shape_cast %496 : vector<1x8x8xf32> to vector<8x8xf32>
    %498 = arith.addf %495, %497 : vector<8x8xf32>
    %cst_173 = arith.constant dense<0xFF800000> : vector<8xf32>
    %499 = vector.multi_reduction <maximumf>, %498, %cst_173 [1] : vector<8x8xf32> to vector<8xf32>
    %500 = vector.shape_cast %499 : vector<8xf32> to vector<8x1xf32>
    %501 = vector.broadcast %500 : vector<8x1xf32> to vector<8x8xf32>
    %502 = arith.subf %498, %501 : vector<8x8xf32>
    %503 = math.exp %502 : vector<8x8xf32>
    %cst_174 = arith.constant dense<0.000000e+00> : vector<8xf32>
    %504 = vector.multi_reduction <add>, %503, %cst_174 [1] : vector<8x8xf32> to vector<8xf32>
    %505 = vector.shape_cast %504 : vector<8xf32> to vector<8x1xf32>
    %506 = tpu.reciprocal %505 {approx = true} : vector<8x1xf32> -> vector<8x1xf32>
    %507 = vector.broadcast %506 : vector<8x1xf32> to vector<8x8xf32>
    %508 = arith.mulf %503, %507 : vector<8x8xf32>
    %509 = arith.truncf %508 : vector<8x8xf32> to vector<8x8xbf16>
    %510 = vector.extract_strided_slice %488 {offsets = [0, 0], sizes = [8, 8], strides = [1, 1]} : vector<8x32xf32> to vector<8x8xf32>
    %511 = arith.truncf %510 : vector<8x8xf32> to vector<8x8xbf16>
    %cst_175 = arith.constant dense<0.000000e+00> : vector<8x8xf32>
    %512 = tpu.matmul %509, %511, %cst_175 {dimension_numbers = #tpu.dot_dimension_numbers<[1], [0], [0], [1], [0, 0, 1, 1], [], []>} : vector<8x8xbf16>, vector<8x8xbf16>, vector<8x8xf32> -> vector<8x8xf32>
    %513 = vector.extract_strided_slice %483 {offsets = [0, 8], sizes = [8, 8], strides = [1, 1]} : vector<8x32xf32> to vector<8x8xf32>
    %514 = arith.truncf %513 : vector<8x8xf32> to vector<8x8xbf16>
    %515 = vector.extract_strided_slice %487 {offsets = [0, 8], sizes = [8, 8], strides = [1, 1]} : vector<8x32xf32> to vector<8x8xf32>
    %516 = arith.truncf %515 : vector<8x8xf32> to vector<8x8xbf16>
    %cst_176 = arith.constant dense<0.000000e+00> : vector<8x8xf32>
    %517 = tpu.matmul %514, %516, %cst_176 {dimension_numbers = #tpu.dot_dimension_numbers<[1], [1], [0], [0], [0, 0, 1, 0], [], []>} : vector<8x8xbf16>, vector<8x8xbf16>, vector<8x8xf32> -> vector<8x8xf32>
    %518 = vector.extract_strided_slice %10 {offsets = [1, 0, 0], sizes = [1, 8, 8], strides = [1, 1, 1]} : vector<4x8x8xf32> to vector<1x8x8xf32>
    %519 = vector.shape_cast %518 : vector<1x8x8xf32> to vector<8x8xf32>
    %520 = arith.addf %517, %519 : vector<8x8xf32>
    %cst_177 = arith.constant dense<0xFF800000> : vector<8xf32>
    %521 = vector.multi_reduction <maximumf>, %520, %cst_177 [1] : vector<8x8xf32> to vector<8xf32>
    %522 = vector.shape_cast %521 : vector<8xf32> to vector<8x1xf32>
    %523 = vector.broadcast %522 : vector<8x1xf32> to vector<8x8xf32>
    %524 = arith.subf %520, %523 : vector<8x8xf32>
    %525 = math.exp %524 : vector<8x8xf32>
    %cst_178 = arith.constant dense<0.000000e+00> : vector<8xf32>
    %526 = vector.multi_reduction <add>, %525, %cst_178 [1] : vector<8x8xf32> to vector<8xf32>
    %527 = vector.shape_cast %526 : vector<8xf32> to vector<8x1xf32>
    %528 = tpu.reciprocal %527 {approx = true} : vector<8x1xf32> -> vector<8x1xf32>
    %529 = vector.broadcast %528 : vector<8x1xf32> to vector<8x8xf32>
    %530 = arith.mulf %525, %529 : vector<8x8xf32>
    %531 = arith.truncf %530 : vector<8x8xf32> to vector<8x8xbf16>
    %532 = vector.extract_strided_slice %488 {offsets = [0, 8], sizes = [8, 8], strides = [1, 1]} : vector<8x32xf32> to vector<8x8xf32>
    %533 = arith.truncf %532 : vector<8x8xf32> to vector<8x8xbf16>
    %cst_179 = arith.constant dense<0.000000e+00> : vector<8x8xf32>
    %534 = tpu.matmul %531, %533, %cst_179 {dimension_numbers = #tpu.dot_dimension_numbers<[1], [0], [0], [1], [0, 0, 1, 1], [], []>} : vector<8x8xbf16>, vector<8x8xbf16>, vector<8x8xf32> -> vector<8x8xf32>
    %535 = vector.extract_strided_slice %483 {offsets = [0, 16], sizes = [8, 8], strides = [1, 1]} : vector<8x32xf32> to vector<8x8xf32>
    %536 = arith.truncf %535 : vector<8x8xf32> to vector<8x8xbf16>
    %537 = vector.extract_strided_slice %487 {offsets = [0, 16], sizes = [8, 8], strides = [1, 1]} : vector<8x32xf32> to vector<8x8xf32>
    %538 = arith.truncf %537 : vector<8x8xf32> to vector<8x8xbf16>
    %cst_180 = arith.constant dense<0.000000e+00> : vector<8x8xf32>
    %539 = tpu.matmul %536, %538, %cst_180 {dimension_numbers = #tpu.dot_dimension_numbers<[1], [1], [0], [0], [0, 0, 1, 0], [], []>} : vector<8x8xbf16>, vector<8x8xbf16>, vector<8x8xf32> -> vector<8x8xf32>
    %540 = vector.extract_strided_slice %10 {offsets = [2, 0, 0], sizes = [1, 8, 8], strides = [1, 1, 1]} : vector<4x8x8xf32> to vector<1x8x8xf32>
    %541 = vector.shape_cast %540 : vector<1x8x8xf32> to vector<8x8xf32>
    %542 = arith.addf %539, %541 : vector<8x8xf32>
    %cst_181 = arith.constant dense<0xFF800000> : vector<8xf32>
    %543 = vector.multi_reduction <maximumf>, %542, %cst_181 [1] : vector<8x8xf32> to vector<8xf32>
    %544 = vector.shape_cast %543 : vector<8xf32> to vector<8x1xf32>
    %545 = vector.broadcast %544 : vector<8x1xf32> to vector<8x8xf32>
    %546 = arith.subf %542, %545 : vector<8x8xf32>
    %547 = math.exp %546 : vector<8x8xf32>
    %cst_182 = arith.constant dense<0.000000e+00> : vector<8xf32>
    %548 = vector.multi_reduction <add>, %547, %cst_182 [1] : vector<8x8xf32> to vector<8xf32>
    %549 = vector.shape_cast %548 : vector<8xf32> to vector<8x1xf32>
    %550 = tpu.reciprocal %549 {approx = true} : vector<8x1xf32> -> vector<8x1xf32>
    %551 = vector.broadcast %550 : vector<8x1xf32> to vector<8x8xf32>
    %552 = arith.mulf %547, %551 : vector<8x8xf32>
    %553 = arith.truncf %552 : vector<8x8xf32> to vector<8x8xbf16>
    %554 = vector.extract_strided_slice %488 {offsets = [0, 16], sizes = [8, 8], strides = [1, 1]} : vector<8x32xf32> to vector<8x8xf32>
    %555 = arith.truncf %554 : vector<8x8xf32> to vector<8x8xbf16>
    %cst_183 = arith.constant dense<0.000000e+00> : vector<8x8xf32>
    %556 = tpu.matmul %553, %555, %cst_183 {dimension_numbers = #tpu.dot_dimension_numbers<[1], [0], [0], [1], [0, 0, 1, 1], [], []>} : vector<8x8xbf16>, vector<8x8xbf16>, vector<8x8xf32> -> vector<8x8xf32>
    %557 = vector.extract_strided_slice %483 {offsets = [0, 24], sizes = [8, 8], strides = [1, 1]} : vector<8x32xf32> to vector<8x8xf32>
    %558 = arith.truncf %557 : vector<8x8xf32> to vector<8x8xbf16>
    %559 = vector.extract_strided_slice %487 {offsets = [0, 24], sizes = [8, 8], strides = [1, 1]} : vector<8x32xf32> to vector<8x8xf32>
    %560 = arith.truncf %559 : vector<8x8xf32> to vector<8x8xbf16>
    %cst_184 = arith.constant dense<0.000000e+00> : vector<8x8xf32>
    %561 = tpu.matmul %558, %560, %cst_184 {dimension_numbers = #tpu.dot_dimension_numbers<[1], [1], [0], [0], [0, 0, 1, 0], [], []>} : vector<8x8xbf16>, vector<8x8xbf16>, vector<8x8xf32> -> vector<8x8xf32>
    %562 = vector.extract_strided_slice %10 {offsets = [3, 0, 0], sizes = [1, 8, 8], strides = [1, 1, 1]} : vector<4x8x8xf32> to vector<1x8x8xf32>
    %563 = vector.shape_cast %562 : vector<1x8x8xf32> to vector<8x8xf32>
    %564 = arith.addf %561, %563 : vector<8x8xf32>
    %cst_185 = arith.constant dense<0xFF800000> : vector<8xf32>
    %565 = vector.multi_reduction <maximumf>, %564, %cst_185 [1] : vector<8x8xf32> to vector<8xf32>
    %566 = vector.shape_cast %565 : vector<8xf32> to vector<8x1xf32>
    %567 = vector.broadcast %566 : vector<8x1xf32> to vector<8x8xf32>
    %568 = arith.subf %564, %567 : vector<8x8xf32>
    %569 = math.exp %568 : vector<8x8xf32>
    %cst_186 = arith.constant dense<0.000000e+00> : vector<8xf32>
    %570 = vector.multi_reduction <add>, %569, %cst_186 [1] : vector<8x8xf32> to vector<8xf32>
    %571 = vector.shape_cast %570 : vector<8xf32> to vector<8x1xf32>
    %572 = tpu.reciprocal %571 {approx = true} : vector<8x1xf32> -> vector<8x1xf32>
    %573 = vector.broadcast %572 : vector<8x1xf32> to vector<8x8xf32>
    %574 = arith.mulf %569, %573 : vector<8x8xf32>
    %575 = arith.truncf %574 : vector<8x8xf32> to vector<8x8xbf16>
    %576 = vector.extract_strided_slice %488 {offsets = [0, 24], sizes = [8, 8], strides = [1, 1]} : vector<8x32xf32> to vector<8x8xf32>
    %577 = arith.truncf %576 : vector<8x8xf32> to vector<8x8xbf16>
    %cst_187 = arith.constant dense<0.000000e+00> : vector<8x8xf32>
    %578 = tpu.matmul %575, %577, %cst_187 {dimension_numbers = #tpu.dot_dimension_numbers<[1], [0], [0], [1], [0, 0, 1, 1], [], []>} : vector<8x8xbf16>, vector<8x8xbf16>, vector<8x8xf32> -> vector<8x8xf32>
    %579 = tpu.concatenate %512, %534, %556, %578 in 1 : vector<8x8xf32>, vector<8x8xf32>, vector<8x8xf32>, vector<8x8xf32> -> vector<8x32xf32>
    %580 = arith.truncf %579 : vector<8x32xf32> to vector<8x32xbf16>
    %cst_188 = arith.constant dense<0.000000e+00> : vector<8x32xf32>
    %581 = tpu.matmul %580, %490, %cst_188 {dimension_numbers = #tpu.dot_dimension_numbers<[1], [0], [0], [1], [0, 0, 1, 1], [], []>} : vector<8x32xbf16>, vector<32x32xbf16>, vector<8x32xf32> -> vector<8x32xf32>
    %582 = arith.addf %465, %581 : vector<8x32xf32>
    %c0_189 = arith.constant 0 : index
    %c0_190 = arith.constant 0 : index
    %c0_191 = arith.constant 0 : index
    %583 = vector.load %arg23[%c0_189, %c0_190, %c0_191] : memref<2x1x32xf32, #tpu.memory_space<vmem>>, vector<1x1x32xf32>
    %584 = vector.shape_cast %583 : vector<1x1x32xf32> to vector<1x32xf32>
    %c0_192 = arith.constant 0 : index
    %c0_193 = arith.constant 0 : index
    %c0_194 = arith.constant 0 : index
    %585 = vector.load %arg24[%c0_192, %c0_193, %c0_194] : memref<2x32x64xbf16, #tpu.memory_space<vmem>>, vector<1x32x64xbf16>
    %586 = vector.shape_cast %585 : vector<1x32x64xbf16> to vector<32x64xbf16>
    %c0_195 = arith.constant 0 : index
    %c0_196 = arith.constant 0 : index
    %c0_197 = arith.constant 0 : index
    %587 = vector.load %arg25[%c0_195, %c0_196, %c0_197] : memref<2x32x64xbf16, #tpu.memory_space<vmem>>, vector<1x32x64xbf16>
    %588 = vector.shape_cast %587 : vector<1x32x64xbf16> to vector<32x64xbf16>
    %c0_198 = arith.constant 0 : index
    %c0_199 = arith.constant 0 : index
    %c0_200 = arith.constant 0 : index
    %589 = vector.load %arg26[%c0_198, %c0_199, %c0_200] : memref<2x64x32xbf16, #tpu.memory_space<vmem>>, vector<1x64x32xbf16>
    %590 = vector.shape_cast %589 : vector<1x64x32xbf16> to vector<64x32xbf16>
    %591 = arith.mulf %582, %582 : vector<8x32xf32>
    %cst_201 = arith.constant dense<0.000000e+00> : vector<8xf32>
    %592 = vector.multi_reduction <add>, %591, %cst_201 [1] : vector<8x32xf32> to vector<8xf32>
    %593 = vector.shape_cast %592 : vector<8xf32> to vector<8x1xf32>
    %cst_202 = arith.constant 3.200000e+01 : f32
    %594 = vector.broadcast %cst_202 : f32 to vector<8x1xf32>
    %595 = arith.divf %593, %594 : vector<8x1xf32>
    %cst_203 = arith.constant 9.99999997E-7 : f32
    %596 = vector.broadcast %cst_203 : f32 to vector<8x1xf32>
    %597 = arith.addf %595, %596 : vector<8x1xf32>
    %598 = math.rsqrt %597 : vector<8x1xf32>
    %599 = vector.broadcast %598 : vector<8x1xf32> to vector<8x32xf32>
    %600 = arith.mulf %582, %599 : vector<8x32xf32>
    %601 = vector.broadcast %584 : vector<1x32xf32> to vector<8x32xf32>
    %602 = arith.mulf %600, %601 : vector<8x32xf32>
    %603 = arith.truncf %602 : vector<8x32xf32> to vector<8x32xbf16>
    %cst_204 = arith.constant dense<0.000000e+00> : vector<8x64xf32>
    %604 = tpu.matmul %603, %586, %cst_204 {dimension_numbers = #tpu.dot_dimension_numbers<[1], [0], [0], [1], [0, 0, 1, 1], [], []>} : vector<8x32xbf16>, vector<32x64xbf16>, vector<8x64xf32> -> vector<8x64xf32>
    %605 = arith.mulf %604, %604 : vector<8x64xf32>
    %606 = arith.mulf %604, %605 : vector<8x64xf32>
    %cst_205 = arith.constant 4.471500e-02 : f32
    %607 = vector.broadcast %cst_205 : f32 to vector<8x64xf32>
    %608 = arith.mulf %607, %606 : vector<8x64xf32>
    %609 = arith.addf %604, %608 : vector<8x64xf32>
    %cst_206 = arith.constant 0.797884583 : f32
    %610 = vector.broadcast %cst_206 : f32 to vector<8x64xf32>
    %611 = arith.mulf %610, %609 : vector<8x64xf32>
    %612 = math.tanh %611 : vector<8x64xf32>
    %cst_207 = arith.constant 1.000000e+00 : f32
    %613 = vector.broadcast %cst_207 : f32 to vector<8x64xf32>
    %614 = arith.addf %613, %612 : vector<8x64xf32>
    %cst_208 = arith.constant 5.000000e-01 : f32
    %615 = vector.broadcast %cst_208 : f32 to vector<8x64xf32>
    %616 = arith.mulf %615, %614 : vector<8x64xf32>
    %617 = arith.mulf %604, %616 : vector<8x64xf32>
    %cst_209 = arith.constant dense<0.000000e+00> : vector<8x64xf32>
    %618 = tpu.matmul %603, %588, %cst_209 {dimension_numbers = #tpu.dot_dimension_numbers<[1], [0], [0], [1], [0, 0, 1, 1], [], []>} : vector<8x32xbf16>, vector<32x64xbf16>, vector<8x64xf32> -> vector<8x64xf32>
    %619 = arith.mulf %617, %618 : vector<8x64xf32>
    %620 = arith.truncf %619 : vector<8x64xf32> to vector<8x64xbf16>
    %cst_210 = arith.constant dense<0.000000e+00> : vector<8x32xf32>
    %621 = tpu.matmul %620, %590, %cst_210 {dimension_numbers = #tpu.dot_dimension_numbers<[1], [0], [0], [1], [0, 0, 1, 1], [], []>} : vector<8x64xbf16>, vector<64x32xbf16>, vector<8x32xf32> -> vector<8x32xf32>
    %622 = arith.addf %582, %621 : vector<8x32xf32>
    %c1_211 = arith.constant 1 : index
    %c0_212 = arith.constant 0 : index
    %c0_213 = arith.constant 0 : index
    %623 = vector.load %arg16[%c1_211, %c0_212, %c0_213] : memref<2x1x32xf32, #tpu.memory_space<vmem>>, vector<1x1x32xf32>
    %624 = vector.shape_cast %623 : vector<1x1x32xf32> to vector<1x32xf32>
    %625 = arith.mulf %622, %622 : vector<8x32xf32>
    %cst_214 = arith.constant dense<0.000000e+00> : vector<8xf32>
    %626 = vector.multi_reduction <add>, %625, %cst_214 [1] : vector<8x32xf32> to vector<8xf32>
    %627 = vector.shape_cast %626 : vector<8xf32> to vector<8x1xf32>
    %cst_215 = arith.constant 3.200000e+01 : f32
    %628 = vector.broadcast %cst_215 : f32 to vector<8x1xf32>
    %629 = arith.divf %627, %628 : vector<8x1xf32>
    %cst_216 = arith.constant 9.99999997E-7 : f32
    %630 = vector.broadcast %cst_216 : f32 to vector<8x1xf32>
    %631 = arith.addf %629, %630 : vector<8x1xf32>
    %632 = math.rsqrt %631 : vector<8x1xf32>
    %633 = vector.broadcast %632 : vector<8x1xf32> to vector<8x32xf32>
    %634 = arith.mulf %622, %633 : vector<8x32xf32>
    %635 = vector.broadcast %624 : vector<1x32xf32> to vector<8x32xf32>
    %636 = arith.mulf %634, %635 : vector<8x32xf32>
    %637 = arith.truncf %636 : vector<8x32xf32> to vector<8x32xbf16>
    %c1_217 = arith.constant 1 : index
    %c0_218 = arith.constant 0 : index
    %c0_219 = arith.constant 0 : index
    %638 = vector.load %arg17[%c1_217, %c0_218, %c0_219] : memref<2x32x96xbf16, #tpu.memory_space<vmem>>, vector<1x32x96xbf16>
    %639 = vector.shape_cast %638 : vector<1x32x96xbf16> to vector<32x96xbf16>
    %cst_220 = arith.constant dense<0.000000e+00> : vector<8x96xf32>
    %640 = tpu.matmul %637, %639, %cst_220 {dimension_numbers = #tpu.dot_dimension_numbers<[1], [0], [0], [1], [0, 0, 1, 1], [], []>} : vector<8x32xbf16>, vector<32x96xbf16>, vector<8x96xf32> -> vector<8x96xf32>
    %641 = vector.extract_strided_slice %640 {offsets = [0, 0], sizes = [8, 32], strides = [1, 1]} : vector<8x96xf32> to vector<8x32xf32>
    %642 = vector.extract_strided_slice %640 {offsets = [0, 32], sizes = [8, 32], strides = [1, 1]} : vector<8x96xf32> to vector<8x32xf32>
    %643 = vector.extract_strided_slice %640 {offsets = [0, 64], sizes = [8, 32], strides = [1, 1]} : vector<8x96xf32> to vector<8x32xf32>
    %c1_221 = arith.constant 1 : index
    %c0_222 = arith.constant 0 : index
    %c0_223 = arith.constant 0 : index
    %644 = vector.load %arg18[%c1_221, %c0_222, %c0_223] : memref<2x32x32xbf16, #tpu.memory_space<vmem>>, vector<1x32x32xbf16>
    %645 = vector.shape_cast %644 : vector<1x32x32xbf16> to vector<32x32xbf16>
    %646 = vector.extract_strided_slice %641 {offsets = [0, 0], sizes = [8, 8], strides = [1, 1]} : vector<8x32xf32> to vector<8x8xf32>
    %647 = arith.truncf %646 : vector<8x8xf32> to vector<8x8xbf16>
    %648 = vector.extract_strided_slice %642 {offsets = [0, 0], sizes = [8, 8], strides = [1, 1]} : vector<8x32xf32> to vector<8x8xf32>
    %649 = arith.truncf %648 : vector<8x8xf32> to vector<8x8xbf16>
    %cst_224 = arith.constant dense<0.000000e+00> : vector<8x8xf32>
    %650 = tpu.matmul %647, %649, %cst_224 {dimension_numbers = #tpu.dot_dimension_numbers<[1], [1], [0], [0], [0, 0, 1, 0], [], []>} : vector<8x8xbf16>, vector<8x8xbf16>, vector<8x8xf32> -> vector<8x8xf32>
    %651 = vector.extract_strided_slice %7 {offsets = [0, 0, 0], sizes = [1, 8, 8], strides = [1, 1, 1]} : vector<4x8x8xf32> to vector<1x8x8xf32>
    %652 = vector.shape_cast %651 : vector<1x8x8xf32> to vector<8x8xf32>
    %653 = arith.addf %650, %652 : vector<8x8xf32>
    %cst_225 = arith.constant dense<0xFF800000> : vector<8xf32>
    %654 = vector.multi_reduction <maximumf>, %653, %cst_225 [1] : vector<8x8xf32> to vector<8xf32>
    %655 = vector.shape_cast %654 : vector<8xf32> to vector<8x1xf32>
    %656 = vector.broadcast %655 : vector<8x1xf32> to vector<8x8xf32>
    %657 = arith.subf %653, %656 : vector<8x8xf32>
    %658 = math.exp %657 : vector<8x8xf32>
    %cst_226 = arith.constant dense<0.000000e+00> : vector<8xf32>
    %659 = vector.multi_reduction <add>, %658, %cst_226 [1] : vector<8x8xf32> to vector<8xf32>
    %660 = vector.shape_cast %659 : vector<8xf32> to vector<8x1xf32>
    %661 = tpu.reciprocal %660 {approx = true} : vector<8x1xf32> -> vector<8x1xf32>
    %662 = vector.broadcast %661 : vector<8x1xf32> to vector<8x8xf32>
    %663 = arith.mulf %658, %662 : vector<8x8xf32>
    %664 = arith.truncf %663 : vector<8x8xf32> to vector<8x8xbf16>
    %665 = vector.extract_strided_slice %643 {offsets = [0, 0], sizes = [8, 8], strides = [1, 1]} : vector<8x32xf32> to vector<8x8xf32>
    %666 = arith.truncf %665 : vector<8x8xf32> to vector<8x8xbf16>
    %cst_227 = arith.constant dense<0.000000e+00> : vector<8x8xf32>
    %667 = tpu.matmul %664, %666, %cst_227 {dimension_numbers = #tpu.dot_dimension_numbers<[1], [0], [0], [1], [0, 0, 1, 1], [], []>} : vector<8x8xbf16>, vector<8x8xbf16>, vector<8x8xf32> -> vector<8x8xf32>
    %668 = vector.extract_strided_slice %641 {offsets = [0, 8], sizes = [8, 8], strides = [1, 1]} : vector<8x32xf32> to vector<8x8xf32>
    %669 = arith.truncf %668 : vector<8x8xf32> to vector<8x8xbf16>
    %670 = vector.extract_strided_slice %642 {offsets = [0, 8], sizes = [8, 8], strides = [1, 1]} : vector<8x32xf32> to vector<8x8xf32>
    %671 = arith.truncf %670 : vector<8x8xf32> to vector<8x8xbf16>
    %cst_228 = arith.constant dense<0.000000e+00> : vector<8x8xf32>
    %672 = tpu.matmul %669, %671, %cst_228 {dimension_numbers = #tpu.dot_dimension_numbers<[1], [1], [0], [0], [0, 0, 1, 0], [], []>} : vector<8x8xbf16>, vector<8x8xbf16>, vector<8x8xf32> -> vector<8x8xf32>
    %673 = vector.extract_strided_slice %7 {offsets = [1, 0, 0], sizes = [1, 8, 8], strides = [1, 1, 1]} : vector<4x8x8xf32> to vector<1x8x8xf32>
    %674 = vector.shape_cast %673 : vector<1x8x8xf32> to vector<8x8xf32>
    %675 = arith.addf %672, %674 : vector<8x8xf32>
    %cst_229 = arith.constant dense<0xFF800000> : vector<8xf32>
    %676 = vector.multi_reduction <maximumf>, %675, %cst_229 [1] : vector<8x8xf32> to vector<8xf32>
    %677 = vector.shape_cast %676 : vector<8xf32> to vector<8x1xf32>
    %678 = vector.broadcast %677 : vector<8x1xf32> to vector<8x8xf32>
    %679 = arith.subf %675, %678 : vector<8x8xf32>
    %680 = math.exp %679 : vector<8x8xf32>
    %cst_230 = arith.constant dense<0.000000e+00> : vector<8xf32>
    %681 = vector.multi_reduction <add>, %680, %cst_230 [1] : vector<8x8xf32> to vector<8xf32>
    %682 = vector.shape_cast %681 : vector<8xf32> to vector<8x1xf32>
    %683 = tpu.reciprocal %682 {approx = true} : vector<8x1xf32> -> vector<8x1xf32>
    %684 = vector.broadcast %683 : vector<8x1xf32> to vector<8x8xf32>
    %685 = arith.mulf %680, %684 : vector<8x8xf32>
    %686 = arith.truncf %685 : vector<8x8xf32> to vector<8x8xbf16>
    %687 = vector.extract_strided_slice %643 {offsets = [0, 8], sizes = [8, 8], strides = [1, 1]} : vector<8x32xf32> to vector<8x8xf32>
    %688 = arith.truncf %687 : vector<8x8xf32> to vector<8x8xbf16>
    %cst_231 = arith.constant dense<0.000000e+00> : vector<8x8xf32>
    %689 = tpu.matmul %686, %688, %cst_231 {dimension_numbers = #tpu.dot_dimension_numbers<[1], [0], [0], [1], [0, 0, 1, 1], [], []>} : vector<8x8xbf16>, vector<8x8xbf16>, vector<8x8xf32> -> vector<8x8xf32>
    %690 = vector.extract_strided_slice %641 {offsets = [0, 16], sizes = [8, 8], strides = [1, 1]} : vector<8x32xf32> to vector<8x8xf32>
    %691 = arith.truncf %690 : vector<8x8xf32> to vector<8x8xbf16>
    %692 = vector.extract_strided_slice %642 {offsets = [0, 16], sizes = [8, 8], strides = [1, 1]} : vector<8x32xf32> to vector<8x8xf32>
    %693 = arith.truncf %692 : vector<8x8xf32> to vector<8x8xbf16>
    %cst_232 = arith.constant dense<0.000000e+00> : vector<8x8xf32>
    %694 = tpu.matmul %691, %693, %cst_232 {dimension_numbers = #tpu.dot_dimension_numbers<[1], [1], [0], [0], [0, 0, 1, 0], [], []>} : vector<8x8xbf16>, vector<8x8xbf16>, vector<8x8xf32> -> vector<8x8xf32>
    %695 = vector.extract_strided_slice %7 {offsets = [2, 0, 0], sizes = [1, 8, 8], strides = [1, 1, 1]} : vector<4x8x8xf32> to vector<1x8x8xf32>
    %696 = vector.shape_cast %695 : vector<1x8x8xf32> to vector<8x8xf32>
    %697 = arith.addf %694, %696 : vector<8x8xf32>
    %cst_233 = arith.constant dense<0xFF800000> : vector<8xf32>
    %698 = vector.multi_reduction <maximumf>, %697, %cst_233 [1] : vector<8x8xf32> to vector<8xf32>
    %699 = vector.shape_cast %698 : vector<8xf32> to vector<8x1xf32>
    %700 = vector.broadcast %699 : vector<8x1xf32> to vector<8x8xf32>
    %701 = arith.subf %697, %700 : vector<8x8xf32>
    %702 = math.exp %701 : vector<8x8xf32>
    %cst_234 = arith.constant dense<0.000000e+00> : vector<8xf32>
    %703 = vector.multi_reduction <add>, %702, %cst_234 [1] : vector<8x8xf32> to vector<8xf32>
    %704 = vector.shape_cast %703 : vector<8xf32> to vector<8x1xf32>
    %705 = tpu.reciprocal %704 {approx = true} : vector<8x1xf32> -> vector<8x1xf32>
    %706 = vector.broadcast %705 : vector<8x1xf32> to vector<8x8xf32>
    %707 = arith.mulf %702, %706 : vector<8x8xf32>
    %708 = arith.truncf %707 : vector<8x8xf32> to vector<8x8xbf16>
    %709 = vector.extract_strided_slice %643 {offsets = [0, 16], sizes = [8, 8], strides = [1, 1]} : vector<8x32xf32> to vector<8x8xf32>
    %710 = arith.truncf %709 : vector<8x8xf32> to vector<8x8xbf16>
    %cst_235 = arith.constant dense<0.000000e+00> : vector<8x8xf32>
    %711 = tpu.matmul %708, %710, %cst_235 {dimension_numbers = #tpu.dot_dimension_numbers<[1], [0], [0], [1], [0, 0, 1, 1], [], []>} : vector<8x8xbf16>, vector<8x8xbf16>, vector<8x8xf32> -> vector<8x8xf32>
    %712 = vector.extract_strided_slice %641 {offsets = [0, 24], sizes = [8, 8], strides = [1, 1]} : vector<8x32xf32> to vector<8x8xf32>
    %713 = arith.truncf %712 : vector<8x8xf32> to vector<8x8xbf16>
    %714 = vector.extract_strided_slice %642 {offsets = [0, 24], sizes = [8, 8], strides = [1, 1]} : vector<8x32xf32> to vector<8x8xf32>
    %715 = arith.truncf %714 : vector<8x8xf32> to vector<8x8xbf16>
    %cst_236 = arith.constant dense<0.000000e+00> : vector<8x8xf32>
    %716 = tpu.matmul %713, %715, %cst_236 {dimension_numbers = #tpu.dot_dimension_numbers<[1], [1], [0], [0], [0, 0, 1, 0], [], []>} : vector<8x8xbf16>, vector<8x8xbf16>, vector<8x8xf32> -> vector<8x8xf32>
    %717 = vector.extract_strided_slice %7 {offsets = [3, 0, 0], sizes = [1, 8, 8], strides = [1, 1, 1]} : vector<4x8x8xf32> to vector<1x8x8xf32>
    %718 = vector.shape_cast %717 : vector<1x8x8xf32> to vector<8x8xf32>
    %719 = arith.addf %716, %718 : vector<8x8xf32>
    %cst_237 = arith.constant dense<0xFF800000> : vector<8xf32>
    %720 = vector.multi_reduction <maximumf>, %719, %cst_237 [1] : vector<8x8xf32> to vector<8xf32>
    %721 = vector.shape_cast %720 : vector<8xf32> to vector<8x1xf32>
    %722 = vector.broadcast %721 : vector<8x1xf32> to vector<8x8xf32>
    %723 = arith.subf %719, %722 : vector<8x8xf32>
    %724 = math.exp %723 : vector<8x8xf32>
    %cst_238 = arith.constant dense<0.000000e+00> : vector<8xf32>
    %725 = vector.multi_reduction <add>, %724, %cst_238 [1] : vector<8x8xf32> to vector<8xf32>
    %726 = vector.shape_cast %725 : vector<8xf32> to vector<8x1xf32>
    %727 = tpu.reciprocal %726 {approx = true} : vector<8x1xf32> -> vector<8x1xf32>
    %728 = vector.broadcast %727 : vector<8x1xf32> to vector<8x8xf32>
    %729 = arith.mulf %724, %728 : vector<8x8xf32>
    %730 = arith.truncf %729 : vector<8x8xf32> to vector<8x8xbf16>
    %731 = vector.extract_strided_slice %643 {offsets = [0, 24], sizes = [8, 8], strides = [1, 1]} : vector<8x32xf32> to vector<8x8xf32>
    %732 = arith.truncf %731 : vector<8x8xf32> to vector<8x8xbf16>
    %cst_239 = arith.constant dense<0.000000e+00> : vector<8x8xf32>
    %733 = tpu.matmul %730, %732, %cst_239 {dimension_numbers = #tpu.dot_dimension_numbers<[1], [0], [0], [1], [0, 0, 1, 1], [], []>} : vector<8x8xbf16>, vector<8x8xbf16>, vector<8x8xf32> -> vector<8x8xf32>
    %734 = tpu.concatenate %667, %689, %711, %733 in 1 : vector<8x8xf32>, vector<8x8xf32>, vector<8x8xf32>, vector<8x8xf32> -> vector<8x32xf32>
    %735 = arith.truncf %734 : vector<8x32xf32> to vector<8x32xbf16>
    %cst_240 = arith.constant dense<0.000000e+00> : vector<8x32xf32>
    %736 = tpu.matmul %735, %645, %cst_240 {dimension_numbers = #tpu.dot_dimension_numbers<[1], [0], [0], [1], [0, 0, 1, 1], [], []>} : vector<8x32xbf16>, vector<32x32xbf16>, vector<8x32xf32> -> vector<8x32xf32>
    %737 = arith.addf %622, %736 : vector<8x32xf32>
    %c1_241 = arith.constant 1 : index
    %c0_242 = arith.constant 0 : index
    %c0_243 = arith.constant 0 : index
    %738 = vector.load %arg19[%c1_241, %c0_242, %c0_243] : memref<2x1x32xf32, #tpu.memory_space<vmem>>, vector<1x1x32xf32>
    %739 = vector.shape_cast %738 : vector<1x1x32xf32> to vector<1x32xf32>
    %740 = arith.mulf %737, %737 : vector<8x32xf32>
    %cst_244 = arith.constant dense<0.000000e+00> : vector<8xf32>
    %741 = vector.multi_reduction <add>, %740, %cst_244 [1] : vector<8x32xf32> to vector<8xf32>
    %742 = vector.shape_cast %741 : vector<8xf32> to vector<8x1xf32>
    %cst_245 = arith.constant 3.200000e+01 : f32
    %743 = vector.broadcast %cst_245 : f32 to vector<8x1xf32>
    %744 = arith.divf %742, %743 : vector<8x1xf32>
    %cst_246 = arith.constant 9.99999997E-7 : f32
    %745 = vector.broadcast %cst_246 : f32 to vector<8x1xf32>
    %746 = arith.addf %744, %745 : vector<8x1xf32>
    %747 = math.rsqrt %746 : vector<8x1xf32>
    %748 = vector.broadcast %747 : vector<8x1xf32> to vector<8x32xf32>
    %749 = arith.mulf %737, %748 : vector<8x32xf32>
    %750 = vector.broadcast %739 : vector<1x32xf32> to vector<8x32xf32>
    %751 = arith.mulf %749, %750 : vector<8x32xf32>
    %752 = arith.truncf %751 : vector<8x32xf32> to vector<8x32xbf16>
    %c1_247 = arith.constant 1 : index
    %c0_248 = arith.constant 0 : index
    %c0_249 = arith.constant 0 : index
    %753 = vector.load %arg20[%c1_247, %c0_248, %c0_249] : memref<2x32x32xbf16, #tpu.memory_space<vmem>>, vector<1x32x32xbf16>
    %754 = vector.shape_cast %753 : vector<1x32x32xbf16> to vector<32x32xbf16>
    %cst_250 = arith.constant dense<0.000000e+00> : vector<8x32xf32>
    %755 = tpu.matmul %752, %754, %cst_250 {dimension_numbers = #tpu.dot_dimension_numbers<[1], [0], [0], [1], [0, 0, 1, 1], [], []>} : vector<8x32xbf16>, vector<32x32xbf16>, vector<8x32xf32> -> vector<8x32xf32>
    %c1_251 = arith.constant 1 : index
    %c0_252 = arith.constant 0 : index
    %c0_253 = arith.constant 0 : index
    %756 = vector.load %arg21[%c1_251, %c0_252, %c0_253] : memref<2x32x64xbf16, #tpu.memory_space<vmem>>, vector<1x32x64xbf16>
    %757 = vector.shape_cast %756 : vector<1x32x64xbf16> to vector<32x64xbf16>
    %cst_254 = arith.constant dense<0.000000e+00> : vector<8x64xf32>
    %758 = tpu.matmul %342, %757, %cst_254 {dimension_numbers = #tpu.dot_dimension_numbers<[1], [0], [0], [1], [0, 0, 1, 1], [], []>} : vector<8x32xbf16>, vector<32x64xbf16>, vector<8x64xf32> -> vector<8x64xf32>
    %759 = vector.extract_strided_slice %758 {offsets = [0, 0], sizes = [8, 32], strides = [1, 1]} : vector<8x64xf32> to vector<8x32xf32>
    %760 = vector.extract_strided_slice %758 {offsets = [0, 32], sizes = [8, 32], strides = [1, 1]} : vector<8x64xf32> to vector<8x32xf32>
    %c1_255 = arith.constant 1 : index
    %c0_256 = arith.constant 0 : index
    %c0_257 = arith.constant 0 : index
    %761 = vector.load %arg22[%c1_255, %c0_256, %c0_257] : memref<2x32x32xbf16, #tpu.memory_space<vmem>>, vector<1x32x32xbf16>
    %762 = vector.shape_cast %761 : vector<1x32x32xbf16> to vector<32x32xbf16>
    %763 = vector.extract_strided_slice %755 {offsets = [0, 0], sizes = [8, 8], strides = [1, 1]} : vector<8x32xf32> to vector<8x8xf32>
    %764 = arith.truncf %763 : vector<8x8xf32> to vector<8x8xbf16>
    %765 = vector.extract_strided_slice %759 {offsets = [0, 0], sizes = [8, 8], strides = [1, 1]} : vector<8x32xf32> to vector<8x8xf32>
    %766 = arith.truncf %765 : vector<8x8xf32> to vector<8x8xbf16>
    %cst_258 = arith.constant dense<0.000000e+00> : vector<8x8xf32>
    %767 = tpu.matmul %764, %766, %cst_258 {dimension_numbers = #tpu.dot_dimension_numbers<[1], [1], [0], [0], [0, 0, 1, 0], [], []>} : vector<8x8xbf16>, vector<8x8xbf16>, vector<8x8xf32> -> vector<8x8xf32>
    %768 = vector.extract_strided_slice %10 {offsets = [0, 0, 0], sizes = [1, 8, 8], strides = [1, 1, 1]} : vector<4x8x8xf32> to vector<1x8x8xf32>
    %769 = vector.shape_cast %768 : vector<1x8x8xf32> to vector<8x8xf32>
    %770 = arith.addf %767, %769 : vector<8x8xf32>
    %cst_259 = arith.constant dense<0xFF800000> : vector<8xf32>
    %771 = vector.multi_reduction <maximumf>, %770, %cst_259 [1] : vector<8x8xf32> to vector<8xf32>
    %772 = vector.shape_cast %771 : vector<8xf32> to vector<8x1xf32>
    %773 = vector.broadcast %772 : vector<8x1xf32> to vector<8x8xf32>
    %774 = arith.subf %770, %773 : vector<8x8xf32>
    %775 = math.exp %774 : vector<8x8xf32>
    %cst_260 = arith.constant dense<0.000000e+00> : vector<8xf32>
    %776 = vector.multi_reduction <add>, %775, %cst_260 [1] : vector<8x8xf32> to vector<8xf32>
    %777 = vector.shape_cast %776 : vector<8xf32> to vector<8x1xf32>
    %778 = tpu.reciprocal %777 {approx = true} : vector<8x1xf32> -> vector<8x1xf32>
    %779 = vector.broadcast %778 : vector<8x1xf32> to vector<8x8xf32>
    %780 = arith.mulf %775, %779 : vector<8x8xf32>
    %781 = arith.truncf %780 : vector<8x8xf32> to vector<8x8xbf16>
    %782 = vector.extract_strided_slice %760 {offsets = [0, 0], sizes = [8, 8], strides = [1, 1]} : vector<8x32xf32> to vector<8x8xf32>
    %783 = arith.truncf %782 : vector<8x8xf32> to vector<8x8xbf16>
    %cst_261 = arith.constant dense<0.000000e+00> : vector<8x8xf32>
    %784 = tpu.matmul %781, %783, %cst_261 {dimension_numbers = #tpu.dot_dimension_numbers<[1], [0], [0], [1], [0, 0, 1, 1], [], []>} : vector<8x8xbf16>, vector<8x8xbf16>, vector<8x8xf32> -> vector<8x8xf32>
    %785 = vector.extract_strided_slice %755 {offsets = [0, 8], sizes = [8, 8], strides = [1, 1]} : vector<8x32xf32> to vector<8x8xf32>
    %786 = arith.truncf %785 : vector<8x8xf32> to vector<8x8xbf16>
    %787 = vector.extract_strided_slice %759 {offsets = [0, 8], sizes = [8, 8], strides = [1, 1]} : vector<8x32xf32> to vector<8x8xf32>
    %788 = arith.truncf %787 : vector<8x8xf32> to vector<8x8xbf16>
    %cst_262 = arith.constant dense<0.000000e+00> : vector<8x8xf32>
    %789 = tpu.matmul %786, %788, %cst_262 {dimension_numbers = #tpu.dot_dimension_numbers<[1], [1], [0], [0], [0, 0, 1, 0], [], []>} : vector<8x8xbf16>, vector<8x8xbf16>, vector<8x8xf32> -> vector<8x8xf32>
    %790 = vector.extract_strided_slice %10 {offsets = [1, 0, 0], sizes = [1, 8, 8], strides = [1, 1, 1]} : vector<4x8x8xf32> to vector<1x8x8xf32>
    %791 = vector.shape_cast %790 : vector<1x8x8xf32> to vector<8x8xf32>
    %792 = arith.addf %789, %791 : vector<8x8xf32>
    %cst_263 = arith.constant dense<0xFF800000> : vector<8xf32>
    %793 = vector.multi_reduction <maximumf>, %792, %cst_263 [1] : vector<8x8xf32> to vector<8xf32>
    %794 = vector.shape_cast %793 : vector<8xf32> to vector<8x1xf32>
    %795 = vector.broadcast %794 : vector<8x1xf32> to vector<8x8xf32>
    %796 = arith.subf %792, %795 : vector<8x8xf32>
    %797 = math.exp %796 : vector<8x8xf32>
    %cst_264 = arith.constant dense<0.000000e+00> : vector<8xf32>
    %798 = vector.multi_reduction <add>, %797, %cst_264 [1] : vector<8x8xf32> to vector<8xf32>
    %799 = vector.shape_cast %798 : vector<8xf32> to vector<8x1xf32>
    %800 = tpu.reciprocal %799 {approx = true} : vector<8x1xf32> -> vector<8x1xf32>
    %801 = vector.broadcast %800 : vector<8x1xf32> to vector<8x8xf32>
    %802 = arith.mulf %797, %801 : vector<8x8xf32>
    %803 = arith.truncf %802 : vector<8x8xf32> to vector<8x8xbf16>
    %804 = vector.extract_strided_slice %760 {offsets = [0, 8], sizes = [8, 8], strides = [1, 1]} : vector<8x32xf32> to vector<8x8xf32>
    %805 = arith.truncf %804 : vector<8x8xf32> to vector<8x8xbf16>
    %cst_265 = arith.constant dense<0.000000e+00> : vector<8x8xf32>
    %806 = tpu.matmul %803, %805, %cst_265 {dimension_numbers = #tpu.dot_dimension_numbers<[1], [0], [0], [1], [0, 0, 1, 1], [], []>} : vector<8x8xbf16>, vector<8x8xbf16>, vector<8x8xf32> -> vector<8x8xf32>
    %807 = vector.extract_strided_slice %755 {offsets = [0, 16], sizes = [8, 8], strides = [1, 1]} : vector<8x32xf32> to vector<8x8xf32>
    %808 = arith.truncf %807 : vector<8x8xf32> to vector<8x8xbf16>
    %809 = vector.extract_strided_slice %759 {offsets = [0, 16], sizes = [8, 8], strides = [1, 1]} : vector<8x32xf32> to vector<8x8xf32>
    %810 = arith.truncf %809 : vector<8x8xf32> to vector<8x8xbf16>
    %cst_266 = arith.constant dense<0.000000e+00> : vector<8x8xf32>
    %811 = tpu.matmul %808, %810, %cst_266 {dimension_numbers = #tpu.dot_dimension_numbers<[1], [1], [0], [0], [0, 0, 1, 0], [], []>} : vector<8x8xbf16>, vector<8x8xbf16>, vector<8x8xf32> -> vector<8x8xf32>
    %812 = vector.extract_strided_slice %10 {offsets = [2, 0, 0], sizes = [1, 8, 8], strides = [1, 1, 1]} : vector<4x8x8xf32> to vector<1x8x8xf32>
    %813 = vector.shape_cast %812 : vector<1x8x8xf32> to vector<8x8xf32>
    %814 = arith.addf %811, %813 : vector<8x8xf32>
    %cst_267 = arith.constant dense<0xFF800000> : vector<8xf32>
    %815 = vector.multi_reduction <maximumf>, %814, %cst_267 [1] : vector<8x8xf32> to vector<8xf32>
    %816 = vector.shape_cast %815 : vector<8xf32> to vector<8x1xf32>
    %817 = vector.broadcast %816 : vector<8x1xf32> to vector<8x8xf32>
    %818 = arith.subf %814, %817 : vector<8x8xf32>
    %819 = math.exp %818 : vector<8x8xf32>
    %cst_268 = arith.constant dense<0.000000e+00> : vector<8xf32>
    %820 = vector.multi_reduction <add>, %819, %cst_268 [1] : vector<8x8xf32> to vector<8xf32>
    %821 = vector.shape_cast %820 : vector<8xf32> to vector<8x1xf32>
    %822 = tpu.reciprocal %821 {approx = true} : vector<8x1xf32> -> vector<8x1xf32>
    %823 = vector.broadcast %822 : vector<8x1xf32> to vector<8x8xf32>
    %824 = arith.mulf %819, %823 : vector<8x8xf32>
    %825 = arith.truncf %824 : vector<8x8xf32> to vector<8x8xbf16>
    %826 = vector.extract_strided_slice %760 {offsets = [0, 16], sizes = [8, 8], strides = [1, 1]} : vector<8x32xf32> to vector<8x8xf32>
    %827 = arith.truncf %826 : vector<8x8xf32> to vector<8x8xbf16>
    %cst_269 = arith.constant dense<0.000000e+00> : vector<8x8xf32>
    %828 = tpu.matmul %825, %827, %cst_269 {dimension_numbers = #tpu.dot_dimension_numbers<[1], [0], [0], [1], [0, 0, 1, 1], [], []>} : vector<8x8xbf16>, vector<8x8xbf16>, vector<8x8xf32> -> vector<8x8xf32>
    %829 = vector.extract_strided_slice %755 {offsets = [0, 24], sizes = [8, 8], strides = [1, 1]} : vector<8x32xf32> to vector<8x8xf32>
    %830 = arith.truncf %829 : vector<8x8xf32> to vector<8x8xbf16>
    %831 = vector.extract_strided_slice %759 {offsets = [0, 24], sizes = [8, 8], strides = [1, 1]} : vector<8x32xf32> to vector<8x8xf32>
    %832 = arith.truncf %831 : vector<8x8xf32> to vector<8x8xbf16>
    %cst_270 = arith.constant dense<0.000000e+00> : vector<8x8xf32>
    %833 = tpu.matmul %830, %832, %cst_270 {dimension_numbers = #tpu.dot_dimension_numbers<[1], [1], [0], [0], [0, 0, 1, 0], [], []>} : vector<8x8xbf16>, vector<8x8xbf16>, vector<8x8xf32> -> vector<8x8xf32>
    %834 = vector.extract_strided_slice %10 {offsets = [3, 0, 0], sizes = [1, 8, 8], strides = [1, 1, 1]} : vector<4x8x8xf32> to vector<1x8x8xf32>
    %835 = vector.shape_cast %834 : vector<1x8x8xf32> to vector<8x8xf32>
    %836 = arith.addf %833, %835 : vector<8x8xf32>
    %cst_271 = arith.constant dense<0xFF800000> : vector<8xf32>
    %837 = vector.multi_reduction <maximumf>, %836, %cst_271 [1] : vector<8x8xf32> to vector<8xf32>
    %838 = vector.shape_cast %837 : vector<8xf32> to vector<8x1xf32>
    %839 = vector.broadcast %838 : vector<8x1xf32> to vector<8x8xf32>
    %840 = arith.subf %836, %839 : vector<8x8xf32>
    %841 = math.exp %840 : vector<8x8xf32>
    %cst_272 = arith.constant dense<0.000000e+00> : vector<8xf32>
    %842 = vector.multi_reduction <add>, %841, %cst_272 [1] : vector<8x8xf32> to vector<8xf32>
    %843 = vector.shape_cast %842 : vector<8xf32> to vector<8x1xf32>
    %844 = tpu.reciprocal %843 {approx = true} : vector<8x1xf32> -> vector<8x1xf32>
    %845 = vector.broadcast %844 : vector<8x1xf32> to vector<8x8xf32>
    %846 = arith.mulf %841, %845 : vector<8x8xf32>
    %847 = arith.truncf %846 : vector<8x8xf32> to vector<8x8xbf16>
    %848 = vector.extract_strided_slice %760 {offsets = [0, 24], sizes = [8, 8], strides = [1, 1]} : vector<8x32xf32> to vector<8x8xf32>
    %849 = arith.truncf %848 : vector<8x8xf32> to vector<8x8xbf16>
    %cst_273 = arith.constant dense<0.000000e+00> : vector<8x8xf32>
    %850 = tpu.matmul %847, %849, %cst_273 {dimension_numbers = #tpu.dot_dimension_numbers<[1], [0], [0], [1], [0, 0, 1, 1], [], []>} : vector<8x8xbf16>, vector<8x8xbf16>, vector<8x8xf32> -> vector<8x8xf32>
    %851 = tpu.concatenate %784, %806, %828, %850 in 1 : vector<8x8xf32>, vector<8x8xf32>, vector<8x8xf32>, vector<8x8xf32> -> vector<8x32xf32>
    %852 = arith.truncf %851 : vector<8x32xf32> to vector<8x32xbf16>
    %cst_274 = arith.constant dense<0.000000e+00> : vector<8x32xf32>
    %853 = tpu.matmul %852, %762, %cst_274 {dimension_numbers = #tpu.dot_dimension_numbers<[1], [0], [0], [1], [0, 0, 1, 1], [], []>} : vector<8x32xbf16>, vector<32x32xbf16>, vector<8x32xf32> -> vector<8x32xf32>
    %854 = arith.addf %737, %853 : vector<8x32xf32>
    %c1_275 = arith.constant 1 : index
    %c0_276 = arith.constant 0 : index
    %c0_277 = arith.constant 0 : index
    %855 = vector.load %arg23[%c1_275, %c0_276, %c0_277] : memref<2x1x32xf32, #tpu.memory_space<vmem>>, vector<1x1x32xf32>
    %856 = vector.shape_cast %855 : vector<1x1x32xf32> to vector<1x32xf32>
    %c1_278 = arith.constant 1 : index
    %c0_279 = arith.constant 0 : index
    %c0_280 = arith.constant 0 : index
    %857 = vector.load %arg24[%c1_278, %c0_279, %c0_280] : memref<2x32x64xbf16, #tpu.memory_space<vmem>>, vector<1x32x64xbf16>
    %858 = vector.shape_cast %857 : vector<1x32x64xbf16> to vector<32x64xbf16>
    %c1_281 = arith.constant 1 : index
    %c0_282 = arith.constant 0 : index
    %c0_283 = arith.constant 0 : index
    %859 = vector.load %arg25[%c1_281, %c0_282, %c0_283] : memref<2x32x64xbf16, #tpu.memory_space<vmem>>, vector<1x32x64xbf16>
    %860 = vector.shape_cast %859 : vector<1x32x64xbf16> to vector<32x64xbf16>
    %c1_284 = arith.constant 1 : index
    %c0_285 = arith.constant 0 : index
    %c0_286 = arith.constant 0 : index
    %861 = vector.load %arg26[%c1_284, %c0_285, %c0_286] : memref<2x64x32xbf16, #tpu.memory_space<vmem>>, vector<1x64x32xbf16>
    %862 = vector.shape_cast %861 : vector<1x64x32xbf16> to vector<64x32xbf16>
    %863 = arith.mulf %854, %854 : vector<8x32xf32>
    %cst_287 = arith.constant dense<0.000000e+00> : vector<8xf32>
    %864 = vector.multi_reduction <add>, %863, %cst_287 [1] : vector<8x32xf32> to vector<8xf32>
    %865 = vector.shape_cast %864 : vector<8xf32> to vector<8x1xf32>
    %cst_288 = arith.constant 3.200000e+01 : f32
    %866 = vector.broadcast %cst_288 : f32 to vector<8x1xf32>
    %867 = arith.divf %865, %866 : vector<8x1xf32>
    %cst_289 = arith.constant 9.99999997E-7 : f32
    %868 = vector.broadcast %cst_289 : f32 to vector<8x1xf32>
    %869 = arith.addf %867, %868 : vector<8x1xf32>
    %870 = math.rsqrt %869 : vector<8x1xf32>
    %871 = vector.broadcast %870 : vector<8x1xf32> to vector<8x32xf32>
    %872 = arith.mulf %854, %871 : vector<8x32xf32>
    %873 = vector.broadcast %856 : vector<1x32xf32> to vector<8x32xf32>
    %874 = arith.mulf %872, %873 : vector<8x32xf32>
    %875 = arith.truncf %874 : vector<8x32xf32> to vector<8x32xbf16>
    %cst_290 = arith.constant dense<0.000000e+00> : vector<8x64xf32>
    %876 = tpu.matmul %875, %858, %cst_290 {dimension_numbers = #tpu.dot_dimension_numbers<[1], [0], [0], [1], [0, 0, 1, 1], [], []>} : vector<8x32xbf16>, vector<32x64xbf16>, vector<8x64xf32> -> vector<8x64xf32>
    %877 = arith.mulf %876, %876 : vector<8x64xf32>
    %878 = arith.mulf %876, %877 : vector<8x64xf32>
    %cst_291 = arith.constant 4.471500e-02 : f32
    %879 = vector.broadcast %cst_291 : f32 to vector<8x64xf32>
    %880 = arith.mulf %879, %878 : vector<8x64xf32>
    %881 = arith.addf %876, %880 : vector<8x64xf32>
    %cst_292 = arith.constant 0.797884583 : f32
    %882 = vector.broadcast %cst_292 : f32 to vector<8x64xf32>
    %883 = arith.mulf %882, %881 : vector<8x64xf32>
    %884 = math.tanh %883 : vector<8x64xf32>
    %cst_293 = arith.constant 1.000000e+00 : f32
    %885 = vector.broadcast %cst_293 : f32 to vector<8x64xf32>
    %886 = arith.addf %885, %884 : vector<8x64xf32>
    %cst_294 = arith.constant 5.000000e-01 : f32
    %887 = vector.broadcast %cst_294 : f32 to vector<8x64xf32>
    %888 = arith.mulf %887, %886 : vector<8x64xf32>
    %889 = arith.mulf %876, %888 : vector<8x64xf32>
    %cst_295 = arith.constant dense<0.000000e+00> : vector<8x64xf32>
    %890 = tpu.matmul %875, %860, %cst_295 {dimension_numbers = #tpu.dot_dimension_numbers<[1], [0], [0], [1], [0, 0, 1, 1], [], []>} : vector<8x32xbf16>, vector<32x64xbf16>, vector<8x64xf32> -> vector<8x64xf32>
    %891 = arith.mulf %889, %890 : vector<8x64xf32>
    %892 = arith.truncf %891 : vector<8x64xf32> to vector<8x64xbf16>
    %cst_296 = arith.constant dense<0.000000e+00> : vector<8x32xf32>
    %893 = tpu.matmul %892, %862, %cst_296 {dimension_numbers = #tpu.dot_dimension_numbers<[1], [0], [0], [1], [0, 0, 1, 1], [], []>} : vector<8x64xbf16>, vector<64x32xbf16>, vector<8x32xf32> -> vector<8x32xf32>
    %894 = arith.addf %854, %893 : vector<8x32xf32>
    %c0_297 = arith.constant 0 : index
    %c0_298 = arith.constant 0 : index
    %895 = vector.load %arg27[%c0_297, %c0_298] : memref<1x32xf32, #tpu.memory_space<vmem>>, vector<1x32xf32>
    %896 = arith.mulf %894, %894 : vector<8x32xf32>
    %cst_299 = arith.constant dense<0.000000e+00> : vector<8xf32>
    %897 = vector.multi_reduction <add>, %896, %cst_299 [1] : vector<8x32xf32> to vector<8xf32>
    %898 = vector.shape_cast %897 : vector<8xf32> to vector<8x1xf32>
    %cst_300 = arith.constant 3.200000e+01 : f32
    %899 = vector.broadcast %cst_300 : f32 to vector<8x1xf32>
    %900 = arith.divf %898, %899 : vector<8x1xf32>
    %cst_301 = arith.constant 9.99999997E-7 : f32
    %901 = vector.broadcast %cst_301 : f32 to vector<8x1xf32>
    %902 = arith.addf %900, %901 : vector<8x1xf32>
    %903 = math.rsqrt %902 : vector<8x1xf32>
    %904 = vector.broadcast %903 : vector<8x1xf32> to vector<8x32xf32>
    %905 = arith.mulf %894, %904 : vector<8x32xf32>
    %906 = vector.broadcast %895 : vector<1x32xf32> to vector<8x32xf32>
    %907 = arith.mulf %905, %906 : vector<8x32xf32>
    %908 = arith.truncf %907 : vector<8x32xf32> to vector<8x32xbf16>
    %c0_302 = arith.constant 0 : index
    %c0_303 = arith.constant 0 : index
    %909 = vector.load %arg28[%c0_302, %c0_303] : memref<32x64xbf16, #tpu.memory_space<vmem>>, vector<32x64xbf16>
    %cst_304 = arith.constant dense<0.000000e+00> : vector<8x64xf32>
    %910 = tpu.matmul %908, %909, %cst_304 {dimension_numbers = #tpu.dot_dimension_numbers<[1], [0], [0], [1], [0, 0, 1, 1], [], []>} : vector<8x32xbf16>, vector<32x64xbf16>, vector<8x64xf32> -> vector<8x64xf32>
    %911 = vector.shape_cast %910 : vector<8x64xf32> to vector<1x8x64xf32>
    %c0_305 = arith.constant 0 : index
    %c0_306 = arith.constant 0 : index
    %c0_307 = arith.constant 0 : index
    %912 = vector.load %arg29[%c0_305, %c0_306, %c0_307] : memref<1x8x64xf32, #tpu.memory_space<vmem>>, vector<1x8x64xf32>
    tpu.vector_store %arg29[%c0_305, %c0_306, %c0_307], %911 {strides = array<i32>} : memref<1x8x64xf32, #tpu.memory_space<vmem>>, vector<1x8x64xf32>,
    %c0_308 = arith.constant 0 : index
    %c0_309 = arith.constant 0 : index
    %c0_310 = arith.constant 0 : index
    %913 = vector.load %arg3[%c0_308, %c0_309, %c0_310] : memref<1x8x1xi32, #tpu.memory_space<vmem>>, vector<1x8x1xi32>
    %914 = vector.shape_cast %913 : vector<1x8x1xi32> to vector<8x1xi32>
    %cst_311 = arith.constant dense<0xFF800000> : vector<8xf32>
    %915 = vector.multi_reduction <maximumf>, %910, %cst_311 [1] : vector<8x64xf32> to vector<8xf32>
    %916 = vector.shape_cast %915 : vector<8xf32> to vector<8x1xf32>
    %917 = vector.broadcast %916 : vector<8x1xf32> to vector<8x64xf32>
    %918 = arith.subf %910, %917 : vector<8x64xf32>
    %919 = math.exp %918 : vector<8x64xf32>
    %cst_312 = arith.constant dense<0.000000e+00> : vector<8xf32>
    %920 = vector.multi_reduction <add>, %919, %cst_312 [1] : vector<8x64xf32> to vector<8xf32>
    %921 = vector.shape_cast %920 : vector<8xf32> to vector<8x1xf32>
    %922 = math.log %921 : vector<8x1xf32>
    %923 = arith.addf %922, %916 : vector<8x1xf32>
    %924 = tpu.iota {dimensions = array<i32: 1>} : vector<8x64xi32>
    %925 = vector.broadcast %914 : vector<8x1xi32> to vector<8x64xi32>
    %926 = arith.cmpi eq, %924, %925 : vector<8x64xi32>
    %927 = arith.extui %926 : vector<8x64xi1> to vector<8x64xi32>
    %928 = arith.sitofp %927 : vector<8x64xi32> to vector<8x64xf32>
    %929 = arith.mulf %910, %928 : vector<8x64xf32>
    %cst_313 = arith.constant dense<0.000000e+00> : vector<8xf32>
    %930 = vector.multi_reduction <add>, %929, %cst_313 [1] : vector<8x64xf32> to vector<8xf32>
    %931 = vector.shape_cast %930 : vector<8xf32> to vector<8x1xf32>
    %c-100_i32 = arith.constant -100 : i32
    %932 = vector.broadcast %c-100_i32 : i32 to vector<8x1xi32>
    %933 = arith.cmpi ne, %914, %932 : vector<8x1xi32>
    %934 = arith.extui %933 : vector<8x1xi1> to vector<8x1xi32>
    %935 = arith.sitofp %934 : vector<8x1xi32> to vector<8x1xf32>
    %936 = arith.subf %923, %931 : vector<8x1xf32>
    %937 = arith.mulf %936, %935 : vector<8x1xf32>
    %cst_314 = arith.constant dense<0.000000e+00> : vector<1xf32>
    %938 = vector.multi_reduction <add>, %937, %cst_314 [0] : vector<8x1xf32> to vector<1xf32>
    %939 = vector.shape_cast %938 : vector<1xf32> to vector<1x1xf32>
    %940 = vector.shape_cast %939 : vector<1x1xf32> to vector<1x1x1xf32>
    %c0_315 = arith.constant 0 : index
    %c0_316 = arith.constant 0 : index
    %c0_317 = arith.constant 0 : index
    %941 = vector.load %arg30[%c0_315, %c0_316, %c0_317] : memref<1x1x1xf32, #tpu.memory_space<vmem>>, vector<1x1x1xf32>
    tpu.vector_store %arg30[%c0_315, %c0_316, %c0_317], %940 {strides = array<i32>} : memref<1x1x1xf32, #tpu.memory_space<vmem>>, vector<1x1x1xf32>,
    %cst_318 = arith.constant dense<0.000000e+00> : vector<1xf32>
    %942 = vector.multi_reduction <add>, %935, %cst_318 [0] : vector<8x1xf32> to vector<1xf32>
    %943 = vector.shape_cast %942 : vector<1xf32> to vector<1x1xf32>
    %944 = vector.shape_cast %943 : vector<1x1xf32> to vector<1x1x1xf32>
    %c0_319 = arith.constant 0 : index
    %c0_320 = arith.constant 0 : index
    %c0_321 = arith.constant 0 : index
    %945 = vector.load %arg31[%c0_319, %c0_320, %c0_321] : memref<1x1x1xf32, #tpu.memory_space<vmem>>, vector<1x1x1xf32>
    tpu.vector_store %arg31[%c0_319, %c0_320, %c0_321], %944 {strides = array<i32>} : memref<1x1x1xf32, #tpu.memory_space<vmem>>, vector<1x1x1xf32>,
    return
  }
  func.func @transform_0(%arg0: i32) -> (i32, i32, i32) {
    %c0_i32 = arith.constant 0 : i32
    %c0_i32_0 = arith.constant 0 : i32
    %c0_i32_1 = arith.constant 0 : i32
    return %arg0, %c0_i32, %c0_i32_0 : i32, i32, i32
  }
  func.func @transform_1(%arg0: i32) -> (i32, i32, i32) {
    %c0_i32 = arith.constant 0 : i32
    %c0_i32_0 = arith.constant 0 : i32
    %c0_i32_1 = arith.constant 0 : i32
    return %arg0, %c0_i32, %c0_i32_0 : i32, i32, i32
  }
  func.func @transform_2(%arg0: i32) -> (i32, i32, i32) {
    %c0_i32 = arith.constant 0 : i32
    %c0_i32_0 = arith.constant 0 : i32
    %c0_i32_1 = arith.constant 0 : i32
    return %arg0, %c0_i32, %c0_i32_0 : i32, i32, i32
  }
  func.func @transform_3(%arg0: i32) -> (i32, i32, i32) {
    %c0_i32 = arith.constant 0 : i32
    %c0_i32_0 = arith.constant 0 : i32
    %c0_i32_1 = arith.constant 0 : i32
    return %arg0, %c0_i32, %c0_i32_0 : i32, i32, i32
  }
  func.func @transform_4(%arg0: i32) -> (i32, i32) {
    %c0_i32 = arith.constant 0 : i32
    %c0_i32_0 = arith.constant 0 : i32
    %c0_i32_1 = arith.constant 0 : i32
    return %c0_i32, %c0_i32_0 : i32, i32
  }
  func.func @transform_5(%arg0: i32) -> (i32, i32, i32) {
    %c0_i32 = arith.constant 0 : i32
    %c0_i32_0 = arith.constant 0 : i32
    %c0_i32_1 = arith.constant 0 : i32
    %c0_i32_2 = arith.constant 0 : i32
    return %c0_i32, %c0_i32_0, %c0_i32_1 : i32, i32, i32
  }
  func.func @transform_6(%arg0: i32) -> (i32, i32, i32) {
    %c0_i32 = arith.constant 0 : i32
    %c0_i32_0 = arith.constant 0 : i32
    %c0_i32_1 = arith.constant 0 : i32
    %c0_i32_2 = arith.constant 0 : i32
    return %c0_i32, %c0_i32_0, %c0_i32_1 : i32, i32, i32
  }
  func.func @transform_7(%arg0: i32) -> (i32, i32, i32) {
    %c0_i32 = arith.constant 0 : i32
    %c0_i32_0 = arith.constant 0 : i32
    %c0_i32_1 = arith.constant 0 : i32
    %c0_i32_2 = arith.constant 0 : i32
    return %c0_i32, %c0_i32_0, %c0_i32_1 : i32, i32, i32
  }
  func.func @transform_8(%arg0: i32) -> (i32, i32, i32) {
    %c0_i32 = arith.constant 0 : i32
    %c0_i32_0 = arith.constant 0 : i32
    %c0_i32_1 = arith.constant 0 : i32
    %c0_i32_2 = arith.constant 0 : i32
    return %c0_i32, %c0_i32_0, %c0_i32_1 : i32, i32, i32
  }
  func.func @transform_9(%arg0: i32) -> (i32, i32, i32) {
    %c0_i32 = arith.constant 0 : i32
    %c0_i32_0 = arith.constant 0 : i32
    %c0_i32_1 = arith.constant 0 : i32
    %c0_i32_2 = arith.constant 0 : i32
    return %c0_i32, %c0_i32_0, %c0_i32_1 : i32, i32, i32
  }
  func.func @transform_10(%arg0: i32) -> (i32, i32, i32) {
    %c0_i32 = arith.constant 0 : i32
    %c0_i32_0 = arith.constant 0 : i32
    %c0_i32_1 = arith.constant 0 : i32
    %c0_i32_2 = arith.constant 0 : i32
    return %c0_i32, %c0_i32_0, %c0_i32_1 : i32, i32, i32
  }
  func.func @transform_11(%arg0: i32) -> (i32, i32, i32) {
    %c0_i32 = arith.constant 0 : i32
    %c0_i32_0 = arith.constant 0 : i32
    %c0_i32_1 = arith.constant 0 : i32
    %c0_i32_2 = arith.constant 0 : i32
    return %c0_i32, %c0_i32_0, %c0_i32_1 : i32, i32, i32
  }
  func.func @transform_12(%arg0: i32) -> (i32, i32, i32) {
    %c0_i32 = arith.constant 0 : i32
    %c0_i32_0 = arith.constant 0 : i32
    %c0_i32_1 = arith.constant 0 : i32
    %c0_i32_2 = arith.constant 0 : i32
    return %c0_i32, %c0_i32_0, %c0_i32_1 : i32, i32, i32
  }
  func.func @transform_13(%arg0: i32) -> (i32, i32, i32) {
    %c0_i32 = arith.constant 0 : i32
    %c0_i32_0 = arith.constant 0 : i32
    %c0_i32_1 = arith.constant 0 : i32
    %c0_i32_2 = arith.constant 0 : i32
    return %c0_i32, %c0_i32_0, %c0_i32_1 : i32, i32, i32
  }
  func.func @transform_14(%arg0: i32) -> (i32, i32) {
    %c0_i32 = arith.constant 0 : i32
    %c0_i32_0 = arith.constant 0 : i32
    %c0_i32_1 = arith.constant 0 : i32
    return %c0_i32, %c0_i32_0 : i32, i32
  }
  func.func @transform_15(%arg0: i32) -> (i32, i32, i32) {
    %c0_i32 = arith.constant 0 : i32
    %c0_i32_0 = arith.constant 0 : i32
    %c0_i32_1 = arith.constant 0 : i32
    %c0_i32_2 = arith.constant 0 : i32
    return %c0_i32, %c0_i32_0, %c0_i32_1 : i32, i32, i32
  }
  func.func @transform_16(%arg0: i32) -> (i32, i32, i32) {
    %c0_i32 = arith.constant 0 : i32
    %c0_i32_0 = arith.constant 0 : i32
    %c0_i32_1 = arith.constant 0 : i32
    %c0_i32_2 = arith.constant 0 : i32
    return %c0_i32, %c0_i32_0, %c0_i32_1 : i32, i32, i32
  }
  func.func @transform_17(%arg0: i32) -> (i32, i32, i32) {
    %c0_i32 = arith.constant 0 : i32
    %c0_i32_0 = arith.constant 0 : i32
    %c0_i32_1 = arith.constant 0 : i32
    %c0_i32_2 = arith.constant 0 : i32
    return %c0_i32, %c0_i32_0, %c0_i32_1 : i32, i32, i32
  }
  func.func @transform_18(%arg0: i32) -> (i32, i32, i32) {
    %c0_i32 = arith.constant 0 : i32
    %c0_i32_0 = arith.constant 0 : i32
    %c0_i32_1 = arith.constant 0 : i32
    %c0_i32_2 = arith.constant 0 : i32
    return %c0_i32, %c0_i32_0, %c0_i32_1 : i32, i32, i32
  }
  func.func @transform_19(%arg0: i32) -> (i32, i32, i32) {
    %c0_i32 = arith.constant 0 : i32
    %c0_i32_0 = arith.constant 0 : i32
    %c0_i32_1 = arith.constant 0 : i32
    %c0_i32_2 = arith.constant 0 : i32
    return %c0_i32, %c0_i32_0, %c0_i32_1 : i32, i32, i32
  }
  func.func @transform_20(%arg0: i32) -> (i32, i32, i32) {
    %c0_i32 = arith.constant 0 : i32
    %c0_i32_0 = arith.constant 0 : i32
    %c0_i32_1 = arith.constant 0 : i32
    %c0_i32_2 = arith.constant 0 : i32
    return %c0_i32, %c0_i32_0, %c0_i32_1 : i32, i32, i32
  }
  func.func @transform_21(%arg0: i32) -> (i32, i32, i32) {
    %c0_i32 = arith.constant 0 : i32
    %c0_i32_0 = arith.constant 0 : i32
    %c0_i32_1 = arith.constant 0 : i32
    %c0_i32_2 = arith.constant 0 : i32
    return %c0_i32, %c0_i32_0, %c0_i32_1 : i32, i32, i32
  }
  func.func @transform_22(%arg0: i32) -> (i32, i32, i32) {
    %c0_i32 = arith.constant 0 : i32
    %c0_i32_0 = arith.constant 0 : i32
    %c0_i32_1 = arith.constant 0 : i32
    %c0_i32_2 = arith.constant 0 : i32
    return %c0_i32, %c0_i32_0, %c0_i32_1 : i32, i32, i32
  }
  func.func @transform_23(%arg0: i32) -> (i32, i32, i32) {
    %c0_i32 = arith.constant 0 : i32
    %c0_i32_0 = arith.constant 0 : i32
    %c0_i32_1 = arith.constant 0 : i32
    %c0_i32_2 = arith.constant 0 : i32
    return %c0_i32, %c0_i32_0, %c0_i32_1 : i32, i32, i32
  }
  func.func @transform_24(%arg0: i32) -> (i32, i32, i32) {
    %c0_i32 = arith.constant 0 : i32
    %c0_i32_0 = arith.constant 0 : i32
    %c0_i32_1 = arith.constant 0 : i32
    %c0_i32_2 = arith.constant 0 : i32
    return %c0_i32, %c0_i32_0, %c0_i32_1 : i32, i32, i32
  }
  func.func @transform_25(%arg0: i32) -> (i32, i32, i32) {
    %c0_i32 = arith.constant 0 : i32
    %c0_i32_0 = arith.constant 0 : i32
    %c0_i32_1 = arith.constant 0 : i32
    %c0_i32_2 = arith.constant 0 : i32
    return %c0_i32, %c0_i32_0, %c0_i32_1 : i32, i32, i32
  }
  func.func @transform_26(%arg0: i32) -> (i32, i32) {
    %c0_i32 = arith.constant 0 : i32
    %c0_i32_0 = arith.constant 0 : i32
    %c0_i32_1 = arith.constant 0 : i32
    return %c0_i32, %c0_i32_0 : i32, i32
  }
  func.func @transform_27(%arg0: i32) -> (i32, i32) {
    %c0_i32 = arith.constant 0 : i32
    %c0_i32_0 = arith.constant 0 : i32
    %c0_i32_1 = arith.constant 0 : i32
    return %c0_i32, %c0_i32_0 : i32, i32
  }
  func.func @transform_28(%arg0: i32) -> (i32, i32, i32) {
    %c0_i32 = arith.constant 0 : i32
    %c0_i32_0 = arith.constant 0 : i32
    %c0_i32_1 = arith.constant 0 : i32
    return %arg0, %c0_i32, %c0_i32_0 : i32, i32, i32
  }
  func.func @transform_29(%arg0: i32) -> (i32, i32, i32) {
    %c0_i32 = arith.constant 0 : i32
    %c0_i32_0 = arith.constant 0 : i32
    %c0_i32_1 = arith.constant 0 : i32
    return %arg0, %c0_i32, %c0_i32_0 : i32, i32, i32
  }
  func.func @transform_30(%arg0: i32) -> (i32, i32, i32) {
    %c0_i32 = arith.constant 0 : i32
    %c0_i32_0 = arith.constant 0 : i32
    %c0_i32_1 = arith.constant 0 : i32
    return %arg0, %c0_i32, %c0_i32_0 : i32, i32, i32
  }
}

</mosaic_0001>

<bundles_post_ra>
// kernel: t5_forward.1
= control target key start
LH: loop header
LB: loop body
LE: loop exit
PB: predicated region body
PF: predicated region fallthrough
CT: control target
= control target key end

     0   :  { %s5202_s6 = smov 1   ;;  %s5203_s10 = smov 2   ;;  %s6219_s0 = inlined_call_operand.smem [shape: u32[31], index: -1, kind: input, shape index: {}] }
   0x1   :  { %s5265_s5 = sld [smem:[%s6219_s0]]   ;;  %s5204_s14 = smov 3  }
   0x2   :  { %s5270_s9 = sld [smem:[%s6219_s0 + %s5202_s6]]   ;;  %s5205_s18 = smov 4  }
   0x3   :  { %s5275_s13 = sld [smem:[%s6219_s0 + %s5203_s10]]   ;;  %s5206_s22 = smov 5  }
   0x4   :  { %s5280_s17 = sld [smem:[%s6219_s0 + %s5204_s14]]   ;;  %s5207_s26 = smov 6  }
   0x5   :  { %s5285_s21 = sld [smem:[%s6219_s0 + %s5205_s18]]   ;;  %s5208_s30 = smov 7  }
   0x6   :  { %s5290_s25 = sld [smem:[%s6219_s0 + %s5206_s22]]   ;;  %s5209_s4 = smov 8  }
   0x7   :  { %6276 = sst [smem:[#allocation19_spill]] %s5265_s5  ;;  %s5210_s10 = smov 9  }
   0x8   :  { %6277 = sst [smem:[#allocation20_spill]] %s5270_s9  ;;  %s5211_s15 = smov 10  }
   0x9   :  { %6278 = sst [smem:[#allocation21_spill]] %s5275_s13  ;;  %s5212_s20 = smov 11  }
   0xa   :  { %6279 = sst [smem:[#allocation22_spill]] %s5280_s17  ;;  %s5214_s1 = smov 13  }
   0xb   :  { %s5295_s29 = sld [smem:[%s6219_s0 + %s5207_s26]]   ;;  %s5213_s26 = smov 12  }
   0xc   :  { %s5300_s3 = sld [smem:[%s6219_s0 + %s5208_s30]]   ;;  %s5215_s7 = smov 14  }
   0xd   :  { %s5305_s8 = sld [smem:[%s6219_s0 + %s5209_s4]]   ;;  %s5217_s22 = smov 16  }
   0xe   :  { %s5310_s14 = sld [smem:[%s6219_s0 + %s5210_s10]]   ;;  %s5218_s28 = smov 17  }
   0xf   :  { %s5315_s19 = sld [smem:[%s6219_s0 + %s5211_s15]]   ;;  %s5216_s15 = smov 15  }
  0x10   :  { %s5320_s24 = sld [smem:[%s6219_s0 + %s5212_s20]]  }
  0x11   :  { %6280 = sst [smem:[#allocation23_spill]] %s5295_s29 }
  0x12   :  { %6281 = sst [smem:[#allocation24_spill]] %s5300_s3 }
  0x13   :  { %6282 = sst [smem:[#allocation25_spill]] %s5305_s8 }
  0x14   :  { %6283 = sst [smem:[#allocation26_spill]] %s5310_s14 }
  0x15   :  { %6284 = sst [smem:[#allocation27_spill]] %s5315_s19 }
  0x16   :  { %s5325_s30 = sld [smem:[%s6219_s0 + %s5213_s26]]  }
  0x17   :  { %s5330_s6 = sld [smem:[%s6219_s0 + %s5214_s1]]  }
  0x18   :  { %s5335_s12 = sld [smem:[%s6219_s0 + %s5215_s7]]   ;;  %s5219_s7 = smov 18  }
  0x19   :  { %s5340_s20 = sld [smem:[%s6219_s0 + %s5216_s15]]   ;;  %s5220_s15 = smov 19  }
  0x1a   :  { %s5345_s27 = sld [smem:[%s6219_s0 + %s5217_s22]]   ;;  %s5221_s22 = smov 20  }
  0x1b   :  { %s5350_s4 = sld [smem:[%s6219_s0 + %s5218_s28]]   ;;  %s5222_s28 = smov 21  }
  0x1c   :  { %6285 = sst [smem:[#allocation28_spill]] %s5325_s30 }
  0x1d   :  { %6286 = sst [smem:[#allocation29_spill]] %s5330_s6 }
  0x1e   :  { %6287 = sst [smem:[#allocation30_spill]] %s5335_s12 }
  0x1f   :  { %6288 = sst [smem:[#allocation31_spill]] %s5340_s20 }
  0x20   :  { %6289 = sst [smem:[#allocation32_spill]] %s5345_s27 }
  0x21   :  { %6290 = sst [smem:[#allocation33_spill]] %s5350_s4 }
  0x22   :  { %s5355_s13 = sld [smem:[%s6219_s0 + %s5219_s7]]   ;;  %s5223_s7 = smov 22  }
  0x23   :  { %s5360_s12 = sld [smem:[%s6219_s0 + %s5220_s15]]   ;;  %s5224_s15 = smov 23  }
  0x24   :  { %s5365_s29 = sld [smem:[%s6219_s0 + %s5221_s22]]   ;;  %s5225_s22 = smov 24  }
  0x25   :  { %s5370_s20 = sld [smem:[%s6219_s0 + %s5222_s28]]   ;;  %s5226_s28 = smov 25  }
  0x26   :  { %s5380_s27 = sld [smem:[%s6219_s0 + %s5224_s15]]   ;;  %s5228_s15 = smov 27  }
  0x27   :  { %s5385_s9 = sld [smem:[%s6219_s0 + %s5225_s22]]   ;;  %s5229_s22 = smov 28  }
  0x28   :  { %6291 = sst [smem:[#allocation34_spill]] %s5355_s13 }
  0x29   :  { %6292 = sst [smem:[#allocation35_spill]] %s5360_s12 }
  0x2a   :  { %s5375_s13 = sld [smem:[%s6219_s0 + %s5223_s7]]   ;;  %s5227_s7 = smov 26  }
  0x2b   :  { %s5390_s6 = sld [smem:[%s6219_s0 + %s5226_s28]]   ;;  %s5230_s28 = smov 29  }
  0x2c   :  { %s5400_s19 = sld [smem:[%s6219_s0 + %s5228_s15]]  }
  0x2d   :  { %6294 = sst [smem:[#allocation37_spill]] %s5385_s9 }
  0x2e   :  { %s5405_s30 = sld [smem:[%s6219_s0 + %s5229_s22]]  }
  0x30   :  { %6293 = sst [smem:[#allocation36_spill]] %s5375_s13 }
  0x31   :  { %6295 = sst [smem:[#allocation38_spill]] %s5390_s6 }
  0x32   :  { %s5395_s13 = sld [smem:[%s6219_s0 + %s5227_s7]]   ;;  %s5231_s7 = smov 30  }
  0x33   :  { %s5410_s6 = sld [smem:[%s6219_s0 + %s5230_s28]]  }
  0x34   :  { %6297 = sst [smem:[#allocation40_spill]] %s5405_s30 }
  0x38   :  { %6296 = sst [smem:[#allocation39_spill]] %s5395_s13 }
  0x39   :  { %6298 = sst [smem:[#allocation41_spill]] %s5410_s6 }
  0x3a   :  { %s5415_s13 = sld [smem:[%s6219_s0 + %s5231_s7]]  }
  0x3b   :  { %67 = vsyncpa [#allocation3], 0 }
  0x3c   :  { %68 = vsyncpa [#allocation6], 0 }
  0x3d   :  { %69 = vsyncpa [#allocation9], 0 }
  0x3e   :  { %70 = vsyncpa [#allocation12], 0 }
  0x3f   :  { %71 = vsyncpa [#allocation4], 0 }
  0x40   :  { %73 = vsyncpa [#allocation4 + $0x1], 0  ;;  %s5417_s15 = smov 0   ;;  %s5419_s16 = smov 0  }
  0x41   :  { %s5421_s18 = smov 0   ;;  %s5423_s22 = smov 0  }
  0x42 LB: > { %s6299_s14 = sld [smem:[#allocation26_spill]]  ;;  %s5438_s0 = sadd.s32 4294967295, %s5200_s22   ;;  %s5192_s16 = sphi %s5419_s16, %s6357_s16   ;;  %s5188_s15 = sphi %s5417_s15, %s6356_s15   ;;  %s5200_s22 = sphi %s5423_s22, %s6353_s22   ;;  %s5196_s18 = sphi %s5421_s18, %s6358_s18  }
  0x43   : > { %s6300_s9 = sld [smem:[#allocation37_spill]]  ;;  %s4187_s23 = sadd.s32 4294967294, %s5200_s22  }
  0x44   : > { %s6301_s8 = sld [smem:[#allocation25_spill]]  ;;  %s5442_s26 = sadd.s32 1, %s5200_s22  }
  0x45   : > { %s6302_s4 = sld [smem:[#allocation33_spill]]  ;;  %s694_s28 = sadd.s32 1, %s5196_s18 }
  0x46   : > { %s6303_s3 = sld [smem:[#allocation24_spill]]  ;;  %s691_s1 = ssub.s32 %s5200_s22, %s5442_s26 }
  0x47   : > { %s6304_s12 = sld [smem:[#allocation35_spill]]  ;;  %p704_p0 = scmp.ne.s32.totalorder %s5196_s18, %s5192_s16 }
  0x48   : > { %6305 = sst [smem:[#allocation42_spill]] %s5188_s15  ;;  %p692_p1 = scmp.eq.s32.totalorder %s691_s1, 0 }
  0x49   : > { %6306 = sst [smem:[#allocation43_spill]] %s5196_s18  ;;  %p705_p2 = scmp.eq.s32.totalorder %s5438_s0, 1 }
  0x4a   : > { %6307 = sst [smem:[#allocation44_spill]] %s5200_s22  ;;  %p710_p3 = scmp.ne.s32.totalorder %s5192_s16, %s5188_s15 }
  0x4b   : > { %6308 = sst [smem:[#allocation45_spill]] %s5442_s26  ;;  %p711_p4 = scmp.eq.s32.totalorder %s4187_s23, 1 }
  0x4c   : > { %s5453_s2 = scalar_select %p692_p1, %s5196_s18, %s694_s28  }
  0x4d   : > { %p5455_p5 = por %p705_p2, %p704_p0  ;;  %p5459_p6 = por %p711_p4, %p710_p3 }
  0x4e   : > { %6309 = sst [smem:[#allocation46_spill]] %s5453_s2  ;;  %p4188_p7 = scmp.ge.s32.totalorder %s5200_s22, 1 }
  0x4f   : > { %s6310_s7 = scalar_select %p5455_p5, 1, 0 }
  0x50   : > { %s6312_s10 = scalar_select %p5459_p6, 1, 0 }
  0x51   : > { %6311 = sst [smem:[#allocation47_spill]] %s6310_s7  ;;  %p770_p8 = scmp.lt.s32.totalorder %s5200_s22, 3 }
  0x52   : > { %6313 = sst [smem:[#allocation48_spill]] %s6312_s10  ;;  %p4692_p9 = scmp.eq.s32.totalorder %s5438_s0, 0 }
  0x53   : > { %p5466_p10 = pnand %p4188_p7, %p770_p8  ;;  %s837_s1 = sshll.u32 %s6304_s12, 4  ;;  %s838_s1 = int_to_ptr.hbm [resolvable:$true] %s837_s1 }
  0x54   : > { %s865_s23 = sshll.u32 %s5370_s20, 4  ;;  %s5232_s2 = smov [#allocation5]   ;;  %s5480_s23 = int_to_ptr.hbm [resolvable:$true] %s865_s23 }
  0x55   : > { %p4669_p11 = pneg %p5466_p10  ;;  %s839_s18 = sshll.u32 %s5232_s2, 4  ;;  %s840_s18 = int_to_ptr.vmem [resolvable:$true] %s839_s18 }
  0x56   : > { %s4942_s26 = sshra.s32 %s838_s1, 4  ;;  %s4949_s22 = scalar_lea.hbm %s6304_s12, 32  ;;  %s4943_s26 = int_to_ptr.hbm [resolvable:$true] %s4942_s26 }
  0x57   : > { %p5476_p12 = pnand %p4692_p9, %p4669_p11  ;;  %s4944_s10 = scalar_lea.hbm %s4943_s26, 32 }
  0x58   : > { %p4945_p13 = scmp.ne.s32.totalorder %s4943_s26, %s4944_s10  ;;  %p4950_p3 = scmp.lt.s32.totalorder %s4943_s26, %s6304_s12 }
  0x59   : > { %p5484_p0 = pneg %p5476_p12  ;;  %p4951_p4 = scmp.lt.s32.totalorder %s4949_s22, %s4944_s10 }
  0x5b   : > { %p4947_p1 = pnand %p5484_p0, %p4945_p13  ;;  %p4952_p7 = por %p4951_p4, %p4950_p3 }
  0x5d   : > { %p4948_p2 = pneg %p4947_p1 }
  0x5f   : > { %p4953_p8 = pnand %p4952_p7, %p4948_p2 }
  0x61   : > { %4956 = shalt.err (!%p4953_p8)
}
  0x62   : > { %s5233_s2 = smov 64   ;;  %s5234_s6 = smov 4  }
  0x63   : > { %4675 = dma.hbm_to_vmem [thread:$0]  (!%p5476_p12), %s838_s1, 512, %s840_s18, [#allocation6], %s5233_s2, %s5233_s2, %s5234_s6  }
  0x64   : > { %s5235_s7 = smov [#allocation8]   ;;  %s820_s26 = sshll.u32 %s6302_s4, 4  ;;  %s5498_s26 = int_to_ptr.hbm [resolvable:$true] %s820_s26 }
  0x65   : > { %s867_s30 = sshll.u32 %s5235_s7, 4  ;;  %s4972_s22 = sshra.s32 %s5480_s23, 4  ;;  %s868_s30 = int_to_ptr.vmem [resolvable:$true] %s867_s30  ;;  %s4973_s22 = int_to_ptr.hbm [resolvable:$true] %s4972_s22 }
  0x66   : > { %s4974_s10 = scalar_lea.hbm %s4973_s22, 32  ;;  %s4979_s12 = scalar_lea.hbm %s5370_s20, 32 }
  0x67   : > { %p4975_p11 = scmp.ne.s32.totalorder %s4973_s22, %s4974_s10  ;;  %p4980_p2 = scmp.lt.s32.totalorder %s4973_s22, %s5370_s20 }
  0x68   : > { %p4981_p3 = scmp.lt.s32.totalorder %s4979_s12, %s4974_s10 }
  0x69   : > { %p4977_p13 = pnand %p4975_p11, %p5484_p0 }
  0x6a   : > { %p4982_p4 = por %p4981_p3, %p4980_p2 }
  0x6b   : > { %p4978_p1 = pneg %p4977_p13 }
  0x6d   : > { %p4983_p7 = pnand %p4982_p4, %p4978_p1 }
  0x6f   : > { %4986 = shalt.err (!%p4983_p7)
}
  0x70   : > { %4681 = dma.hbm_to_vmem [thread:$0]  (!%p5476_p12), %s5480_s23, 512, %s868_s30, [#allocation9], %s5233_s2, %s5233_s2, %s5234_s6  }
  0x71   : > { %s851_s18 = sshll.u32 %s5365_s29, 4  ;;  %s5236_s7 = smov [#allocation2]   ;;  %s5512_s18 = int_to_ptr.hbm [resolvable:$true] %s851_s18 }
  0x72   : > { %s822_s1 = sshll.u32 %s5236_s7, 4  ;;  %s5002_s12 = sshra.s32 %s5498_s26, 4  ;;  %s823_s1 = int_to_ptr.vmem [resolvable:$true] %s822_s1  ;;  %s5003_s12 = int_to_ptr.hbm [resolvable:$true] %s5002_s12 }
  0x73   : > { %s5004_s22 = scalar_lea.hbm %s5003_s12, 32  ;;  %s5009_s10 = scalar_lea.hbm %s6302_s4, 32 }
  0x74   : > { %p5005_p8 = scmp.ne.s32.totalorder %s5003_s12, %s5004_s22  ;;  %p5010_p1 = scmp.lt.s32.totalorder %s5003_s12, %s6302_s4 }
  0x75   : > { %p5011_p2 = scmp.lt.s32.totalorder %s5009_s10, %s5004_s22 }
  0x76   : > { %p5007_p11 = pnand %p5005_p8, %p5484_p0 }
  0x77   : > { %p5012_p3 = por %p5011_p2, %p5010_p1 }
  0x78   : > { %p5008_p13 = pneg %p5007_p11 }
  0x7a   : > { %p5013_p4 = pnand %p5012_p3, %p5008_p13 }
  0x7c   : > { %5016 = shalt.err (!%p5013_p4)
}
  0x7d   : > { %4672 = dma.hbm_to_vmem [thread:$0]  (!%p5476_p12), %s5498_s26, 512, %s823_s1, [#allocation3], %s5233_s2, %s5233_s2, %s5234_s6  }
  0x7e   : > { %s5237_s30 = smov [#allocation7]   ;;  %s882_s7 = sshll.u32 %s5380_s27, 4  ;;  %s5526_s7 = int_to_ptr.hbm [resolvable:$true] %s882_s7 }
  0x7f   : > { %s853_s23 = sshll.u32 %s5237_s30, 4  ;;  %s5032_s12 = sshra.s32 %s5512_s18, 4  ;;  %s854_s23 = int_to_ptr.vmem [resolvable:$true] %s853_s23  ;;  %s5033_s12 = int_to_ptr.hbm [resolvable:$true] %s5032_s12 }
  0x80   : > { %s5034_s22 = scalar_lea.hbm %s5033_s12, 32  ;;  %s5039_s10 = scalar_lea.hbm %s5365_s29, 32 }
  0x81   : > { %p5035_p7 = scmp.ne.s32.totalorder %s5033_s12, %s5034_s22  ;;  %p5040_p13 = scmp.lt.s32.totalorder %s5033_s12, %s5365_s29 }
  0x82   : > { %p5041_p1 = scmp.lt.s32.totalorder %s5039_s10, %s5034_s22 }
  0x83   : > { %p5037_p8 = pnand %p5035_p7, %p5484_p0 }
  0x84   : > { %p5042_p2 = por %p5041_p1, %p5040_p13 }
  0x85   : > { %p5038_p11 = pneg %p5037_p8 }
  0x87   : > { %p5043_p3 = pnand %p5042_p2, %p5038_p11 }
  0x89   : > { %5046 = shalt.err (!%p5043_p3)
}
  0x8a   : > { %4678 = dma.hbm_to_vmem [thread:$0]  (!%p5476_p12), %s5512_s18, 512, %s854_s23, [#allocation6], %s5233_s2, %s5233_s2, %s5234_s6  }
  0x8b   : > { %s896_s26 = sshll.u32 %s6300_s9, 4  ;;  %s5238_s1 = smov [#allocation10]   ;;  %s5540_s26 = int_to_ptr.hbm [resolvable:$true] %s896_s26 }
  0x8c   : > { %s884_s30 = sshll.u32 %s5238_s1, 4  ;;  %s5062_s12 = sshra.s32 %s5526_s7, 4  ;;  %s885_s30 = int_to_ptr.vmem [resolvable:$true] %s884_s30  ;;  %s5063_s12 = int_to_ptr.hbm [resolvable:$true] %s5062_s12 }
  0x8d   : > { %s5064_s22 = scalar_lea.hbm %s5063_s12, 32  ;;  %s5069_s10 = scalar_lea.hbm %s5380_s27, 32 }
  0x8e   : > { %p5065_p4 = scmp.ne.s32.totalorder %s5063_s12, %s5064_s22  ;;  %p5070_p11 = scmp.lt.s32.totalorder %s5063_s12, %s5380_s27 }
  0x8f   : > { %p5071_p13 = scmp.lt.s32.totalorder %s5069_s10, %s5064_s22 }
  0x90   : > { %p5067_p7 = pnand %p5065_p4, %p5484_p0 }
  0x91   : > { %p5072_p1 = por %p5071_p13, %p5070_p11 }
  0x92   : > { %p5068_p8 = pneg %p5067_p7 }
  0x94   : > { %p5073_p2 = pnand %p5072_p1, %p5068_p8 }
  0x96   : > { %5076 = shalt.err (!%p5073_p2)
}
  0x97   : > { %4684 = dma.hbm_to_vmem [thread:$0]  (!%p5476_p12), %s5526_s7, 512, %s885_s30, [#allocation9], %s5233_s2, %s5233_s2, %s5234_s6  }
  0x98   : > { %s5239_s18 = smov [#allocation11]   ;;  %s5092_s1 = sshra.s32 %s5540_s26, 4  ;;  %s5093_s1 = int_to_ptr.hbm [resolvable:$true] %s5092_s1 }
  0x99   : > { %s898_s23 = sshll.u32 %s5239_s18, 4  ;;  %s5094_s12 = scalar_lea.hbm %s5093_s1, 32  ;;  %s899_s23 = int_to_ptr.vmem [resolvable:$true] %s898_s23 }
  0x9a   : > { %p5095_p3 = scmp.ne.s32.totalorder %s5093_s1, %s5094_s12  ;;  %s5099_s22 = scalar_lea.hbm %s6300_s9, 32 }
  0x9b   : > { %p5100_p8 = scmp.lt.s32.totalorder %s5093_s1, %s6300_s9  ;;  %p5101_p11 = scmp.lt.s32.totalorder %s5099_s22, %s5094_s12 }
  0x9c   : > { %p5097_p4 = pnand %p5095_p3, %p5484_p0 }
  0x9d   : > { %p5102_p13 = por %p5101_p11, %p5100_p8 }
  0x9e   : > { %p5098_p7 = pneg %p5097_p4 }
  0xa0   : > { %p5103_p1 = pnand %p5102_p13, %p5098_p7 }
  0xa2   : > { %5106 = shalt.err (!%p5103_p1)
}
  0xa3   : > { %4687 = dma.hbm_to_vmem [thread:$0]  (!%p5476_p12), %s5540_s26, 512, %s899_s23, [#allocation12], %s5233_s2, %s5233_s2, %s5234_s6  }
  0xa4   : > { %950 = sbr.rel (%p5466_p10) target bundleno = 10141 (0x279d), region = 132 }
  0xa9   : > { %5167 = dma.done.wait (%p4692_p9), [#allocation3], 512  }
  0xaa   : > { %5169 = vsyncadd (%p4692_p9), [#allocation3], 4294966784 }
  0xab   : > { %5171 = dma.done.wait (%p4692_p9), [#allocation6], 1024  }
  0xac   : > { %5173 = vsyncadd (%p4692_p9), [#allocation6], 4294966272 }
  0xad   : > { %5175 = dma.done.wait (%p4692_p9), [#allocation9], 1024  }
  0xae   : > { %5177 = vsyncadd (%p4692_p9), [#allocation9], 4294966272 }
  0xaf   : > { %5179 = dma.done.wait (%p4692_p9), [#allocation12], 512  }
  0xb0   : > { %5181 = vsyncadd (%p4692_p9), [#allocation12], 4294966784  ;;  %s6317_s5 = sld [smem:[#allocation19_spill]]  ;;  %p1070_p10 = scmp.lt.s32.totalorder %s5438_s0, 1  ;;  %v5240_v0 = vmov 0   ;;  %v5596_v2 = vld [vmem:[%s5285_s21 + $0x38] sm:$0xff]  ;;  %v1117_v10 = vlaneseq }
  0xb1   : > { %s6318_s17 = sld [smem:[#allocation22_spill]]  ;;  %4792 = vset.pattern.permute.xlu0 %v5240_v0  ;;  %4793 = vset.pattern.permute.xlu1 %v5240_v0  ;;  %v5599_v3 = vld [vmem:[%s5285_s21 + $0x30] sm:$0xff]  ;;  %v5603_v4 = vld [vmem:[%s5285_s21 + $0x28] sm:$0xff]  ;;  %v5606_v5 = vld [vmem:[%s5285_s21 + $0x20] sm:$0xff]  ;;  %vm1125_vm0 = vcmask 523264   ;;  %v5241_v13 = vmov 0.0  }
  0xb2   : > { %s5584_s6 = scalar_select %p1070_p10, %s5438_s0, 1  ;;  %1137 = vmatpush.msra.mxu0 %v5596_v2  ;;  %v5611_v6 = vld [vmem:[%s5285_s21 + $0x18] sm:$0xff]  ;;  %v5615_v7 = vld [vmem:[%s5285_s21 + $0x10] sm:$0xff]  ;;  %v5620_v8 = vld [vmem:[%s5285_s21 + $0x8] sm:$0xff]  ;;  %v5627_v11 = vand.u32 127, %v1117_v10  ;;  %vm1151_vm2 = vcmask 261120  }
  0xb3   : > { %v5624_v9 = vld [vmem:[%s5285_s21] sm:$0xff]  ;;  %v5242_v18 = vmov 32.0   ;;  %v4582_v22 = vld [vmem:[%s6301_s8 + $0x8] sm:$0xff]  ;;  %s6263_s2 = smov 72   ;;  %s6245_s7 = smov 64   ;;  %vm1257_vm7 = vcmask 1043456  }
  0xb4   : > { %s5587_s15 = sshll.u32 %s5584_s6, 3  ;;  %1138 = vmatpush.msra.mxu0 %v5599_v3  ;;  %4807 = vrcp.f32 %v5242_v18  ;;  %1205 = vmatpush.bf16.msra.mxu1 %v4582_v22  ;;  %v4581_v24 = vld [vmem:[%s6301_s8] sm:$0xff]  ;;  %s6261_s26 = smov 96   ;;  %vm1220_vm8 = vcmask 64512   ;;  %vm1455_vm9 = vcmask 130048   ;;  %vm1457_vm10 = vcmask 195584  }
  0xb5   : > { %v4795_v36 = vld [vmem:[%s6303_s3] ss:$0 sm:$0xff]  ;;  %s6259_s30 = smov 88   ;;  %s6257_s10 = smov 120  }
  0xb6   : > { %s1073_s11 = scalar_lea.vmem %s6317_s5, %s5587_s15  ;;  %1139 = vmatpush.msra.mxu0 %v5603_v4  ;;  %v1101_v51 = vld [vmem:[%s5290_s25] sm:$0xff]  ;;  %s6253_s18 = smov 112  }
  0xb7   : > { %s5593_s28 = scalar_lea.vmem %s6318_s17, %s5584_s6  ;;  %v1116_v1 = vld [vmem:[%s1073_s11] sm:$0xff]  ;;  %s6255_s23 = smov 80  }
  0xb8   : > { %1120 = vperm.xlu0 %4792, %v1116_v1   ;;  %1140 = vmatpush.msra.mxu0 %v5606_v5  ;;  %v4794_v50 = vld [vmem:[%s5593_s28] ss:$0 sm:$0xff]  ;;  %s6265_s1 = smov 104   ;;  %s6241_s12 = smov 56  }
  0xb9   : > { %1206 = vmatpush.bf16.msra.mxu1 %v4581_v24  ;;  %v5664_v52 = vadd.f32 %v4794_v50, %v1101_v51  ;;  %s6243_s22 = smov 48   ;;  %s6239_s11 = smov 40  }
  0xba   : > { %1141 = vmatpush.msra.mxu0 %v5611_v6  ;;  %v4808_v19 = vpop.eup %4807  ;;  %s6333_s4 = smov 104   ;;  %s6334_s5 = smov 72  }
  0xbb   : > { %v1156_v20 = vmul.f32 32.0, %v4808_v19  ;;  %vm1160_vm3 = vweird.f32 %v4808_v19  ;;  %s6337_s9 = smov 120   ;;  %s6344_s17 = sld [smem:[#allocation38_spill]] }
  0xbc   : > { %1142 = vmatpush.msra.mxu0 %v5615_v7 }
  0xbd   : > { %v1157_v21 = vsub.f32 1.0, %v1156_v20  ;;  %v1103_v20 = vld [vmem:[%s5290_s25 + $0x10] sm:$0xff] }
  0xbe   : > { %1143 = vmatpush.msra.mxu0 %v5620_v8 }
  0xbf   : > { %v1158_v23 = vmul.f32 %v4808_v19, %v1157_v21  ;;  %v5682_v21 = vadd.f32 %v4794_v50, %v1103_v20 }
  0xc0   : > { %1144 = vmatpush.msra.mxu0 %v5624_v9 }
  0xc1   : > { %v1159_v25 = vadd.f32 %v4808_v19, %v1158_v23 }
  0xc3   : > { %v5639_v26 = vsel %vm1160_vm3, %v4808_v19, %v1159_v25 }
 0x12a   : > { %v1121_v12 = vpop.permute.xlu0 %1120 }
 0x12b   : > { %vm1122_vm1 = vcmp.eq.s32.totalorder %v5627_v11, %v1121_v12 }
 0x12c   : > { %v4207_v14 = vsel %vm1122_vm1, 1.0, %v5241_v13 }
 0x12d   : > { %4208 = vmatmul.msk.f32.vlgmr.msra.gmra.mxu0 %vm1125_vm0, %v4207_v14 }
 0x1aa   : > { %v5632_v15 = vpop.f32.mrf.mxu0 }
 0x1ab   : > { %v1150_v16 = vmul.f32 %v5632_v15, %v5632_v15 }
 0x1ad   : > { %v1152_v17 = vsel %vm1151_vm2, %v1150_v16, 0.0 }
 0x1ae   : > { %1153 = vadd.xlane.f32.xlu0 %v1152_v17 }
 0x221   : > { %v1154_v27 = vpop.xlane.xlu0 %1153 }
 0x222   : > { %v1162_v28 = vmul.f32 %v5639_v26, %v1154_v27 }
 0x224   : > { %v1163_v29 = vadd.f32 1e-06, %v1162_v28 }
 0x226   : > { %4809 = vrsqrt.f32 %v1163_v29  ;;  %vm1170_vm5 = vweird.f32 %v1163_v29 }
 0x22c   : > { %v4810_v30 = vpop.eup %4809 }
 0x22d   : > { %v1165_v31 = vmul.f32 %v4810_v30, %v1163_v29  ;;  %vm1171_vm4 = vweird.f32 %v4810_v30  ;;  %v1102_v29 = vld [vmem:[%s5290_s25 + $0x8] sm:$0xff] }
 0x22e   : > { %vm1172_vm6 = vmor %vm1170_vm5, %vm1171_vm4 }
 0x22f   : > { %v1166_v32 = vmul.f32 %v4810_v30, %v1165_v31 }
 0x231   : > { %v1167_v33 = vmul.f32 0.5, %v1166_v32 }
 0x233   : > { %v1168_v34 = vsub.f32 1.5, %v1167_v33 }
 0x235   : > { %v1169_v35 = vmul.f32 %v4810_v30, %v1168_v34 }
 0x237   : > { %v1173_v37 = vsel %vm1172_vm6, %v4810_v30, %v1169_v35  ;;  %v5689_v30 = vadd.f32 %v4794_v50, %v1102_v29  ;;  %v1104_v35 = vld [vmem:[%s5290_s25 + $0x18] sm:$0xff] }
 0x238   : > { %v1174_v38 = vmul.f32 %v1173_v37, %v5632_v15 }
 0x23a   : > { %v1178_v39 = vmul.f32 %v4795_v36, %v1174_v38  ;;  %v5696_v36 = vadd.f32 %v4794_v50, %v1104_v35 }
 0x23c   : > { %v1179_v40 = vpack.c.bf16 %v1178_v39, %v1178_v39 }
 0x23e   : > { %4217 = vmatmul.msk.bf16.vlgmr.msra.gmra.mxu1 %vm1151_vm2, %v1179_v40 }
 0x2bb   : > { %v1208_v41 = vpop.f32.mrf.mxu1 }
 0x2bc   : > { %v5645_v42 = vpack.c.bf16 %v1208_v41, %v1208_v41 }
 0x2be   : > { %1388 = vrot.lane.b32.xlu0 %v5645_v42, %s6263_s2  ;;  %1252 = vrot.lane.b32.xlu2 %v5645_v42, %s6245_s7  ;;  %s6319_s7 = sld [smem:[#allocation28_spill]] }
 0x2bf   : > { %1218 = vrot.lane.b32.xlu1 %v5645_v42, %s6261_s26 }
 0x2c3   : > { %v1210_v43 = vpop.f32.mrf.mxu1 }
 0x2c6   : > { %1276 = vrot.lane.b32.xlu2 %v5645_v42, %s6259_s30 }
 0x2ce   : > { %1274 = vrot.lane.b32.xlu2 %v5645_v42, %s6257_s10 }
 0x318   : > { %v1253_v44 = vpop.permute.xlu2 %1252 }
 0x319   : > { %v1259_v45 = vsel %vm1257_vm7, %v1253_v44, 0 }
 0x31a   : > { %1268 = vmatpush.bf16.msra.mxu3 %v1259_v45 }
 0x320   : > { %v1277_v46 = vpop.permute.xlu2 %1276 }
 0x321   : > { %v1282_v47 = vsel %vm1220_vm8, %v1277_v46, 0 }
 0x322   : > { %1291 = vmatpush.bf16.xpose.msrb.mxu3 %v1282_v47 }
 0x328   : > { %v1275_v62 = vpop.permute.xlu2 %1274 }
 0x330   : > { %v1389_v12 = vpop.permute.xlu0 %1388 }
 0x331   : > { %v1219_v48 = vpop.permute.xlu1 %1218  ;;  %v1394_v17 = vsel %vm1220_vm8, %v1389_v12, 0 }
 0x332   : > { %v1225_v49 = vsel %vm1220_vm8, %v1219_v48, 0 }
 0x333   : > { %1234 = vmatpush.bf16.xpose.msra.mxu2 %v1225_v49 }
 0x33a   : > { %4218 = vmatmul.msk.bf16.vlgmr.msra.gmra.mxu2 %vm1220_vm8, %v5645_v42 }
 0x3bd   : > { %v1236_v53 = vpop.f32.mrf.mxu2 }
 0x3be   : > { %v1237_v54 = vadd.f32 %v1236_v53, %v5664_v52 }
 0x3c0   : > { %v1240_v55 = vsel %vm1220_vm8, %v1237_v54, -inf }
 0x3c1   : > { %1241 = vmax.xlane.f32.xlu1 %v1240_v55 }
 0x3c5   : > { %v1238_v56 = vpop.f32.mrf.mxu2 }
 0x3da   : > { %1330 = vrot.lane.b32.xlu1 %v5645_v42, %s6253_s18 }
 0x434   : > { %v1242_v57 = vpop.xlane.xlu1 %1241 }
 0x435   : > { %v1243_v58 = vsub.f32 %v1237_v54, %v1242_v57 }
 0x437   : > { %v1244_v59 = vmul.f32 1.442695, %v1243_v58 }
 0x439   : > { %4811 = vpow2.f32 %v1244_v59 }
 0x43f   : > { %v4812_v60 = vpop.eup %4811 }
 0x440   : > { %v1246_v61 = vsel %vm1220_vm8, %v4812_v60, 0.0 }
 0x441   : > { %1247 = vadd.xlane.f32.xlu2 %v1246_v61 }
 0x44c   : > { %v1331_v18 = vpop.permute.xlu1 %1330 }
 0x459   : > { %1332 = vrot.lane.b32.xlu2 %v5645_v42, %s6255_s23 }
 0x461   : > { %1386 = vrot.lane.b32.xlu2 %v5645_v42, %s6265_s1 }
 0x4b4   : > { %v1248_v63 = vpop.xlane.xlu2 %1247 }
 0x4b5   : > { %4813 = vrcp.f32 %v1248_v63 }
 0x4bb   : > { %v4814_v0 = vpop.eup %4813 }
 0x4bc   : > { %v1333_v1 = vpop.permute.xlu2 %1332  ;;  %v1250_v10 = vmul.f32 %v4814_v0, %v4812_v60 }
 0x4bd   : > { %v1338_v14 = vsel %vm1220_vm8, %v1333_v1, 0 }
 0x4be   : > { %1347 = vmatpush.bf16.xpose.msrb.mxu1 %v1338_v14  ;;  %v1251_v16 = vpack.c.bf16 %v1250_v10, %v1250_v10 }
 0x4c0   : > { %4219 = vmatmul.msk.bf16.vlgmr.msra.gmra.mxu3 %vm1220_vm8, %v1251_v16 }
 0x4c1   : > { %1403 = vmatpush.bf16.xpose.msra.mxu3 %v1394_v17 }
 0x4c4   : > { %v1387_v19 = vpop.permute.xlu2 %1386 }
 0x4c5   : > { %4222 = vmatmul.msk.bf16.vlgmr.msrb.gmra.mxu1 %vm1220_vm8, %v1331_v18 }
 0x4d0   : > { %4220 = vmatmul.msk.bf16.vlgmr.msrb.gmra.mxu3 %vm1220_vm8, %v1275_v62 }
 0x4e0   : > { %4224 = vmatmul.msk.bf16.vlgmr.msra.gmra.mxu3 %vm1220_vm8, %v1387_v19 }
 0x542   : > { %v1349_v22 = vpop.f32.mrf.mxu1 }
 0x543   : > { %v1350_v23 = vadd.f32 %v1349_v22, %v5682_v21  ;;  %v5685_v24 = vpop.f32.mrf.mxu3 }
 0x545   : > { %v1353_v25 = vsel %vm1220_vm8, %v1350_v23, -inf }
 0x546   : > { %1354 = vmax.xlane.f32.xlu0 %v1353_v25 }
 0x54a   : > { %v1351_v27 = vpop.f32.mrf.mxu1 }
 0x54b   : > { %v1272_v28 = vpop.f32.mrf.mxu3 }
 0x553   : > { %v1293_v31 = vpop.f32.mrf.mxu3 }
 0x554   : > { %v1294_v32 = vadd.f32 %v1293_v31, %v5689_v30 }
 0x556   : > { %v1297_v33 = vsel %vm1220_vm8, %v1294_v32, -inf }
 0x557   : > { %1298 = vmax.xlane.f32.xlu2 %v1297_v33  ;;  %v4583_v33 = vld [vmem:[%s6299_s14] sm:$0xff] }
 0x55a   : > { %1309 = vrot.lane.b32.xlu0 %v5645_v42, %s6241_s12  ;;  %s6249_s12 = smov 16  }
 0x55b   : > { %v1295_v34 = vpop.f32.mrf.mxu3 }
 0x563   : > { %v1405_v37 = vpop.f32.mrf.mxu3 }
 0x564   : > { %v1406_v38 = vadd.f32 %v1405_v37, %v5696_v36 }
 0x566   : > { %v1409_v39 = vsel %vm1220_vm8, %v1406_v38, -inf }
 0x567   : > { %1410 = vmax.xlane.f32.xlu1 %v1409_v39 }
 0x56b   : > { %v1407_v40 = vpop.f32.mrf.mxu3 }
 0x5b9   : > { %v1355_v41 = vpop.xlane.xlu0 %1354 }
 0x5ba   : > { %v1356_v43 = vsub.f32 %v1350_v23, %v1355_v41 }
 0x5bc   : > { %v1357_v44 = vmul.f32 1.442695, %v1356_v43 }
 0x5be   : > { %4815 = vpow2.f32 %v1357_v44 }
 0x5c4   : > { %v4816_v45 = vpop.eup %4815 }
 0x5c5   : > { %v1359_v46 = vsel %vm1220_vm8, %v4816_v45, 0.0 }
 0x5c6   : > { %1360 = vadd.xlane.f32.xlu2 %v1359_v46 }
 0x5ca   : > { %v1299_v47 = vpop.xlane.xlu2 %1298 }
 0x5cb   : > { %v1300_v48 = vsub.f32 %v1294_v32, %v1299_v47  ;;  %v4584_v32 = vld [vmem:[%s6299_s14 + $0x8] sm:$0xff] }
 0x5cc   : > { %v1310_v49 = vpop.permute.xlu0 %1309  ;;  %1481 = vmatpush.bf16.msra.mxu1 %v4584_v32 }
 0x5cd   : > { %v1301_v50 = vmul.f32 1.442695, %v1300_v48  ;;  %v1315_v51 = vsel %vm1257_vm7, %v1310_v49, 0  ;;  %v4588_v48 = vld [vmem:[%s6319_s7 + $0x8] sm:$0xff]  ;;  %v4585_v49 = vld [vmem:[%s5320_s24] sm:$0xff] }
 0x5ce   : > { %1324 = vmatpush.bf16.msrb.mxu0 %v1315_v51  ;;  %1583 = vmatpush.bf16.msrb.mxu3 %v4588_v48 }
 0x5cf   : > { %4817 = vpow2.f32 %v1301_v50  ;;  %v4587_v50 = vld [vmem:[%s6319_s7] sm:$0xff] }
 0x5d0   : > { %1482 = vmatpush.bf16.msra.mxu1 %v4583_v33 }
 0x5d2   : > { %1584 = vmatpush.bf16.msrb.mxu3 %v4587_v50 }
 0x5d5   : > { %v4818_v53 = vpop.eup %4817 }
 0x5d6   : > { %v1303_v54 = vsel %vm1220_vm8, %v4818_v53, 0.0 }
 0x5d7   : > { %1304 = vadd.xlane.f32.xlu2 %v1303_v54 }
 0x5da   : > { %v1411_v55 = vpop.xlane.xlu1 %1410 }
 0x5db   : > { %v1412_v56 = vsub.f32 %v1406_v38, %v1411_v55 }
 0x5dd   : > { %v1413_v57 = vmul.f32 1.442695, %v1412_v56 }
 0x5df   : > { %4819 = vpow2.f32 %v1413_v57 }
 0x5e5   : > { %v4820_v58 = vpop.eup %4819 }
 0x5e6   : > { %v1415_v59 = vsel %vm1220_vm8, %v4820_v58, 0.0 }
 0x5e7   : > { %1416 = vadd.xlane.f32.xlu1 %v1415_v59 }
 0x5ef   : > { %1365 = vrot.lane.b32.xlu2 %v5645_v42, %s6243_s22  ;;  %s6247_s22 = smov 24  }
 0x600   : > { %1421 = vrot.lane.b32.xlu1 %v5645_v42, %s6239_s11  ;;  %s6251_s11 = smov 8  }
 0x639   : > { %v1361_v60 = vpop.xlane.xlu2 %1360 }
 0x63a   : > { %4821 = vrcp.f32 %v1361_v60 }
 0x640   : > { %v4822_v62 = vpop.eup %4821 }
 0x641   : > { %v1363_v0 = vmul.f32 %v4822_v62, %v4816_v45 }
 0x643   : > { %v1364_v16 = vpack.c.bf16 %v1363_v0, %v1363_v0 }
 0x64a   : > { %v1305_v61 = vpop.xlane.xlu2 %1304 }
 0x64b   : > { %4823 = vrcp.f32 %v1305_v61 }
 0x651   : > { %v4824_v63 = vpop.eup %4823 }
 0x652   : > { %v1307_v1 = vmul.f32 %v4824_v63, %v4818_v53  ;;  %v1366_v10 = vpop.permute.xlu2 %1365 }
 0x653   : > { %v1371_v12 = vsel %vm1257_vm7, %v1366_v10, 0 }
 0x654   : > { %1380 = vmatpush.bf16.msrb.mxu2 %v1371_v12  ;;  %v1308_v14 = vpack.c.bf16 %v1307_v1, %v1307_v1 }
 0x656   : > { %4221 = vmatmul.msk.bf16.vlgmr.msrb.gmra.mxu0 %vm1220_vm8, %v1308_v14 }
 0x657   : > { %4223 = vmatmul.msk.bf16.vlgmr.msrb.gmra.mxu2 %vm1220_vm8, %v1364_v16 }
 0x65a   : > { %v1417_v17 = vpop.xlane.xlu1 %1416 }
 0x65b   : > { %4825 = vrcp.f32 %v1417_v17 }
 0x661   : > { %v4826_v42 = vpop.eup %4825 }
 0x662   : > { %v1419_v18 = vmul.f32 %v4826_v42, %v4820_v58 }
 0x664   : > { %v1420_v22 = vpack.c.bf16 %v1419_v18, %v1419_v18 }
 0x672   : > { %v1422_v19 = vpop.permute.xlu1 %1421 }
 0x673   : > { %v1427_v20 = vsel %vm1257_vm7, %v1422_v19, 0 }
 0x674   : > { %1436 = vmatpush.bf16.msra.mxu0 %v1427_v20 }
 0x677   : > { %4225 = vmatmul.msk.bf16.vlgmr.msra.gmra.mxu0 %vm1220_vm8, %v1420_v22 }
 0x6d3   : > { %v1326_v23 = vpop.f32.mrf.mxu0 }
 0x6d4   : > { %1443 = vrot.lane.b32.xlu0 %v1326_v23, %s6251_s11  ;;  %s6322_s11 = sld [smem:[#allocation29_spill]] }
 0x6da   : > { %v1382_v25 = vpop.f32.mrf.mxu2  ;;  %v4592_v1 = vld [vmem:[%s6322_s11 + $0x18] sm:$0xff]  ;;  %v4591_v10 = vld [vmem:[%s6322_s11 + $0x10] sm:$0xff]  ;;  %v4590_v12 = vld [vmem:[%s6322_s11 + $0x8] sm:$0xff] }
 0x6db   : > { %v1328_v27 = vpop.f32.mrf.mxu0  ;;  %1623 = vmatpush.bf16.msrb.mxu0 %v4592_v1  ;;  %v4589_v14 = vld [vmem:[%s6322_s11] sm:$0xff] }
 0x6dc   : > { %1447 = vrot.lane.b32.xlu0 %v1382_v25, %s6249_s12 }
 0x6df   : > { %1624 = vmatpush.bf16.msrb.mxu0 %v4591_v10 }
 0x6e2   : > { %v1384_v28 = vpop.f32.mrf.mxu2 }
 0x6e3   : > { %1625 = vmatpush.bf16.msrb.mxu0 %v4590_v12 }
 0x6e7   : > { %1626 = vmatpush.bf16.msrb.mxu0 %v4589_v14 }
 0x6f4   : > { %v1438_v29 = vpop.f32.mrf.mxu0 }
 0x6f5   : > { %1451 = vrot.lane.b32.xlu2 %v1438_v29, %s6247_s22  ;;  %s6320_s22 = sld [smem:[#allocation27_spill]] }
 0x6fb   : > { %s6321_s12 = smov %s6320_s22  ;;  %v4796_v60 = vld [vmem:[%s6320_s22] ss:$0 sm:$0xff]  ;;  %s6323_s22 = smov 64  }
 0x6fc   : > { %v1440_v31 = vpop.f32.mrf.mxu0 }
 0x746   : > { %v1444_v34 = vpop.permute.xlu0 %1443 }
 0x747   : > { %v1454_v35 = vsel %vm1220_vm8, %v5685_v24, %v1444_v34  ;;  %v4586_v24 = vld [vmem:[%s5320_s24 + $0x8] sm:$0xff] }
 0x748   : > { %1549 = vmatpush.bf16.msra.mxu2 %v4586_v24 }
 0x74c   : > { %1550 = vmatpush.bf16.msra.mxu2 %v4585_v49 }
 0x74e   : > { %v1448_v37 = vpop.permute.xlu0 %1447 }
 0x74f   : > { %v1456_v38 = vsel %vm1455_vm9, %v1454_v35, %v1448_v37  ;;  %v1452_v39 = vpop.permute.xlu2 %1451 }
 0x750   : > { %v1458_v40 = vsel %vm1457_vm10, %v1456_v38, %v1452_v39 }
 0x751   : > { %v1459_v41 = vpack.c.bf16 %v1458_v40, %v1458_v40  ;;  %v4594_v40 = vld [vmem:[%s6301_s8 + $0x18] sm:$0xff] }
 0x752   : > { %1683 = vmatpush.bf16.msrb.mxu1 %v4594_v40 }
 0x753   : > { %4234 = vmatmul.msk.bf16.vlgmr.msra.gmra.mxu1 %vm1151_vm2, %v1459_v41  ;;  %v4593_v41 = vld [vmem:[%s6301_s8 + $0x10] sm:$0xff]  ;;  %s6336_s8 = smov 88  }
 0x756   : > { %1684 = vmatpush.bf16.msrb.mxu1 %v4593_v41 }
 0x7d0   : > { %v1484_v43 = vpop.f32.mrf.mxu1 }
 0x7d1   : > { %v1488_v44 = vadd.f32 %v1484_v43, %v5632_v15 }
 0x7d3   : > { %v1506_v45 = vmul.f32 %v1488_v44, %v1488_v44 }
 0x7d5   : > { %v1507_v46 = vsel %vm1151_vm2, %v1506_v45, 0.0 }
 0x7d6   : > { %1508 = vadd.xlane.f32.xlu0 %v1507_v46 }
 0x7d8   : > { %v1486_v47 = vpop.f32.mrf.mxu1 }
 0x849   : > { %v1509_v51 = vpop.xlane.xlu0 %1508 }
 0x84a   : > { %v1510_v53 = vmul.f32 %v1509_v51, %v5639_v26  ;;  %v4797_v51 = vld [vmem:[%s6303_s3 + $0x1] ss:$0 sm:$0xff] }
 0x84c   : > { %v1511_v54 = vadd.f32 1e-06, %v1510_v53 }
 0x84e   : > { %4827 = vrsqrt.f32 %v1511_v54  ;;  %vm1518_vm12 = vweird.f32 %v1511_v54 }
 0x854   : > { %v4828_v15 = vpop.eup %4827 }
 0x855   : > { %v1513_v55 = vmul.f32 %v4828_v15, %v1511_v54  ;;  %vm1519_vm11 = vweird.f32 %v4828_v15 }
 0x856   : > { %vm1520_vm13 = vmor %vm1518_vm12, %vm1519_vm11 }
 0x857   : > { %v1514_v56 = vmul.f32 %v4828_v15, %v1513_v55 }
 0x859   : > { %v1515_v57 = vmul.f32 0.5, %v1514_v56 }
 0x85b   : > { %v1516_v58 = vsub.f32 1.5, %v1515_v57 }
 0x85d   : > { %v1517_v59 = vmul.f32 %v4828_v15, %v1516_v58 }
 0x85f   : > { %v1521_v61 = vsel %vm1520_vm13, %v4828_v15, %v1517_v59 }
 0x860   : > { %v1522_v62 = vmul.f32 %v1521_v61, %v1488_v44 }
 0x862   : > { %v1526_v63 = vmul.f32 %v4796_v60, %v1522_v62 }
 0x864   : > { %v1527_v0 = vpack.c.bf16 %v1526_v63, %v1526_v63 }
 0x866   : > { %4243 = vmatmul.msk.bf16.vlgmr.msra.gmra.mxu2 %vm1151_vm2, %v1527_v0  ;;  %4252 = vmatmul.msk.bf16.vlgmr.msrb.gmra.mxu3 %vm1151_vm2, %v1527_v0 }
 0x8e9   : > { %v1552_v16 = vpop.f32.mrf.mxu2  ;;  %v1586_v17 = vpop.f32.mrf.mxu3 }
 0x8ea   : > { %v1556_v42 = vmul.f32 %v1552_v16, %v1552_v16 }
 0x8ec   : > { %v1557_v18 = vmul.f32 %v1556_v42, %v1552_v16 }
 0x8ee   : > { %v1558_v19 = vmul.f32 0.044715, %v1557_v18 }
 0x8f0   : > { %v1559_v20 = vadd.f32 %v1558_v19, %v1552_v16 }
 0x8f1   : > { %v1554_v22 = vpop.f32.mrf.mxu2  ;;  %v1588_v23 = vpop.f32.mrf.mxu3 }
 0x8f2   : > { %v1560_v25 = vmul.f32 0.7978846, %v1559_v20 }
 0x8f4   : > { %4829 = vtanh.f32 %v1560_v25 }
 0x8fa   : > { %v4830_v27 = vpop.eup %4829 }
 0x8fb   : > { %v1562_v28 = vadd.f32 1.0, %v4830_v27 }
 0x8fd   : > { %v1563_v29 = vmul.f32 0.5, %v1562_v28 }
 0x8ff   : > { %v1564_v31 = vmul.f32 %v1563_v29, %v1552_v16 }
 0x901   : > { %v1590_v32 = vmul.f32 %v1586_v17, %v1564_v31 }
 0x903   : > { %v1591_v33 = vpack.c.bf16 %v1590_v32, %v1590_v32 }
 0x905   : > { %4269 = vmatmul.msk.bf16.vlgmr.msrb.gmra.mxu0 %vm1125_vm0, %v1591_v33 }
 0x982   : > { %v1628_v34 = vpop.f32.mrf.mxu0 }
 0x983   : > { %v5738_v35 = vadd.f32 %v1628_v34, %v1488_v44 }
 0x985   : > { %v1635_v37 = vmul.f32 %v5738_v35, %v5738_v35 }
 0x987   : > { %v1636_v38 = vsel %vm1151_vm2, %v1635_v37, 0.0 }
 0x988   : > { %1637 = vadd.xlane.f32.xlu1 %v1636_v38 }
 0x98a   : > { %v1630_v39 = vpop.f32.mrf.mxu0 }
 0x9fb   : > { %v1638_v43 = vpop.xlane.xlu1 %1637 }
 0x9fc   : > { %v1639_v45 = vmul.f32 %v1638_v43, %v5639_v26 }
 0x9fe   : > { %v1640_v46 = vadd.f32 1e-06, %v1639_v45 }
 0xa00   : > { %4831 = vrsqrt.f32 %v1640_v46  ;;  %vm1647_vm15 = vweird.f32 %v1640_v46 }
 0xa06   : > { %v4832_v47 = vpop.eup %4831 }
 0xa07   : > { %v1642_v44 = vmul.f32 %v4832_v47, %v1640_v46  ;;  %vm1648_vm14 = vweird.f32 %v4832_v47 }
 0xa08   : > { %vm1649_vm1 = vmor %vm1647_vm15, %vm1648_vm14 }
 0xa09   : > { %v1643_v24 = vmul.f32 %v4832_v47, %v1642_v44 }
 0xa0b   : > { %v1644_v48 = vmul.f32 0.5, %v1643_v24 }
 0xa0d   : > { %v1645_v49 = vsub.f32 1.5, %v1644_v48 }
 0xa0f   : > { %v1646_v50 = vmul.f32 %v4832_v47, %v1645_v49 }
 0xa11   : > { %v1650_v53 = vsel %vm1649_vm1, %v4832_v47, %v1646_v50 }
 0xa12   : > { %v1651_v54 = vmul.f32 %v1650_v53, %v5738_v35 }
 0xa14   : > { %v1655_v15 = vmul.f32 %v4797_v51, %v1651_v54 }
 0xa16   : > { %v1656_v55 = vpack.c.bf16 %v1655_v15, %v1655_v15 }
 0xa18   : > { %4283 = vmatmul.msk.bf16.vlgmr.msrb.gmra.mxu1 %vm1151_vm2, %v1656_v55 }
 0xa95   : > { %v1686_v56 = vpop.f32.mrf.mxu1 }
 0xa96   : > { %v5749_v57 = vpack.c.bf16 %v1686_v56, %v1686_v56 }
 0xa98   : > { %1863 = vrot.lane.b32.xlu1 %v5749_v57, %s6265_s1  ;;  %1865 = vrot.lane.b32.xlu0 %v5749_v57, %s6263_s2  ;;  %s6329_s2 = smov 16   ;;  %s6330_s1 = smov 24  }
 0xa99   : > { %1697 = vrot.lane.b32.xlu2 %v5749_v57, %s6261_s26  ;;  %s6328_s26 = smov 8  }
 0xa9d   : > { %v1688_v58 = vpop.f32.mrf.mxu1 }
 0xaa1   : > { %1753 = vrot.lane.b32.xlu2 %v5749_v57, %s6259_s30  ;;  %s6327_s30 = sld [smem:[#allocation20_spill]] }
 0xaa7   : > { %s1077_s3 = scalar_lea.vmem %s6327_s30, %s5587_s15  ;;  %s6332_s30 = sld [smem:[#allocation31_spill]] }
 0xaa9   : > { %1809 = vrot.lane.b32.xlu2 %v5749_v57, %s6255_s23  ;;  %s6325_s23 = smov 56  }
 0xab1   : > { %1751 = vrot.lane.b32.xlu2 %v5749_v57, %s6257_s10  ;;  %s6326_s10 = smov 40  }
 0xab9   : > { %1807 = vrot.lane.b32.xlu2 %v5749_v57, %s6253_s18  ;;  %s6324_s18 = smov 48  }
 0xaf3   : > { %v1698_v59 = vpop.permute.xlu2 %1697 }
 0xaf4   : > { %v1703_v60 = vsel %vm1220_vm8, %v1698_v59, 0 }
 0xaf5   : > { %1712 = vmatpush.bf16.xpose.msrb.mxu2 %v1703_v60 }
 0xafb   : > { %v1754_v61 = vpop.permute.xlu2 %1753 }
 0xafc   : > { %v1759_v62 = vsel %vm1220_vm8, %v1754_v61, 0  ;;  %4288 = vmatmul.msk.bf16.vlgmr.msrb.gmra.mxu2 %vm1220_vm8, %v5749_v57 }
 0xafd   : > { %1768 = vmatpush.bf16.xpose.msra.mxu0 %v1759_v62 }
 0xb03   : > { %v1810_v63 = vpop.permute.xlu2 %1809 }
 0xb04   : > { %v1815_v0 = vsel %vm1220_vm8, %v1810_v63, 0 }
 0xb05   : > { %1824 = vmatpush.bf16.xpose.msra.mxu2 %v1815_v0 }
 0xb0a   : > { %v1866_v1 = vpop.permute.xlu0 %1865  ;;  %v1864_v16 = vpop.permute.xlu1 %1863 }
 0xb0b   : > { %v1871_v10 = vsel %vm1220_vm8, %v1866_v1, 0  ;;  %v1752_v12 = vpop.permute.xlu2 %1751 }
 0xb0c   : > { %4290 = vmatmul.msk.bf16.vlgmr.msra.gmra.mxu0 %vm1220_vm8, %v1752_v12 }
 0xb0d   : > { %1880 = vmatpush.bf16.xpose.msrb.mxu0 %v1871_v10 }
 0xb13   : > { %v1808_v14 = vpop.permute.xlu2 %1807 }
 0xb14   : > { %4292 = vmatmul.msk.bf16.vlgmr.msra.gmra.mxu2 %vm1220_vm8, %v1808_v14 }
 0xb1c   : > { %4294 = vmatmul.msk.bf16.vlgmr.msrb.gmra.mxu0 %vm1220_vm8, %v1864_v16 }
 0xb7f   : > { %v1714_v17 = vpop.f32.mrf.mxu2 }
 0xb80   : > { %v1715_v42 = vadd.f32 %v1714_v17, %v5664_v52 }
 0xb82   : > { %v1718_v18 = vsel %vm1220_vm8, %v1715_v42, -inf }
 0xb83   : > { %1719 = vmax.xlane.f32.xlu2 %v1718_v18 }
 0xb87   : > { %v1716_v19 = vpop.f32.mrf.mxu2 }
 0xb89   : > { %v1770_v20 = vpop.f32.mrf.mxu0 }
 0xb8a   : > { %v1771_v22 = vadd.f32 %v1770_v20, %v5689_v30 }
 0xb8c   : > { %v1774_v23 = vsel %vm1220_vm8, %v1771_v22, -inf }
 0xb8d   : > { %1775 = vmax.xlane.f32.xlu0 %v1774_v23 }
 0xb91   : > { %v1772_v25 = vpop.f32.mrf.mxu0 }
 0xb97   : > { %v1826_v27 = vpop.f32.mrf.mxu2 }
 0xb98   : > { %v1827_v28 = vadd.f32 %v1826_v27, %v5682_v21 }
 0xb99   : > { %v1882_v29 = vpop.f32.mrf.mxu0 }
 0xb9a   : > { %v1883_v31 = vadd.f32 %v1882_v29, %v5696_v36  ;;  %v1830_v32 = vsel %vm1220_vm8, %v1827_v28, -inf }
 0xb9b   : > { %1831 = vmax.xlane.f32.xlu1 %v1830_v32 }
 0xb9c   : > { %v1886_v52 = vsel %vm1220_vm8, %v1883_v31, -inf }
 0xb9d   : > { %1887 = vmax.xlane.f32.xlu2 %v1886_v52 }
 0xb9f   : > { %v1828_v33 = vpop.f32.mrf.mxu2 }
 0xba1   : > { %v1884_v34 = vpop.f32.mrf.mxu0  ;;  %1730 = vrot.lane.b32.xlu0 %v5749_v57, %s6323_s22 }
 0xba2   : > { %v2135_v34 = vld [vmem:[%s1077_s3] sm:$0xff]  ;;  %s6331_s3 = sld [smem:[#allocation32_spill]] }
 0xba9   : > { %1842 = vrot.lane.b32.xlu0 %v5749_v57, %s6324_s18 }
 0xbf6   : > { %v1720_v30 = vpop.xlane.xlu2 %1719 }
 0xbf7   : > { %v1721_v38 = vsub.f32 %v1715_v42, %v1720_v30 }
 0xbf9   : > { %v1722_v36 = vmul.f32 1.442695, %v1721_v38 }
 0xc00   : > { %v1776_v37 = vpop.xlane.xlu0 %1775 }
 0xc01   : > { %v1777_v21 = vsub.f32 %v1771_v22, %v1776_v37  ;;  %v4596_v37 = vld [vmem:[%s6299_s14 + $0x18] sm:$0xff] }
 0xc02   : > { %1956 = vmatpush.bf16.msrb.mxu2 %v4596_v37 }
 0xc03   : > { %v1778_v39 = vmul.f32 1.442695, %v1777_v21  ;;  %v4595_v21 = vld [vmem:[%s6299_s14 + $0x10] sm:$0xff]  ;;  %s6340_s14 = sld [smem:[#allocation23_spill]] }
 0xc05   : > { %4833 = vpow2.f32 %v1778_v39 }
 0xc06   : > { %4835 = vpow2.f32 %v1722_v36  ;;  %1957 = vmatpush.bf16.msrb.mxu2 %v4595_v21 }
 0xc0b   : > { %v4834_v40 = vpop.eup %4833 }
 0xc0c   : > { %v1780_v41 = vsel %vm1220_vm8, %v4834_v40, 0.0  ;;  %v4836_v46 = vpop.eup %4835 }
 0xc0d   : > { %1781 = vadd.xlane.f32.xlu2 %v1780_v41  ;;  %v1724_v50 = vsel %vm1220_vm8, %v4836_v46, 0.0 }
 0xc0e   : > { %v1832_v43 = vpop.xlane.xlu1 %1831 }
 0xc0f   : > { %v1833_v44 = vsub.f32 %v1827_v28, %v1832_v43 }
 0xc10   : > { %v1888_v45 = vpop.xlane.xlu2 %1887 }
 0xc11   : > { %v1889_v47 = vsub.f32 %v1883_v31, %v1888_v45  ;;  %v1834_v51 = vmul.f32 1.442695, %v1833_v44 }
 0xc13   : > { %v1890_v24 = vmul.f32 1.442695, %v1889_v47  ;;  %v1731_v48 = vpop.permute.xlu0 %1730 }
 0xc14   : > { %v1736_v49 = vsel %vm1257_vm7, %v1731_v48, 0 }
 0xc15   : > { %4837 = vpow2.f32 %v1890_v24  ;;  %1725 = vadd.xlane.f32.xlu2 %v1724_v50  ;;  %1745 = vmatpush.bf16.msra.mxu3 %v1736_v49  ;;  %v4598_v49 = vld [vmem:[%s5320_s24 + $0x18] sm:$0xff] }
 0xc16   : > { %4839 = vpow2.f32 %v1834_v51  ;;  %v4600_v50 = vld [vmem:[%s6319_s7 + $0x18] sm:$0xff]  ;;  %v4597_v51 = vld [vmem:[%s5320_s24 + $0x10] sm:$0xff] }
 0xc17   : > { %2062 = vmatpush.bf16.msra.mxu0 %v4600_v50 }
 0xc1b   : > { %v4838_v53 = vpop.eup %4837  ;;  %v1843_v54 = vpop.permute.xlu0 %1842 }
 0xc1c   : > { %v1848_v15 = vsel %vm1257_vm7, %v1843_v54, 0  ;;  %v1892_v55 = vsel %vm1220_vm8, %v4838_v53, 0.0  ;;  %v4840_v56 = vpop.eup %4839 }
 0xc1d   : > { %1893 = vadd.xlane.f32.xlu1 %v1892_v55  ;;  %1857 = vmatpush.bf16.msrb.mxu3 %v1848_v15  ;;  %v1836_v58 = vsel %vm1220_vm8, %v4840_v56, 0.0 }
 0xc25   : > { %1837 = vadd.xlane.f32.xlu1 %v1836_v58 }
 0xc2d   : > { %1786 = vrot.lane.b32.xlu2 %v5749_v57, %s6325_s23 }
 0xc3e   : > { %1898 = vrot.lane.b32.xlu1 %v5749_v57, %s6326_s10 }
 0xc80   : > { %v1782_v59 = vpop.xlane.xlu2 %1781 }
 0xc81   : > { %4841 = vrcp.f32 %v1782_v59 }
 0xc87   : > { %v4842_v61 = vpop.eup %4841 }
 0xc88   : > { %v1726_v60 = vpop.xlane.xlu2 %1725  ;;  %v1784_v63 = vmul.f32 %v4842_v61, %v4834_v40  ;;  %v4604_v61 = vld [vmem:[%s6322_s11 + $0x38] sm:$0xff] }
 0xc89   : > { %4843 = vrcp.f32 %v1726_v60 }
 0xc8a   : > { %v1785_v16 = vpack.c.bf16 %v1784_v63, %v1784_v63  ;;  %v4602_v63 = vld [vmem:[%s6322_s11 + $0x28] sm:$0xff] }
 0xc8f   : > { %v4844_v62 = vpop.eup %4843 }
 0xc90   : > { %v1728_v0 = vmul.f32 %v4844_v62, %v4836_v46  ;;  %v1894_v1 = vpop.xlane.xlu1 %1893  ;;  %v1787_v10 = vpop.permute.xlu2 %1786  ;;  %v4603_v62 = vld [vmem:[%s6322_s11 + $0x30] sm:$0xff] }
 0xc91   : > { %v1792_v12 = vsel %vm1257_vm7, %v1787_v10, 0 }
 0xc92   : > { %v1729_v14 = vpack.c.bf16 %v1728_v0, %v1728_v0  ;;  %1801 = vmatpush.bf16.msra.mxu1 %v1792_v12  ;;  %v4601_v0 = vld [vmem:[%s6322_s11 + $0x20] sm:$0xff]  ;;  %s6338_s11 = smov 80  }
 0xc94   : > { %4289 = vmatmul.msk.bf16.vlgmr.msra.gmra.mxu3 %vm1220_vm8, %v1729_v14 }
 0xc95   : > { %4291 = vmatmul.msk.bf16.vlgmr.msra.gmra.mxu1 %vm1220_vm8, %v1785_v16  ;;  %2028 = vmatpush.bf16.msra.mxu3 %v4598_v49 }
 0xc98   : > { %v1838_v57 = vpop.xlane.xlu1 %1837 }
 0xc99   : > { %4845 = vrcp.f32 %v1838_v57  ;;  %2029 = vmatpush.bf16.msra.mxu3 %v4597_v51 }
 0xc9a   : > { %4847 = vrcp.f32 %v1894_v1 }
 0xc9f   : > { %v4846_v17 = vpop.eup %4845 }
 0xca0   : > { %v1840_v42 = vmul.f32 %v4846_v17, %v4840_v56  ;;  %v4848_v19 = vpop.eup %4847 }
 0xca1   : > { %v1896_v20 = vmul.f32 %v4848_v19, %v4838_v53  ;;  %v4599_v53 = vld [vmem:[%s6319_s7 + $0x10] sm:$0xff]  ;;  %s6335_s7 = smov 96  }
 0xca2   : > { %v1841_v18 = vpack.c.bf16 %v1840_v42, %v1840_v42  ;;  %2063 = vmatpush.bf16.msra.mxu0 %v4599_v53 }
 0xca3   : > { %v1897_v25 = vpack.c.bf16 %v1896_v20, %v1896_v20 }
 0xca4   : > { %4293 = vmatmul.msk.bf16.vlgmr.msrb.gmra.mxu3 %vm1220_vm8, %v1841_v18 }
 0xca5   : > { %2153 = vmatpush.msrb.mxu3 %v5596_v2 }
 0xca7   : > { %2154 = vmatpush.msrb.mxu3 %v5599_v3 }
 0xca9   : > { %2155 = vmatpush.msrb.mxu3 %v5603_v4 }
 0xcab   : > { %2156 = vmatpush.msrb.mxu3 %v5606_v5  ;;  %v4798_v5 = vld [vmem:[%s6321_s12 + $0x1] ss:$0 sm:$0xff]  ;;  %s6339_s12 = smov 112  }
 0xcad   : > { %2157 = vmatpush.msrb.mxu3 %v5611_v6 }
 0xcaf   : > { %2158 = vmatpush.msrb.mxu3 %v5615_v7 }
 0xcb0   : > { %v1899_v22 = vpop.permute.xlu1 %1898 }
 0xcb1   : > { %v1904_v23 = vsel %vm1257_vm7, %v1899_v22, 0  ;;  %2159 = vmatpush.msrb.mxu3 %v5620_v8 }
 0xcb2   : > { %1913 = vmatpush.bf16.msrb.mxu1 %v1904_v23 }
 0xcb3   : > { %2160 = vmatpush.msrb.mxu3 %v5624_v9 }
 0xcb5   : > { %4295 = vmatmul.msk.bf16.vlgmr.msrb.gmra.mxu1 %vm1220_vm8, %v1897_v25 }
 0xcb6   : > { %2102 = vmatpush.bf16.msra.mxu1 %v4604_v61 }
 0xcba   : > { %2103 = vmatpush.bf16.msra.mxu1 %v4603_v62 }
 0xcbe   : > { %2104 = vmatpush.bf16.msra.mxu1 %v4602_v63 }
 0xcc2   : > { %2105 = vmatpush.bf16.msra.mxu1 %v4601_v0 }
 0xd12   : > { %v1803_v27 = vpop.f32.mrf.mxu1 }
 0xd13   : > { %1920 = vrot.lane.b32.xlu0 %v1803_v27, %s6328_s26 }
 0xd17   : > { %v1747_v28 = vpop.f32.mrf.mxu3 }
 0xd1a   : > { %v1805_v29 = vpop.f32.mrf.mxu1 }
 0xd1f   : > { %v1749_v31 = vpop.f32.mrf.mxu3 }
 0xd27   : > { %v1859_v32 = vpop.f32.mrf.mxu3 }
 0xd28   : > { %1924 = vrot.lane.b32.xlu2 %v1859_v32, %s6329_s2  ;;  %v4606_v32 = vld [vmem:[%s6331_s3 + $0x8] sm:$0xff] }
 0xd29   : > { %2213 = vmatpush.bf16.msra.mxu2 %v4606_v32 }
 0xd2f   : > { %v1861_v52 = vpop.f32.mrf.mxu3 }
 0xd30   : > { %v4605_v52 = vld [vmem:[%s6331_s3] sm:$0xff] }
 0xd31   : > { %2214 = vmatpush.bf16.msra.mxu2 %v4605_v52 }
 0xd32   : > { %v1915_v33 = vpop.f32.mrf.mxu1 }
 0xd33   : > { %1928 = vrot.lane.b32.xlu0 %v1915_v33, %s6330_s1 }
 0xd3a   : > { %v1917_v30 = vpop.f32.mrf.mxu1 }
 0xd3b   : > { %2137 = vperm.xlu0 %4792, %v2135_v34  }
 0xd82   : > { %v1925_v36 = vpop.permute.xlu2 %1924 }
 0xd85   : > { %v1921_v38 = vpop.permute.xlu0 %1920 }
 0xd86   : > { %v1931_v39 = vsel %vm1220_vm8, %v1747_v28, %v1921_v38 }
 0xd87   : > { %v1932_v40 = vsel %vm1455_vm9, %v1931_v39, %v1925_v36 }
 0xda5   : > { %v1929_v41 = vpop.permute.xlu0 %1928 }
 0xda6   : > { %v1933_v43 = vsel %vm1457_vm10, %v1932_v40, %v1929_v41 }
 0xda7   : > { %v1934_v45 = vpack.c.bf16 %v1933_v43, %v1933_v43  ;;  %v4799_v43 = vld [vmem:[%s6332_s30] ss:$0 sm:$0xff] }
 0xda9   : > { %4304 = vmatmul.msk.bf16.vlgmr.msrb.gmra.mxu2 %vm1151_vm2, %v1934_v45 }
 0xdad   : > { %v2138_v9 = vpop.permute.xlu0 %2137 }
 0xdae   : > { %vm2139_vm6 = vcmp.eq.s32.totalorder %v5627_v11, %v2138_v9 }
 0xdaf   : > { %v4357_v60 = vsel %vm2139_vm6, 1.0, %v5241_v13 }
 0xe2c   : > { %v1959_v46 = vpop.f32.mrf.mxu2 }
 0xe2d   : > { %v5814_v47 = vadd.f32 %v1959_v46, %v5738_v35 }
 0xe2f   : > { %v1985_v44 = vmul.f32 %v5814_v47, %v5814_v47 }
 0xe31   : > { %v1986_v24 = vsel %vm1151_vm2, %v1985_v44, 0.0 }
 0xe32   : > { %1987 = vadd.xlane.f32.xlu2 %v1986_v24 }
 0xe34   : > { %v1961_v48 = vpop.f32.mrf.mxu2 }
 0xea5   : > { %v1988_v35 = vpop.xlane.xlu2 %1987 }
 0xea6   : > { %v1989_v54 = vmul.f32 %v1988_v35, %v5639_v26 }
 0xea8   : > { %v1990_v15 = vadd.f32 1e-06, %v1989_v54 }
 0xeaa   : > { %4849 = vrsqrt.f32 %v1990_v15  ;;  %vm1997_vm4 = vweird.f32 %v1990_v15 }
 0xeb0   : > { %v4850_v2 = vpop.eup %4849 }
 0xeb1   : > { %v1992_v3 = vmul.f32 %v4850_v2, %v1990_v15  ;;  %vm1998_vm3 = vweird.f32 %v4850_v2 }
 0xeb2   : > { %vm1999_vm5 = vmor %vm1997_vm4, %vm1998_vm3 }
 0xeb3   : > { %v1993_v55 = vmul.f32 %v4850_v2, %v1992_v3 }
 0xeb5   : > { %v1994_v4 = vmul.f32 0.5, %v1993_v55 }
 0xeb7   : > { %v1995_v56 = vsub.f32 1.5, %v1994_v4 }
 0xeb9   : > { %v1996_v58 = vmul.f32 %v4850_v2, %v1995_v56 }
 0xebb   : > { %v2000_v6 = vsel %vm1999_vm5, %v4850_v2, %v1996_v58 }
 0xebc   : > { %v2001_v7 = vmul.f32 %v2000_v6, %v5814_v47  ;;  %v5883_v6 = vld [vmem:[%s6340_s14] sm:$0xff] }
 0xebe   : > { %v2005_v8 = vmul.f32 %v4798_v5, %v2001_v7 }
 0xec0   : > { %v2006_v59 = vpack.c.bf16 %v2005_v8, %v2005_v8  ;;  %v5886_v8 = vld [vmem:[%s6340_s14 + $0x8] sm:$0xff] }
 0xec2   : > { %4330 = vmatmul.msk.bf16.vlgmr.msra.gmra.mxu3 %vm1151_vm2, %v2006_v59  ;;  %4339 = vmatmul.msk.bf16.vlgmr.msra.gmra.mxu0 %vm1151_vm2, %v2006_v59 }
 0xed2   : > { %4358 = vmatmul.msk.f32.vlgmr.msrb.gmra.mxu3 %vm1125_vm0, %v4357_v60 }
 0xf3f   : > { %v2065_v1 = vpop.f32.mrf.mxu0 }
 0xf45   : > { %v2031_v10 = vpop.f32.mrf.mxu3 }
 0xf46   : > { %v2035_v12 = vmul.f32 %v2031_v10, %v2031_v10 }
 0xf47   : > { %v2067_v14 = vpop.f32.mrf.mxu0 }
 0xf48   : > { %v2036_v16 = vmul.f32 %v2035_v12, %v2031_v10 }
 0xf4a   : > { %v2037_v57 = vmul.f32 0.044715, %v2036_v16  ;;  %v5898_v16 = vld [vmem:[%s6340_s14 + $0x10] sm:$0xff] }
 0xf4c   : > { %v2038_v17 = vadd.f32 %v2037_v57, %v2031_v10 }
 0xf4d   : > { %v2033_v42 = vpop.f32.mrf.mxu3 }
 0xf4e   : > { %v2039_v18 = vmul.f32 0.7978846, %v2038_v17 }
 0xf50   : > { %4851 = vtanh.f32 %v2039_v18 }
 0xf55   : > { %v5843_v19 = vpop.f32.mrf.mxu3 }
 0xf56   : > { %v4852_v20 = vpop.eup %4851  ;;  %v2166_v22 = vmul.f32 %v5843_v19, %v5843_v19 }
 0xf57   : > { %v2041_v23 = vadd.f32 1.0, %v4852_v20 }
 0xf58   : > { %v2167_v25 = vsel %vm1151_vm2, %v2166_v22, 0.0 }
 0xf59   : > { %v2042_v27 = vmul.f32 0.5, %v2041_v23  ;;  %2168 = vadd.xlane.f32.xlu1 %v2167_v25 }
 0xf5b   : > { %v2043_v28 = vmul.f32 %v2042_v27, %v2031_v10 }
 0xf5d   : > { %v2069_v29 = vmul.f32 %v2065_v1, %v2043_v28  ;;  %v5893_v1 = vld [vmem:[%s6340_s14 + $0x18] sm:$0xff]  ;;  %s6341_s14 = sld [smem:[#allocation30_spill]] }
 0xf5f   : > { %v2070_v31 = vpack.c.bf16 %v2069_v29, %v2069_v29 }
 0xf61   : > { %4356 = vmatmul.msk.bf16.vlgmr.msra.gmra.mxu1 %vm1125_vm0, %v2070_v31 }
 0xfcc   : > { %v2169_v33 = vpop.xlane.xlu1 %2168 }
 0xfcd   : > { %v2170_v34 = vmul.f32 %v2169_v33, %v5639_v26 }
 0xfcf   : > { %v2171_v30 = vadd.f32 1e-06, %v2170_v34 }
 0xfd1   : > { %4853 = vrsqrt.f32 %v2171_v30  ;;  %vm2178_vm12 = vweird.f32 %v2171_v30 }
 0xfd7   : > { %v4854_v37 = vpop.eup %4853 }
 0xfd8   : > { %v2173_v21 = vmul.f32 %v4854_v37, %v2171_v30  ;;  %vm2179_vm11 = vweird.f32 %v4854_v37 }
 0xfd9   : > { %vm2180_vm13 = vmor %vm2178_vm12, %vm2179_vm11 }
 0xfda   : > { %v2174_v38 = vmul.f32 %v4854_v37, %v2173_v21 }
 0xfdc   : > { %v2175_v39 = vmul.f32 0.5, %v2174_v38 }
 0xfde   : > { %v2176_v36 = vsub.f32 1.5, %v2175_v39  ;;  %v5852_v40 = vpop.f32.mrf.mxu1 }
 0xfe0   : > { %v2177_v41 = vmul.f32 %v4854_v37, %v2176_v36 }
 0xfe2   : > { %v2181_v45 = vsel %vm2180_vm13, %v4854_v37, %v2177_v41 }
 0xfe3   : > { %v2182_v46 = vmul.f32 %v2181_v45, %v5843_v19 }
 0xfe5   : > { %v2186_v44 = vmul.f32 %v4799_v43, %v2182_v46 }
 0xfe6   : > { %v2109_v24 = vpop.f32.mrf.mxu1 }
 0xfe7   : > { %v2187_v48 = vpack.c.bf16 %v2186_v44, %v2186_v44 }
 0xfe9   : > { %4367 = vmatmul.msk.bf16.vlgmr.msra.gmra.mxu2 %vm1151_vm2, %v2187_v48 }
0x106c   : > { %v2216_v49 = vpop.f32.mrf.mxu2 }
0x106d   : > { %v5857_v50 = vpack.c.bf16 %v2216_v49, %v2216_v49 }
0x106f   : > { %2392 = vrot.lane.b32.xlu1 %v5857_v50, %s6333_s4  ;;  %2394 = vrot.lane.b32.xlu2 %v5857_v50, %s6334_s5 }
0x1070   : > { %2226 = vrot.lane.b32.xlu0 %v5857_v50, %s6335_s7 }
0x1074   : > { %v2218_v51 = vpop.f32.mrf.mxu2 }
0x1078   : > { %2282 = vrot.lane.b32.xlu0 %v5857_v50, %s6336_s8 }
0x1080   : > { %2280 = vrot.lane.b32.xlu0 %v5857_v50, %s6337_s9 }
0x1088   : > { %2338 = vrot.lane.b32.xlu0 %v5857_v50, %s6338_s11 }
0x1090   : > { %2336 = vrot.lane.b32.xlu0 %v5857_v50, %s6339_s12 }
0x10c9   : > { %v2395_v54 = vpop.permute.xlu2 %2394 }
0x10ca   : > { %v2400_v3 = vsel %vm1220_vm8, %v2395_v54, 0 }
0x10e1   : > { %v2393_v58 = vpop.permute.xlu1 %2392 }
0x10e2   : > { %v2227_v53 = vpop.permute.xlu0 %2226 }
0x10e3   : > { %v2232_v35 = vsel %vm1220_vm8, %v2227_v53, 0 }
0x10e4   : > { %2241 = vmatpush.bf16.xpose.msra.mxu3 %v2232_v35 }
0x10ea   : > { %v2283_v15 = vpop.permute.xlu0 %2282 }
0x10eb   : > { %v2288_v2 = vsel %vm1220_vm8, %v2283_v15, 0  ;;  %4368 = vmatmul.msk.bf16.vlgmr.msra.gmra.mxu3 %vm1220_vm8, %v5857_v50 }
0x10ec   : > { %2297 = vmatpush.bf16.xpose.msrb.mxu1 %v2288_v2 }
0x10f2   : > { %v2281_v55 = vpop.permute.xlu0 %2280 }
0x10f3   : > { %4370 = vmatmul.msk.bf16.vlgmr.msrb.gmra.mxu1 %vm1220_vm8, %v2281_v55 }
0x10f4   : > { %2409 = vmatpush.bf16.xpose.msra.mxu1 %v2400_v3 }
0x10fa   : > { %v2339_v4 = vpop.permute.xlu0 %2338 }
0x10fb   : > { %v2344_v56 = vsel %vm1220_vm8, %v2339_v4, 0 }
0x10fc   : > { %2353 = vmatpush.bf16.xpose.msrb.mxu3 %v2344_v56 }
0x1102   : > { %v2337_v5 = vpop.permute.xlu0 %2336 }
0x1103   : > { %4372 = vmatmul.msk.bf16.vlgmr.msrb.gmra.mxu3 %vm1220_vm8, %v2337_v5  ;;  %4374 = vmatmul.msk.bf16.vlgmr.msra.gmra.mxu1 %vm1220_vm8, %v2393_v58 }
0x116e   : > { %v2243_v7 = vpop.f32.mrf.mxu3 }
0x116f   : > { %v2244_v59 = vadd.f32 %v2243_v7, %v5883_v6 }
0x1170   : > { %v2299_v9 = vpop.f32.mrf.mxu1 }
0x1171   : > { %v2300_v60 = vadd.f32 %v2299_v9, %v5886_v8  ;;  %v2247_v61 = vsel %vm1220_vm8, %v2244_v59, -inf }
0x1172   : > { %2248 = vmax.xlane.f32.xlu2 %v2247_v61 }
0x1173   : > { %v2303_v62 = vsel %vm1220_vm8, %v2300_v60, -inf }
0x1174   : > { %2304 = vmax.xlane.f32.xlu0 %v2303_v62 }
0x1176   : > { %v2245_v63 = vpop.f32.mrf.mxu3 }
0x1178   : > { %v2301_v0 = vpop.f32.mrf.mxu1 }
0x1180   : > { %v2411_v10 = vpop.f32.mrf.mxu1 }
0x1181   : > { %v2412_v12 = vadd.f32 %v2411_v10, %v5893_v1 }
0x1183   : > { %v2415_v14 = vsel %vm1220_vm8, %v2412_v12, -inf }
0x1184   : > { %2416 = vmax.xlane.f32.xlu1 %v2415_v14 }
0x1186   : > { %v2355_v57 = vpop.f32.mrf.mxu3 }
0x1187   : > { %v2356_v17 = vadd.f32 %v2355_v57, %v5898_v16 }
0x1188   : > { %v2413_v42 = vpop.f32.mrf.mxu1 }
0x1189   : > { %v2359_v18 = vsel %vm1220_vm8, %v2356_v17, -inf }
0x118a   : > { %2360 = vmax.xlane.f32.xlu0 %v2359_v18  ;;  %v2111_v18 = vadd.f32 %v5852_v40, %v5814_v47  ;;  %v4612_v47 = vld [vmem:[#allocation7 + $0x8] sm:$0xff]  ;;  %v4611_v40 = vld [vmem:[#allocation7] sm:$0xff] }
0x118b   : > { %2573 = vmatpush.bf16.msrb.mxu1 %v4612_v47 }
0x118e   : > { %v2357_v20 = vpop.f32.mrf.mxu3 }
0x118f   : > { %v2113_v20 = vmul.f32 %v2111_v18, %v2111_v18  ;;  %2574 = vmatpush.bf16.msrb.mxu1 %v4611_v40 }
0x119e   : > { %2315 = vrot.lane.b32.xlu0 %v5857_v50, %s6325_s23 }
0x11e5   : > { %v2249_v22 = vpop.xlane.xlu2 %2248 }
0x11e6   : > { %v2250_v23 = vsub.f32 %v2244_v59, %v2249_v22  ;;  %v4608_v22 = vld [vmem:[#allocation2 + $0x8] sm:$0xff] }
0x11e7   : > { %v2305_v25 = vpop.xlane.xlu0 %2304  ;;  %2485 = vmatpush.bf16.msra.mxu3 %v4608_v22 }
0x11e8   : > { %v2251_v27 = vmul.f32 1.442695, %v2250_v23  ;;  %v2306_v28 = vsub.f32 %v2300_v60, %v2305_v25  ;;  %v2114_v23 = vsel %vm1151_vm2, %v2113_v20, 0.0  ;;  %v4607_v25 = vld [vmem:[#allocation2] sm:$0xff] }
0x11ea   : > { %4855 = vpow2.f32 %v2251_v27  ;;  %v2307_v29 = vmul.f32 1.442695, %v2306_v28 }
0x11eb   : > { %2486 = vmatpush.bf16.msra.mxu3 %v4607_v25 }
0x11ec   : > { %4857 = vpow2.f32 %v2307_v29 }
0x11f0   : > { %v4856_v31 = vpop.eup %4855 }
0x11f1   : > { %v2253_v32 = vsel %vm1220_vm8, %v4856_v31, 0.0 }
0x11f2   : > { %v4858_v52 = vpop.eup %4857  ;;  %2254 = vadd.xlane.f32.xlu2 %v2253_v32 }
0x11f3   : > { %v2309_v33 = vsel %vm1220_vm8, %v4858_v52, 0.0 }
0x11f4   : > { %2310 = vadd.xlane.f32.xlu0 %v2309_v33 }
0x11f7   : > { %v2417_v34 = vpop.xlane.xlu1 %2416 }
0x11f8   : > { %v2418_v30 = vsub.f32 %v2412_v12, %v2417_v34 }
0x11fa   : > { %v2419_v37 = vmul.f32 1.442695, %v2418_v30 }
0x11fc   : > { %4859 = vpow2.f32 %v2419_v37 }
0x11fd   : > { %v2361_v21 = vpop.xlane.xlu0 %2360 }
0x11fe   : > { %v2362_v38 = vsub.f32 %v2356_v17, %v2361_v21 }
0x1200   : > { %v2363_v39 = vmul.f32 1.442695, %v2362_v38 }
0x1202   : > { %v4860_v36 = vpop.eup %4859  ;;  %4861 = vpow2.f32 %v2363_v39 }
0x1203   : > { %v2421_v41 = vsel %vm1220_vm8, %v4860_v36, 0.0 }
0x1204   : > { %2422 = vadd.xlane.f32.xlu1 %v2421_v41 }
0x1208   : > { %v4862_v43 = vpop.eup %4861  ;;  %2427 = vrot.lane.b32.xlu0 %v5857_v50, %s6326_s10 }
0x1209   : > { %v2365_v45 = vsel %vm1220_vm8, %v4862_v43, 0.0 }
0x120a   : > { %2259 = vrot.lane.b32.xlu2 %v5857_v50, %s6323_s22 }
0x120c   : > { %2366 = vadd.xlane.f32.xlu1 %v2365_v45  ;;  %v4800_v45 = vld [vmem:[%s6341_s14] ss:$0 sm:$0xff]  ;;  %s6342_s14 = sld [smem:[#allocation34_spill]] }
0x1210   : > { %v2316_v46 = vpop.permute.xlu0 %2315 }
0x1211   : > { %v2321_v44 = vsel %vm1257_vm7, %v2316_v46, 0 }
0x1212   : > { %2330 = vmatpush.bf16.msrb.mxu2 %v2321_v44 }
0x1225   : > { %2371 = vrot.lane.b32.xlu1 %v5857_v50, %s6324_s18 }
0x1265   : > { %v2255_v24 = vpop.xlane.xlu2 %2254 }
0x1266   : > { %4863 = vrcp.f32 %v2255_v24 }
0x1267   : > { %v2311_v48 = vpop.xlane.xlu0 %2310 }
0x1268   : > { %4865 = vrcp.f32 %v2311_v48 }
0x126c   : > { %v4864_v49 = vpop.eup %4863 }
0x126d   : > { %v2257_v51 = vmul.f32 %v4864_v49, %v4856_v31  ;;  %v2260_v53 = vpop.permute.xlu2 %2259 }
0x126e   : > { %v4866_v35 = vpop.eup %4865  ;;  %v2265_v54 = vsel %vm1257_vm7, %v2260_v53, 0 }
0x126f   : > { %v2258_v15 = vpack.c.bf16 %v2257_v51, %v2257_v51  ;;  %v2313_v2 = vmul.f32 %v4866_v35, %v4858_v52  ;;  %2274 = vmatpush.bf16.msrb.mxu0 %v2265_v54 }
0x1271   : > { %v2314_v3 = vpack.c.bf16 %v2313_v2, %v2313_v2 }
0x1272   : > { %4369 = vmatmul.msk.bf16.vlgmr.msrb.gmra.mxu0 %vm1220_vm8, %v2258_v15 }
0x1273   : > { %4371 = vmatmul.msk.bf16.vlgmr.msrb.gmra.mxu2 %vm1220_vm8, %v2314_v3 }
0x1277   : > { %v2423_v55 = vpop.xlane.xlu1 %2422 }
0x1278   : > { %4867 = vrcp.f32 %v2423_v55  ;;  %v4610_v55 = vld [vmem:[#allocation5 + $0x8] sm:$0xff] }
0x127a   : > { %v2428_v50 = vpop.permute.xlu0 %2427 }
0x127b   : > { %v2433_v4 = vsel %vm1257_vm7, %v2428_v50, 0  ;;  %v4609_v50 = vld [vmem:[#allocation5] sm:$0xff] }
0x127c   : > { %2442 = vmatpush.bf16.msra.mxu2 %v2433_v4 }
0x127e   : > { %v4868_v56 = vpop.eup %4867 }
0x127f   : > { %v2425_v58 = vmul.f32 %v4868_v56, %v4860_v36  ;;  %v2367_v7 = vpop.xlane.xlu1 %2366 }
0x1280   : > { %4869 = vrcp.f32 %v2367_v7 }
0x1281   : > { %v2426_v5 = vpack.c.bf16 %v2425_v58, %v2425_v58 }
0x1283   : > { %4375 = vmatmul.msk.bf16.vlgmr.msra.gmra.mxu2 %vm1220_vm8, %v2426_v5 }
0x1286   : > { %v4870_v59 = vpop.eup %4869 }
0x1287   : > { %v2369_v9 = vmul.f32 %v4870_v59, %v4862_v43 }
0x1289   : > { %v2370_v62 = vpack.c.bf16 %v2369_v9, %v2369_v9 }
0x1297   : > { %v2372_v60 = vpop.permute.xlu1 %2371 }
0x1298   : > { %v2377_v61 = vsel %vm1257_vm7, %v2372_v60, 0 }
0x1299   : > { %2386 = vmatpush.bf16.msra.mxu0 %v2377_v61 }
0x129c   : > { %4373 = vmatmul.msk.bf16.vlgmr.msra.gmra.mxu0 %vm1220_vm8, %v2370_v62  ;;  %v4801_v62 = vld [vmem:[%s6342_s14] ss:$0 sm:$0xff] }
0x129d   : > { %2541 = vmatpush.bf16.msrb.mxu0 %v4610_v55 }
0x12a1   : > { %2542 = vmatpush.bf16.msrb.mxu0 %v4609_v50 }
0x12ef   : > { %v2276_v63 = vpop.f32.mrf.mxu0 }
0x12f6   : > { %v2332_v0 = vpop.f32.mrf.mxu2 }
0x12f7   : > { %v2278_v10 = vpop.f32.mrf.mxu0  ;;  %2449 = vrot.lane.b32.xlu2 %v2332_v0, %s6328_s26 }
0x12fe   : > { %v2334_v12 = vpop.f32.mrf.mxu2 }
0x1306   : > { %v2444_v14 = vpop.f32.mrf.mxu2 }
0x1307   : > { %2457 = vrot.lane.b32.xlu2 %v2444_v14, %s6330_s1 }
0x130e   : > { %v2446_v57 = vpop.f32.mrf.mxu2 }
0x1319   : > { %v2388_v17 = vpop.f32.mrf.mxu0 }
0x131a   : > { %2453 = vrot.lane.b32.xlu0 %v2388_v17, %s6329_s2 }
0x1321   : > { %v2390_v42 = vpop.f32.mrf.mxu0 }
0x1344   : > { %2115 = vadd.xlane.f32.xlu0 %v2114_v23 }
0x1351   : > { %v2450_v27 = vpop.permute.xlu2 %2449 }
0x1352   : > { %v2460_v28 = vsel %vm1220_vm8, %v2276_v63, %v2450_v27 }
0x1361   : > { %v2458_v31 = vpop.permute.xlu2 %2457 }
0x138c   : > { %v2454_v29 = vpop.permute.xlu0 %2453 }
0x138d   : > { %v2461_v32 = vsel %vm1455_vm9, %v2460_v28, %v2454_v29 }
0x138e   : > { %v2462_v52 = vsel %vm1457_vm10, %v2461_v32, %v2458_v31  ;;  %v5969_v32 = vld [vmem:[%s5593_s28] ss:$0 sm:$0xff]  ;;  %s6343_s28 = sld [smem:[#allocation36_spill]] }
0x138f   : > { %v2463_v33 = vpack.c.bf16 %v2462_v52, %v2462_v52 }
0x1391   : > { %4384 = vmatmul.msk.bf16.vlgmr.msra.gmra.mxu3 %vm1151_vm2, %v2463_v33 }
0x13b7   : > { %v2116_v34 = vpop.xlane.xlu0 %2115 }
0x13b8   : > { %v2117_v30 = vmul.f32 %v2116_v34, %v5639_v26 }
0x13ba   : > { %v2118_v37 = vadd.f32 1e-06, %v2117_v30 }
0x13bc   : > { %4871 = vrsqrt.f32 %v2118_v37  ;;  %vm2125_vm15 = vweird.f32 %v2118_v37 }
0x13c2   : > { %v4872_v21 = vpop.eup %4871 }
0x13c3   : > { %v2120_v38 = vmul.f32 %v4872_v21, %v2118_v37  ;;  %vm2126_vm14 = vweird.f32 %v4872_v21 }
0x13c4   : > { %vm2127_vm1 = vmor %vm2125_vm15, %vm2126_vm14 }
0x13c5   : > { %v2121_v39 = vmul.f32 %v4872_v21, %v2120_v38 }
0x13c7   : > { %v2122_v36 = vmul.f32 0.5, %v2121_v39 }
0x13c9   : > { %v2123_v41 = vsub.f32 1.5, %v2122_v36 }
0x13cb   : > { %v2124_v43 = vmul.f32 %v4872_v21, %v2123_v41 }
0x13cd   : > { %v2128_v46 = vsel %vm2127_vm1, %v4872_v21, %v2124_v43 }
0x13ce   : > { %v2129_v44 = vmul.f32 %v2128_v46, %v2111_v18 }
0x13d0   : > { %v2133_v24 = vmul.f32 %v4800_v45, %v2129_v44 }
0x13d2   : > { %v5934_v48 = vpack.c.bf16 %v2133_v24, %v2133_v24 }
0x13d4   : > { %4402 = vmatmul.msk.bf16.vlgmr.msrb.gmra.mxu1 %vm1151_vm2, %v5934_v48 }
0x1414   : > { %v2488_v49 = vpop.f32.mrf.mxu3 }
0x1415   : > { %v5939_v51 = vadd.f32 %v2488_v49, %v5843_v19 }
0x1417   : > { %v2494_v53 = vmul.f32 %v5939_v51, %v5939_v51 }
0x1419   : > { %v2495_v35 = vsel %vm1151_vm2, %v2494_v53, 0.0 }
0x141a   : > { %2496 = vadd.xlane.f32.xlu2 %v2495_v35 }
0x141c   : > { %v2490_v54 = vpop.f32.mrf.mxu3 }
0x1451   : > { %v2576_v15 = vpop.f32.mrf.mxu1 }
0x1452   : > { %v5944_v2 = vpack.c.bf16 %v2576_v15, %v2576_v15 }
0x1454   : > { %2754 = vrot.lane.b32.xlu0 %v5944_v2, %s6333_s4  ;;  %2642 = vrot.lane.b32.xlu1 %v5944_v2, %s6337_s9  ;;  %v2590_v19 = vsel %vm1220_vm8, %v5944_v2, 0 }
0x1455   : > { %2599 = vmatpush.bf16.xpose.msrb.mxu2 %v2590_v19 }
0x1459   : > { %v2578_v3 = vpop.f32.mrf.mxu1 }
0x145c   : > { %2698 = vrot.lane.b32.xlu1 %v5944_v2, %s6339_s12 }
0x148d   : > { %v2497_v4 = vpop.xlane.xlu2 %2496 }
0x148e   : > { %v2498_v56 = vmul.f32 %v2497_v4, %v5639_v26 }
0x1490   : > { %v2499_v58 = vadd.f32 1e-06, %v2498_v56 }
0x1492   : > { %4873 = vrsqrt.f32 %v2499_v58  ;;  %vm2506_vm4 = vweird.f32 %v2499_v58 }
0x1498   : > { %v4874_v5 = vpop.eup %4873 }
0x1499   : > { %v2501_v7 = vmul.f32 %v4874_v5, %v2499_v58  ;;  %vm2507_vm3 = vweird.f32 %v4874_v5 }
0x149a   : > { %vm2508_vm5 = vmor %vm2506_vm4, %vm2507_vm3 }
0x149b   : > { %v2502_v59 = vmul.f32 %v4874_v5, %v2501_v7 }
0x149d   : > { %v2503_v9 = vmul.f32 0.5, %v2502_v59 }
0x149f   : > { %v2504_v60 = vsub.f32 1.5, %v2503_v9 }
0x14a1   : > { %v2505_v61 = vmul.f32 %v4874_v5, %v2504_v60 }
0x14a3   : > { %v2509_v63 = vsel %vm2508_vm5, %v4874_v5, %v2505_v61 }
0x14a4   : > { %v2510_v0 = vmul.f32 %v2509_v63, %v5939_v51 }
0x14a6   : > { %v2514_v10 = vmul.f32 %v4801_v62, %v2510_v0 }
0x14a8   : > { %v2515_v12 = vpack.c.bf16 %v2514_v10, %v2514_v10 }
0x14aa   : > { %4393 = vmatmul.msk.bf16.vlgmr.msrb.gmra.mxu0 %vm1151_vm2, %v2515_v12 }
0x14c6   : > { %v2755_v14 = vpop.permute.xlu0 %2754  ;;  %v2643_v57 = vpop.permute.xlu1 %2642 }
0x14c7   : > { %v2760_v17 = vsel %vm1220_vm8, %v2755_v14, 0  ;;  %v2648_v42 = vsel %vm1220_vm8, %v2643_v57, 0 }
0x14c8   : > { %2657 = vmatpush.bf16.xpose.msra.mxu0 %v2648_v42 }
0x14ce   : > { %v2699_v18 = vpop.permute.xlu1 %2698 }
0x14cf   : > { %v2704_v20 = vsel %vm1220_vm8, %v2699_v18, 0 }
0x14d0   : > { %2769 = vmatpush.bf16.xpose.msrb.mxu0 %v2760_v17  ;;  %2713 = vmatpush.bf16.xpose.msra.mxu2 %v2704_v20 }
0x1527   : > { %v2544_v22 = vpop.f32.mrf.mxu0 }
0x1528   : > { %v2584_v23 = vpack.c.bf16 %v2544_v22, %v2544_v22 }
0x152a   : > { %2640 = vrot.lane.b32.xlu1 %v2584_v23, %s6337_s9  ;;  %4403 = vmatmul.msk.bf16.vlgmr.msrb.gmra.mxu2 %vm1220_vm8, %v2584_v23 }
0x152f   : > { %v2546_v25 = vpop.f32.mrf.mxu0 }
0x1532   : > { %2696 = vrot.lane.b32.xlu1 %v2584_v23, %s6339_s12 }
0x153a   : > { %2752 = vrot.lane.b32.xlu1 %v2584_v23, %s6333_s4 }
0x159c   : > { %v2641_v27 = vpop.permute.xlu1 %2640 }
0x159d   : > { %4405 = vmatmul.msk.bf16.vlgmr.msra.gmra.mxu0 %vm1220_vm8, %v2641_v27 }
0x15a4   : > { %v2697_v28 = vpop.permute.xlu1 %2696 }
0x15a5   : > { %4407 = vmatmul.msk.bf16.vlgmr.msra.gmra.mxu2 %vm1220_vm8, %v2697_v28 }
0x15ac   : > { %v2753_v29 = vpop.permute.xlu1 %2752 }
0x15ad   : > { %v2601_v31 = vpop.f32.mrf.mxu2  ;;  %4409 = vmatmul.msk.bf16.vlgmr.msrb.gmra.mxu0 %vm1220_vm8, %v2753_v29 }
0x15ae   : > { %v2602_v52 = vadd.f32 %v5969_v32, %v2601_v31 }
0x15b0   : > { %v2605_v33 = vsel %vm1220_vm8, %v2602_v52, -inf }
0x15b1   : > { %2606 = vmax.xlane.f32.xlu2 %v2605_v33 }
0x15b5   : > { %v2603_v47 = vpop.f32.mrf.mxu2 }
0x161a   : > { %v2659_v40 = vpop.f32.mrf.mxu0 }
0x161b   : > { %v2660_v34 = vadd.f32 %v5969_v32, %v2659_v40 }
0x161d   : > { %v2663_v30 = vsel %vm1220_vm8, %v2660_v34, -inf }
0x161e   : > { %2664 = vmax.xlane.f32.xlu1 %v2663_v30 }
0x1622   : > { %v2661_v37 = vpop.f32.mrf.mxu0 }
0x1624   : > { %v2607_v21 = vpop.xlane.xlu2 %2606 }
0x1625   : > { %v2608_v38 = vsub.f32 %v2602_v52, %v2607_v21 }
0x1627   : > { %v2609_v39 = vmul.f32 1.442695, %v2608_v38 }
0x1628   : > { %v2715_v36 = vpop.f32.mrf.mxu2 }
0x1629   : > { %v2716_v41 = vadd.f32 %v5969_v32, %v2715_v36  ;;  %4875 = vpow2.f32 %v2609_v39 }
0x162a   : > { %v2771_v43 = vpop.f32.mrf.mxu0 }
0x162b   : > { %v2772_v45 = vadd.f32 %v5969_v32, %v2771_v43  ;;  %v2719_v46 = vsel %vm1220_vm8, %v2716_v41, -inf }
0x162c   : > { %2720 = vmax.xlane.f32.xlu2 %v2719_v46  ;;  %v4613_v46 = vld [vmem:[#allocation8] sm:$0xff] }
0x162d   : > { %v2775_v44 = vsel %vm1220_vm8, %v2772_v45, -inf }
0x162e   : > { %2776 = vmax.xlane.f32.xlu0 %v2775_v44 }
0x162f   : > { %v4876_v24 = vpop.eup %4875 }
0x1630   : > { %v2717_v49 = vpop.f32.mrf.mxu2  ;;  %v2611_v35 = vsel %vm1220_vm8, %v4876_v24, 0.0 }
0x1632   : > { %v2773_v53 = vpop.f32.mrf.mxu0 }
0x1634   : > { %2612 = vadd.xlane.f32.xlu2 %v2611_v35 }
0x1637   : > { %2675 = vrot.lane.b32.xlu1 %v5944_v2, %s6336_s8 }
0x163f   : > { %2787 = vrot.lane.b32.xlu1 %v5944_v2, %s6334_s5 }
0x1691   : > { %v2665_v54 = vpop.xlane.xlu1 %2664 }
0x1692   : > { %v2666_v15 = vsub.f32 %v2660_v34, %v2665_v54 }
0x1694   : > { %v2667_v19 = vmul.f32 1.442695, %v2666_v15 }
0x1696   : > { %4877 = vpow2.f32 %v2667_v19 }
0x169c   : > { %v4878_v3 = vpop.eup %4877 }
0x169d   : > { %v2669_v55 = vsel %vm1220_vm8, %v4878_v3, 0.0 }
0x169e   : > { %2670 = vadd.xlane.f32.xlu2 %v2669_v55 }
0x169f   : > { %v2721_v61 = vpop.xlane.xlu2 %2720 }
0x16a0   : > { %v2722_v62 = vsub.f32 %v2716_v41, %v2721_v61 }
0x16a1   : > { %v2777_v50 = vpop.xlane.xlu0 %2776 }
0x16a2   : > { %v2778_v4 = vsub.f32 %v2772_v45, %v2777_v50  ;;  %v2723_v63 = vmul.f32 1.442695, %v2722_v62  ;;  %v4614_v45 = vld [vmem:[#allocation8 + $0x8] sm:$0xff] }
0x16a3   : > { %2845 = vmatpush.bf16.msrb.mxu2 %v4614_v45 }
0x16a4   : > { %v2779_v56 = vmul.f32 1.442695, %v2778_v4 }
0x16a6   : > { %4879 = vpow2.f32 %v2779_v56  ;;  %v4616_v56 = vld [vmem:[#allocation10 + $0x8] sm:$0xff] }
0x16a7   : > { %4881 = vpow2.f32 %v2723_v63  ;;  %v2613_v12 = vpop.xlane.xlu2 %2612  ;;  %2846 = vmatpush.bf16.msrb.mxu2 %v4613_v46  ;;  %v4624_v46 = vld [vmem:[%s6331_s3 + $0x18] sm:$0xff] }
0x16a8   : > { %4883 = vrcp.f32 %v2613_v12  ;;  %v4802_v12 = vld [vmem:[%s6343_s28] ss:$0 sm:$0xff] }
0x16a9   : > { %v2676_v58 = vpop.permute.xlu1 %2675 }
0x16aa   : > { %v2681_v5 = vsel %vm1257_vm7, %v2676_v58, 0  ;;  %v4618_v58 = vld [vmem:[#allocation11 + $0x8] sm:$0xff] }
0x16ab   : > { %2690 = vmatpush.bf16.msra.mxu1 %v2681_v5  ;;  %2947 = vmatpush.bf16.msra.mxu0 %v4618_v58  ;;  %v4615_v5 = vld [vmem:[#allocation10] sm:$0xff] }
0x16ac   : > { %v4880_v7 = vpop.eup %4879  ;;  %3047 = vmatpush.bf16.msra.mxu2 %v4624_v46 }
0x16ad   : > { %v2781_v59 = vsel %vm1220_vm8, %v4880_v7, 0.0  ;;  %v4882_v0 = vpop.eup %4881 }
0x16ae   : > { %2782 = vadd.xlane.f32.xlu0 %v2781_v59  ;;  %v2725_v10 = vsel %vm1220_vm8, %v4882_v0, 0.0  ;;  %v4884_v57 = vpop.eup %4883 }
0x16af   : > { %v2615_v42 = vmul.f32 %v4884_v57, %v4876_v24 }
0x16b1   : > { %v2788_v9 = vpop.permute.xlu1 %2787  ;;  %v2616_v23 = vpack.c.bf16 %v2615_v42, %v2615_v42 }
0x16b2   : > { %v2793_v60 = vsel %vm1257_vm7, %v2788_v9, 0 }
0x16b3   : > { %2802 = vmatpush.bf16.msrb.mxu1 %v2793_v60 }
0x16b6   : > { %2618 = vrot.lane.b32.xlu2 %v5944_v2, %s6335_s7 }
0x16c2   : > { %2731 = vrot.lane.b32.xlu0 %v5944_v2, %s6338_s11 }
0x16df   : > { %2726 = vadd.xlane.f32.xlu2 %v2725_v10 }
0x1711   : > { %v2671_v14 = vpop.xlane.xlu2 %2670 }
0x1712   : > { %4885 = vrcp.f32 %v2671_v14 }
0x1718   : > { %v4886_v17 = vpop.eup %4885 }
0x1719   : > { %v2673_v18 = vmul.f32 %v4886_v17, %v4878_v3  ;;  %v2619_v20 = vpop.permute.xlu2 %2618 }
0x171a   : > { %v2624_v22 = vsel %vm1257_vm7, %v2619_v20, 0  ;;  %v4621_v20 = vld [vmem:[%s6344_s17 + $0x10] sm:$0xff] }
0x171b   : > { %v2674_v2 = vpack.c.bf16 %v2673_v18, %v2673_v18  ;;  %2633 = vmatpush.bf16.msrb.mxu3 %v2624_v22  ;;  %v4622_v18 = vld [vmem:[%s6344_s17 + $0x18] sm:$0xff]  ;;  %v4620_v22 = vld [vmem:[%s6344_s17 + $0x8] sm:$0xff] }
0x171d   : > { %4406 = vmatmul.msk.bf16.vlgmr.msra.gmra.mxu1 %vm1220_vm8, %v2674_v2  ;;  %v4619_v2 = vld [vmem:[%s6344_s17] sm:$0xff] }
0x171e   : > { %4404 = vmatmul.msk.bf16.vlgmr.msrb.gmra.mxu3 %vm1220_vm8, %v2616_v23  ;;  %2987 = vmatpush.bf16.msra.mxu1 %v4622_v18 }
0x1721   : > { %v2783_v25 = vpop.xlane.xlu0 %2782 }
0x1722   : > { %4887 = vrcp.f32 %v2783_v25  ;;  %2988 = vmatpush.bf16.msra.mxu1 %v4621_v20 }
0x1726   : > { %2989 = vmatpush.bf16.msra.mxu1 %v4620_v22 }
0x1728   : > { %v4888_v27 = vpop.eup %4887 }
0x1729   : > { %v2785_v28 = vmul.f32 %v4888_v27, %v4880_v7  ;;  %v4617_v7 = vld [vmem:[#allocation11] sm:$0xff] }
0x172a   : > { %2948 = vmatpush.bf16.msra.mxu0 %v4617_v7  ;;  %2990 = vmatpush.bf16.msra.mxu1 %v4619_v2 }
0x172b   : > { %v2786_v29 = vpack.c.bf16 %v2785_v28, %v2785_v28 }
0x172d   : > { %4410 = vmatmul.msk.bf16.vlgmr.msrb.gmra.mxu1 %vm1220_vm8, %v2786_v29 }
0x1734   : > { %v2732_v31 = vpop.permute.xlu0 %2731 }
0x1735   : > { %v2737_v52 = vsel %vm1257_vm7, %v2732_v31, 0 }
0x1736   : > { %2746 = vmatpush.bf16.msra.mxu3 %v2737_v52 }
0x173a   : > { %2913 = vmatpush.bf16.msrb.mxu3 %v4616_v56 }
0x173e   : > { %2914 = vmatpush.bf16.msrb.mxu3 %v4615_v5 }
0x1752   : > { %v2727_v33 = vpop.xlane.xlu2 %2726 }
0x1753   : > { %4889 = vrcp.f32 %v2727_v33 }
0x1759   : > { %v4890_v47 = vpop.eup %4889 }
0x175a   : > { %v2729_v40 = vmul.f32 %v4890_v47, %v4882_v0 }
0x175c   : > { %v2730_v34 = vpack.c.bf16 %v2729_v40, %v2729_v40 }
0x175e   : > { %4408 = vmatmul.msk.bf16.vlgmr.msra.gmra.mxu3 %vm1220_vm8, %v2730_v34 }
0x179a   : > { %v2692_v30 = vpop.f32.mrf.mxu1 }
0x179b   : > { %2809 = vrot.lane.b32.xlu1 %v2692_v30, %s6328_s26 }
0x17a1   : > { %v2635_v37 = vpop.f32.mrf.mxu3 }
0x17a2   : > { %v2694_v21 = vpop.f32.mrf.mxu1 }
0x17a9   : > { %v2637_v38 = vpop.f32.mrf.mxu3 }
0x17aa   : > { %v2804_v39 = vpop.f32.mrf.mxu1 }
0x17ab   : > { %2817 = vrot.lane.b32.xlu1 %v2804_v39, %s6330_s1 }
0x17b2   : > { %v2806_v36 = vpop.f32.mrf.mxu1 }
0x17e1   : > { %v2748_v41 = vpop.f32.mrf.mxu3 }
0x17e2   : > { %2813 = vrot.lane.b32.xlu0 %v2748_v41, %s6329_s2 }
0x17e9   : > { %v2750_v43 = vpop.f32.mrf.mxu3 }
0x180d   : > { %v2810_v44 = vpop.permute.xlu1 %2809 }
0x180e   : > { %v2820_v24 = vsel %vm1220_vm8, %v2635_v37, %v2810_v44  ;;  %v4623_v44 = vld [vmem:[%s6331_s3 + $0x10] sm:$0xff] }
0x180f   : > { %3048 = vmatpush.bf16.msra.mxu2 %v4623_v44 }
0x181d   : > { %v2818_v53 = vpop.permute.xlu1 %2817 }
0x1854   : > { %v2814_v49 = vpop.permute.xlu0 %2813 }
0x1855   : > { %v2821_v35 = vsel %vm1455_vm9, %v2820_v24, %v2814_v49 }
0x1856   : > { %v2822_v54 = vsel %vm1457_vm10, %v2821_v35, %v2818_v53 }
0x1857   : > { %v2823_v15 = vpack.c.bf16 %v2822_v54, %v2822_v54 }
0x1859   : > { %4419 = vmatmul.msk.bf16.vlgmr.msrb.gmra.mxu2 %vm1151_vm2, %v2823_v15 }
0x18dc   : > { %v2848_v19 = vpop.f32.mrf.mxu2 }
0x18dd   : > { %v2852_v3 = vadd.f32 %v2848_v19, %v5939_v51 }
0x18df   : > { %v2870_v55 = vmul.f32 %v2852_v3, %v2852_v3 }
0x18e1   : > { %v2871_v50 = vsel %vm1151_vm2, %v2870_v55, 0.0 }
0x18e2   : > { %2872 = vadd.xlane.f32.xlu0 %v2871_v50  ;;  %v4803_v50 = vld [vmem:[%s6332_s30 + $0x1] ss:$0 sm:$0xff] }
0x18e4   : > { %v2850_v4 = vpop.f32.mrf.mxu2 }
0x1955   : > { %v2873_v59 = vpop.xlane.xlu0 %2872 }
0x1956   : > { %v2874_v9 = vmul.f32 %v2873_v59, %v5639_v26 }
0x1958   : > { %v2875_v60 = vadd.f32 1e-06, %v2874_v9 }
0x195a   : > { %4891 = vrsqrt.f32 %v2875_v60  ;;  %vm2882_vm11 = vweird.f32 %v2875_v60 }
0x1960   : > { %v4892_v51 = vpop.eup %4891 }
0x1961   : > { %v2877_v61 = vmul.f32 %v4892_v51, %v2875_v60  ;;  %vm2883_vm6 = vweird.f32 %v4892_v51 }
0x1962   : > { %vm2884_vm12 = vmor %vm2882_vm11, %vm2883_vm6  ;;  %vm3929_vm6 = vcmask 0  }
0x1963   : > { %v2878_v62 = vmul.f32 %v4892_v51, %v2877_v61 }
0x1965   : > { %v2879_v63 = vmul.f32 0.5, %v2878_v62 }
0x1967   : > { %v2880_v0 = vsub.f32 1.5, %v2879_v63 }
0x1969   : > { %v2881_v10 = vmul.f32 %v4892_v51, %v2880_v0 }
0x196b   : > { %v2885_v14 = vsel %vm2884_vm12, %v4892_v51, %v2881_v10  ;;  %v4630_v10 = vld [vmem:[#allocation7 + $0x18] sm:$0xff] }
0x196c   : > { %v2886_v57 = vmul.f32 %v2885_v14, %v2852_v3 }
0x196e   : > { %v2890_v17 = vmul.f32 %v4802_v12, %v2886_v57 }
0x1970   : > { %v2891_v42 = vpack.c.bf16 %v2890_v17, %v2890_v17  ;;  %v4629_v17 = vld [vmem:[#allocation7 + $0x10] sm:$0xff] }
0x1972   : > { %4428 = vmatmul.msk.bf16.vlgmr.msrb.gmra.mxu3 %vm1151_vm2, %v2891_v42  ;;  %4437 = vmatmul.msk.bf16.vlgmr.msra.gmra.mxu0 %vm1151_vm2, %v2891_v42 }
0x19ef   : > { %v2950_v23 = vpop.f32.mrf.mxu0 }
0x19f5   : > { %v2916_v25 = vpop.f32.mrf.mxu3 }
0x19f6   : > { %v2920_v27 = vmul.f32 %v2916_v25, %v2916_v25 }
0x19f7   : > { %v2952_v28 = vpop.f32.mrf.mxu0 }
0x19f8   : > { %v2921_v29 = vmul.f32 %v2920_v27, %v2916_v25 }
0x19fa   : > { %v2922_v31 = vmul.f32 0.044715, %v2921_v29 }
0x19fc   : > { %v2923_v52 = vadd.f32 %v2922_v31, %v2916_v25 }
0x19fd   : > { %v2918_v33 = vpop.f32.mrf.mxu3 }
0x19fe   : > { %v2924_v47 = vmul.f32 0.7978846, %v2923_v52 }
0x1a00   : > { %4893 = vtanh.f32 %v2924_v47 }
0x1a06   : > { %v4894_v40 = vpop.eup %4893 }
0x1a07   : > { %v2926_v34 = vadd.f32 1.0, %v4894_v40 }
0x1a09   : > { %v2927_v30 = vmul.f32 0.5, %v2926_v34 }
0x1a0b   : > { %v2928_v37 = vmul.f32 %v2927_v30, %v2916_v25 }
0x1a0d   : > { %v2954_v21 = vmul.f32 %v2950_v23, %v2928_v37 }
0x1a0f   : > { %v2955_v38 = vpack.c.bf16 %v2954_v21, %v2954_v21 }
0x1a11   : > { %4454 = vmatmul.msk.bf16.vlgmr.msra.gmra.mxu1 %vm1125_vm0, %v2955_v38 }
0x1a8e   : > { %v2992_v39 = vpop.f32.mrf.mxu1 }
0x1a8f   : > { %v6017_v36 = vadd.f32 %v2992_v39, %v2852_v3 }
0x1a91   : > { %v2999_v41 = vmul.f32 %v6017_v36, %v6017_v36 }
0x1a93   : > { %v3000_v43 = vsel %vm1151_vm2, %v2999_v41, 0.0 }
0x1a94   : > { %3001 = vadd.xlane.f32.xlu1 %v3000_v43 }
0x1a96   : > { %v2994_v45 = vpop.f32.mrf.mxu1 }
0x1b07   : > { %v3002_v24 = vpop.xlane.xlu1 %3001 }
0x1b08   : > { %v3003_v49 = vmul.f32 %v3002_v24, %v5639_v26 }
0x1b0a   : > { %v3004_v53 = vadd.f32 1e-06, %v3003_v49 }
0x1b0c   : > { %4895 = vrsqrt.f32 %v3004_v53  ;;  %vm3011_vm14 = vweird.f32 %v3004_v53 }
0x1b12   : > { %v4896_v35 = vpop.eup %4895 }
0x1b13   : > { %v3006_v54 = vmul.f32 %v4896_v35, %v3004_v53  ;;  %vm3012_vm13 = vweird.f32 %v4896_v35 }
0x1b14   : > { %vm3013_vm15 = vmor %vm3011_vm14, %vm3012_vm13 }
0x1b15   : > { %v3007_v15 = vmul.f32 %v4896_v35, %v3006_v54 }
0x1b17   : > { %v3008_v19 = vmul.f32 0.5, %v3007_v15 }
0x1b19   : > { %v3009_v3 = vsub.f32 1.5, %v3008_v19 }
0x1b1b   : > { %v3010_v55 = vmul.f32 %v4896_v35, %v3009_v3 }
0x1b1d   : > { %v3014_v4 = vsel %vm3013_vm15, %v4896_v35, %v3010_v55 }
0x1b1e   : > { %v3015_v56 = vmul.f32 %v3014_v4, %v6017_v36 }
0x1b20   : > { %v3019_v58 = vmul.f32 %v4803_v50, %v3015_v56 }
0x1b22   : > { %v3020_v5 = vpack.c.bf16 %v3019_v58, %v3019_v58 }
0x1b24   : > { %4468 = vmatmul.msk.bf16.vlgmr.msra.gmra.mxu2 %vm1151_vm2, %v3020_v5 }
0x1ba7   : > { %v3050_v7 = vpop.f32.mrf.mxu2 }
0x1ba8   : > { %v6028_v59 = vpack.c.bf16 %v3050_v7, %v3050_v7 }
0x1baa   : > { %3171 = vrot.lane.b32.xlu1 %v6028_v59, %s6339_s12  ;;  %3173 = vrot.lane.b32.xlu0 %v6028_v59, %s6338_s11 }
0x1bab   : > { %3061 = vrot.lane.b32.xlu2 %v6028_v59, %s6335_s7 }
0x1baf   : > { %v3052_v9 = vpop.f32.mrf.mxu2 }
0x1bb3   : > { %3117 = vrot.lane.b32.xlu2 %v6028_v59, %s6336_s8 }
0x1bbb   : > { %3115 = vrot.lane.b32.xlu2 %v6028_v59, %s6337_s9 }
0x1bc3   : > { %3229 = vrot.lane.b32.xlu2 %v6028_v59, %s6334_s5 }
0x1bcb   : > { %3227 = vrot.lane.b32.xlu2 %v6028_v59, %s6333_s4 }
0x1c05   : > { %v3062_v60 = vpop.permute.xlu2 %3061 }
0x1c06   : > { %v3067_v51 = vsel %vm1220_vm8, %v3062_v60, 0 }
0x1c07   : > { %3076 = vmatpush.bf16.xpose.msra.mxu3 %v3067_v51 }
0x1c0d   : > { %v3118_v61 = vpop.permute.xlu2 %3117 }
0x1c0e   : > { %v3123_v62 = vsel %vm1220_vm8, %v3118_v61, 0  ;;  %4469 = vmatmul.msk.bf16.vlgmr.msra.gmra.mxu3 %vm1220_vm8, %v6028_v59 }
0x1c0f   : > { %3132 = vmatpush.bf16.xpose.msrb.mxu1 %v3123_v62 }
0x1c15   : > { %v3116_v63 = vpop.permute.xlu2 %3115 }
0x1c16   : > { %4471 = vmatmul.msk.bf16.vlgmr.msrb.gmra.mxu1 %vm1220_vm8, %v3116_v63 }
0x1c1c   : > { %v3174_v0 = vpop.permute.xlu0 %3173  ;;  %v3172_v42 = vpop.permute.xlu1 %3171 }
0x1c1d   : > { %v3179_v12 = vsel %vm1220_vm8, %v3174_v0, 0  ;;  %v3230_v14 = vpop.permute.xlu2 %3229 }
0x1c1e   : > { %v3235_v57 = vsel %vm1220_vm8, %v3230_v14, 0  ;;  %3188 = vmatpush.bf16.xpose.msrb.mxu3 %v3179_v12 }
0x1c1f   : > { %3244 = vmatpush.bf16.xpose.msra.mxu1 %v3235_v57 }
0x1c25   : > { %v3228_v18 = vpop.permute.xlu2 %3227  ;;  %4473 = vmatmul.msk.bf16.vlgmr.msrb.gmra.mxu3 %vm1220_vm8, %v3172_v42 }
0x1c26   : > { %4475 = vmatmul.msk.bf16.vlgmr.msra.gmra.mxu1 %vm1220_vm8, %v3228_v18 }
0x1c27   : > { %3408 = vmatpush.bf16.msrb.mxu1 %v4630_v10 }
0x1c2b   : > { %3409 = vmatpush.bf16.msrb.mxu1 %v4629_v17 }
0x1c36   : > { %4504 = vmatmul.msk.bf16.vlgmr.msrb.gmra.mxu1 %vm1151_vm2, %v5934_v48 }
0x1c91   : > { %v3078_v20 = vpop.f32.mrf.mxu3 }
0x1c92   : > { %v3079_v22 = vadd.f32 %v3078_v20, %v5883_v6 }
0x1c93   : > { %v3134_v2 = vpop.f32.mrf.mxu1 }
0x1c94   : > { %v3135_v23 = vadd.f32 %v3134_v2, %v5886_v8  ;;  %v3082_v25 = vsel %vm1220_vm8, %v3079_v22, -inf }
0x1c95   : > { %3083 = vmax.xlane.f32.xlu0 %v3082_v25 }
0x1c96   : > { %v3138_v27 = vsel %vm1220_vm8, %v3135_v23, -inf }
0x1c97   : > { %3139 = vmax.xlane.f32.xlu2 %v3138_v27 }
0x1c99   : > { %v3080_v28 = vpop.f32.mrf.mxu3 }
0x1c9b   : > { %v3136_v29 = vpop.f32.mrf.mxu1 }
0x1ca3   : > { %v3246_v31 = vpop.f32.mrf.mxu1 }
0x1ca4   : > { %v3247_v52 = vadd.f32 %v3246_v31, %v5893_v1 }
0x1ca6   : > { %v3250_v33 = vsel %vm1220_vm8, %v3247_v52, -inf }
0x1ca7   : > { %3251 = vmax.xlane.f32.xlu1 %v3250_v33 }
0x1ca8   : > { %v3190_v48 = vpop.f32.mrf.mxu3 }
0x1ca9   : > { %v3191_v6 = vadd.f32 %v3190_v48, %v5898_v16  ;;  %3150 = vrot.lane.b32.xlu0 %v6028_v59, %s6325_s23 }
0x1cab   : > { %v3248_v8 = vpop.f32.mrf.mxu1  ;;  %v3194_v47 = vsel %vm1220_vm8, %v3191_v6, -inf }
0x1cac   : > { %3195 = vmax.xlane.f32.xlu2 %v3194_v47 }
0x1cb0   : > { %v3192_v40 = vpop.f32.mrf.mxu3 }
0x1cb1   : > { %v4626_v40 = vld [vmem:[#allocation2 + $0x18] sm:$0xff] }
0x1cb2   : > { %3320 = vmatpush.bf16.msra.mxu3 %v4626_v40 }
0x1cb3   : > { %v3411_v34 = vpop.f32.mrf.mxu1 }
0x1cb4   : > { %v6077_v5 = vpack.c.bf16 %v3411_v34, %v3411_v34  ;;  %v4625_v34 = vld [vmem:[#allocation2 + $0x10] sm:$0xff] }
0x1cb6   : > { %v3426_v14 = vsel %vm1220_vm8, %v6077_v5, 0  ;;  %3321 = vmatpush.bf16.msra.mxu3 %v4625_v34 }
0x1cbb   : > { %v3413_v30 = vpop.f32.mrf.mxu1 }
0x1cbc   : > { %v4628_v30 = vld [vmem:[#allocation5 + $0x18] sm:$0xff] }
0x1cc0   : > { %3094 = vrot.lane.b32.xlu1 %v6028_v59, %s6323_s22 }
0x1d08   : > { %v3084_v1 = vpop.xlane.xlu0 %3083 }
0x1d09   : > { %v3085_v37 = vsub.f32 %v3079_v22, %v3084_v1  ;;  %v4627_v1 = vld [vmem:[#allocation5 + $0x10] sm:$0xff] }
0x1d0a   : > { %v3140_v21 = vpop.xlane.xlu2 %3139 }
0x1d0b   : > { %v3086_v38 = vmul.f32 1.442695, %v3085_v37  ;;  %v3141_v39 = vsub.f32 %v3135_v23, %v3140_v21 }
0x1d0d   : > { %4897 = vpow2.f32 %v3086_v38  ;;  %v3142_v16 = vmul.f32 1.442695, %v3141_v39 }
0x1d0f   : > { %4899 = vpow2.f32 %v3142_v16 }
0x1d13   : > { %v4898_v41 = vpop.eup %4897 }
0x1d14   : > { %v3088_v43 = vsel %vm1220_vm8, %v4898_v41, 0.0 }
0x1d15   : > { %v4900_v45 = vpop.eup %4899  ;;  %3089 = vadd.xlane.f32.xlu2 %v3088_v43 }
0x1d16   : > { %v3144_v46 = vsel %vm1220_vm8, %v4900_v45, 0.0 }
0x1d17   : > { %3145 = vadd.xlane.f32.xlu0 %v3144_v46 }
0x1d1a   : > { %v3252_v44 = vpop.xlane.xlu1 %3251 }
0x1d1b   : > { %v3253_v24 = vsub.f32 %v3247_v52, %v3252_v44  ;;  %v3151_v49 = vpop.permute.xlu0 %3150 }
0x1d1c   : > { %v3156_v53 = vsel %vm1257_vm7, %v3151_v49, 0 }
0x1d1d   : > { %v3254_v35 = vmul.f32 1.442695, %v3253_v24  ;;  %3165 = vmatpush.bf16.msrb.mxu2 %v3156_v53 }
0x1d1f   : > { %4901 = vpow2.f32 %v3254_v35  ;;  %v3196_v54 = vpop.xlane.xlu2 %3195 }
0x1d20   : > { %v3197_v15 = vsub.f32 %v3191_v6, %v3196_v54 }
0x1d22   : > { %v3198_v19 = vmul.f32 1.442695, %v3197_v15 }
0x1d24   : > { %4903 = vpow2.f32 %v3198_v19 }
0x1d25   : > { %v4902_v3 = vpop.eup %4901 }
0x1d26   : > { %v3256_v55 = vsel %vm1220_vm8, %v4902_v3, 0.0 }
0x1d27   : > { %3257 = vadd.xlane.f32.xlu2 %v3256_v55 }
0x1d2a   : > { %v4904_v50 = vpop.eup %4903 }
0x1d2b   : > { %3262 = vrot.lane.b32.xlu0 %v6028_v59, %s6326_s10  ;;  %v3200_v4 = vsel %vm1220_vm8, %v4904_v50, 0.0 }
0x1d2f   : > { %3201 = vadd.xlane.f32.xlu2 %v3200_v4 }
0x1d32   : > { %v3095_v56 = vpop.permute.xlu1 %3094 }
0x1d33   : > { %v3100_v58 = vsel %vm1257_vm7, %v3095_v56, 0 }
0x1d34   : > { %3109 = vmatpush.bf16.msrb.mxu0 %v3100_v58  ;;  %v4804_v58 = vld [vmem:[%s6342_s14 + $0x1] ss:$0 sm:$0xff] }
0x1d47   : > { %3206 = vrot.lane.b32.xlu2 %v6028_v59, %s6324_s18  ;;  %s4578_s18 = sshll.u32 %s5438_s0, 3 }
0x1d4f   : > { %3534 = vrot.lane.b32.xlu2 %v6077_v5, %s6339_s12 }
0x1d88   : > { %v3090_v7 = vpop.xlane.xlu2 %3089 }
0x1d89   : > { %4905 = vrcp.f32 %v3090_v7 }
0x1d8a   : > { %v3146_v9 = vpop.xlane.xlu0 %3145 }
0x1d8b   : > { %4907 = vrcp.f32 %v3146_v9 }
0x1d8f   : > { %v4906_v60 = vpop.eup %4905 }
0x1d90   : > { %v3092_v51 = vmul.f32 %v4906_v60, %v4898_v41 }
0x1d91   : > { %v4908_v61 = vpop.eup %4907 }
0x1d92   : > { %v3093_v62 = vpack.c.bf16 %v3092_v51, %v3092_v51  ;;  %v3148_v63 = vmul.f32 %v4908_v61, %v4900_v45 }
0x1d94   : > { %v3149_v0 = vpack.c.bf16 %v3148_v63, %v3148_v63  ;;  %4470 = vmatmul.msk.bf16.vlgmr.msrb.gmra.mxu0 %vm1220_vm8, %v3093_v62 }
0x1d96   : > { %4472 = vmatmul.msk.bf16.vlgmr.msrb.gmra.mxu2 %vm1220_vm8, %v3149_v0 }
0x1d9a   : > { %v3258_v59 = vpop.xlane.xlu2 %3257 }
0x1d9b   : > { %4909 = vrcp.f32 %v3258_v59 }
0x1d9d   : > { %v3263_v10 = vpop.permute.xlu0 %3262 }
0x1d9e   : > { %v3268_v12 = vsel %vm1257_vm7, %v3263_v10, 0 }
0x1d9f   : > { %3277 = vmatpush.bf16.msra.mxu2 %v3268_v12 }
0x1da1   : > { %v4910_v57 = vpop.eup %4909 }
0x1da2   : > { %v3260_v17 = vmul.f32 %v4910_v57, %v4902_v3  ;;  %v3202_v42 = vpop.xlane.xlu2 %3201 }
0x1da3   : > { %3435 = vmatpush.bf16.xpose.msrb.mxu2 %v3426_v14  ;;  %4911 = vrcp.f32 %v3202_v42 }
0x1da4   : > { %v3261_v18 = vpack.c.bf16 %v3260_v17, %v3260_v17 }
0x1da6   : > { %4476 = vmatmul.msk.bf16.vlgmr.msra.gmra.mxu2 %vm1220_vm8, %v3261_v18 }
0x1da9   : > { %v4912_v20 = vpop.eup %4911 }
0x1daa   : > { %v3204_v22 = vmul.f32 %v4912_v20, %v4904_v50  ;;  %v3207_v2 = vpop.permute.xlu2 %3206 }
0x1dab   : > { %v3212_v23 = vsel %vm1257_vm7, %v3207_v2, 0 }
0x1dac   : > { %v3205_v25 = vpack.c.bf16 %v3204_v22, %v3204_v22  ;;  %3221 = vmatpush.bf16.msra.mxu0 %v3212_v23 }
0x1daf   : > { %4474 = vmatmul.msk.bf16.vlgmr.msra.gmra.mxu0 %vm1220_vm8, %v3205_v25 }
0x1db0   : > { %3378 = vmatpush.bf16.msrb.mxu0 %v4628_v30 }
0x1db2   : > { %v3535_v27 = vpop.permute.xlu2 %3534 }
0x1db3   : > { %v3540_v28 = vsel %vm1220_vm8, %v3535_v27, 0 }
0x1db4   : > { %3549 = vmatpush.bf16.xpose.msra.mxu2 %v3540_v28  ;;  %3379 = vmatpush.bf16.msrb.mxu0 %v4627_v1 }
0x1e11   : > { %v3111_v29 = vpop.f32.mrf.mxu0 }
0x1e19   : > { %v3113_v31 = vpop.f32.mrf.mxu0  ;;  %v3167_v52 = vpop.f32.mrf.mxu2 }
0x1e1a   : > { %3284 = vrot.lane.b32.xlu1 %v3167_v52, %s6328_s26 }
0x1e21   : > { %v3169_v33 = vpop.f32.mrf.mxu2 }
0x1e29   : > { %v3279_v48 = vpop.f32.mrf.mxu2 }
0x1e2a   : > { %3292 = vrot.lane.b32.xlu1 %v3279_v48, %s6330_s1 }
0x1e2c   : > { %v3223_v6 = vpop.f32.mrf.mxu0 }
0x1e2d   : > { %3288 = vrot.lane.b32.xlu0 %v3223_v6, %s6329_s2 }
0x1e31   : > { %v3281_v8 = vpop.f32.mrf.mxu2 }
0x1e32   : > { %3478 = vrot.lane.b32.xlu1 %v6077_v5, %s6337_s9 }
0x1e34   : > { %v3225_v47 = vpop.f32.mrf.mxu0 }
0x1e8c   : > { %v3285_v37 = vpop.permute.xlu1 %3284 }
0x1e8d   : > { %v3295_v38 = vsel %vm1220_vm8, %v3111_v29, %v3285_v37 }
0x1e9c   : > { %v3293_v21 = vpop.permute.xlu1 %3292 }
0x1e9f   : > { %v3289_v39 = vpop.permute.xlu0 %3288 }
0x1ea0   : > { %v3296_v16 = vsel %vm1455_vm9, %v3295_v38, %v3289_v39 }
0x1ea1   : > { %v3297_v41 = vsel %vm1457_vm10, %v3296_v16, %v3293_v21 }
0x1ea2   : > { %v3298_v43 = vpack.c.bf16 %v3297_v41, %v3297_v41 }
0x1ea4   : > { %v3479_v45 = vpop.permute.xlu1 %3478  ;;  %4485 = vmatmul.msk.bf16.vlgmr.msra.gmra.mxu3 %vm1151_vm2, %v3298_v43 }
0x1ea5   : > { %v3484_v46 = vsel %vm1220_vm8, %v3479_v45, 0 }
0x1ea6   : > { %3493 = vmatpush.bf16.xpose.msra.mxu0 %v3484_v46 }
0x1f27   : > { %v3323_v44 = vpop.f32.mrf.mxu3 }
0x1f28   : > { %v6101_v24 = vadd.f32 %v3323_v44, %v6017_v36 }
0x1f2a   : > { %v3330_v49 = vmul.f32 %v6101_v24, %v6101_v24 }
0x1f2c   : > { %v3331_v53 = vsel %vm1151_vm2, %v3330_v49, 0.0 }
0x1f2d   : > { %3332 = vadd.xlane.f32.xlu0 %v3331_v53 }
0x1f2f   : > { %v3325_v35 = vpop.f32.mrf.mxu3 }
0x1fa0   : > { %v3333_v54 = vpop.xlane.xlu0 %3332 }
0x1fa1   : > { %v3334_v15 = vmul.f32 %v3333_v54, %v5639_v26 }
0x1fa3   : > { %v3335_v19 = vadd.f32 1e-06, %v3334_v15 }
0x1fa5   : > { %4913 = vrsqrt.f32 %v3335_v19  ;;  %vm3342_vm3 = vweird.f32 %v3335_v19 }
0x1fab   : > { %v4914_v3 = vpop.eup %4913 }
0x1fac   : > { %v3337_v55 = vmul.f32 %v4914_v3, %v3335_v19  ;;  %vm3343_vm1 = vweird.f32 %v4914_v3 }
0x1fad   : > { %vm3344_vm4 = vmor %vm3342_vm3, %vm3343_vm1 }
0x1fae   : > { %v3338_v50 = vmul.f32 %v4914_v3, %v3337_v55 }
0x1fb0   : > { %v3339_v4 = vmul.f32 0.5, %v3338_v50 }
0x1fb2   : > { %v3340_v56 = vsub.f32 1.5, %v3339_v4 }
0x1fb4   : > { %v3341_v36 = vmul.f32 %v4914_v3, %v3340_v56 }
0x1fb6   : > { %v3345_v7 = vsel %vm3344_vm4, %v4914_v3, %v3341_v36 }
0x1fb7   : > { %v3346_v9 = vmul.f32 %v3345_v7, %v6101_v24 }
0x1fb9   : > { %v3350_v60 = vmul.f32 %v4804_v58, %v3346_v9 }
0x1fbb   : > { %v3351_v51 = vpack.c.bf16 %v3350_v60, %v3350_v60 }
0x1fbd   : > { %4495 = vmatmul.msk.bf16.vlgmr.msrb.gmra.mxu0 %vm1151_vm2, %v3351_v51 }
0x203a   : > { %v3381_v61 = vpop.f32.mrf.mxu0 }
0x203b   : > { %v3420_v62 = vpack.c.bf16 %v3381_v61, %v3381_v61 }
0x203d   : > { %3532 = vrot.lane.b32.xlu2 %v3420_v62, %s6339_s12  ;;  %3476 = vrot.lane.b32.xlu1 %v3420_v62, %s6337_s9 }
0x203e   : > { %4505 = vmatmul.msk.bf16.vlgmr.msrb.gmra.mxu2 %vm1220_vm8, %v3420_v62 }
0x2042   : > { %v3383_v63 = vpop.f32.mrf.mxu0 }
0x2045   : > { %3588 = vrot.lane.b32.xlu2 %v3420_v62, %s6333_s4  ;;  %3590 = vrot.lane.b32.xlu1 %v6077_v5, %s6333_s4  ;;  %s1090_s4 = scalar_lea.vmem %s5415_s13, %s5584_s6 }
0x2097   : > { %v3533_v0 = vpop.permute.xlu2 %3532 }
0x2098   : > { %4509 = vmatmul.msk.bf16.vlgmr.msra.gmra.mxu2 %vm1220_vm8, %v3533_v0 }
0x209f   : > { %v3589_v14 = vpop.permute.xlu2 %3588 }
0x20af   : > { %v3477_v59 = vpop.permute.xlu1 %3476 }
0x20b0   : > { %4507 = vmatmul.msk.bf16.vlgmr.msra.gmra.mxu0 %vm1220_vm8, %v3477_v59 }
0x20b7   : > { %v3591_v10 = vpop.permute.xlu1 %3590 }
0x20b8   : > { %v3596_v12 = vsel %vm1220_vm8, %v3591_v10, 0 }
0x20b9   : > { %3605 = vmatpush.bf16.xpose.msrb.mxu0 %v3596_v12 }
0x20c0   : > { %4511 = vmatmul.msk.bf16.vlgmr.msrb.gmra.mxu0 %vm1220_vm8, %v3589_v14 }
0x20c1   : > { %v3437_v57 = vpop.f32.mrf.mxu2 }
0x20c2   : > { %v3438_v17 = vadd.f32 %v5969_v32, %v3437_v57 }
0x20c4   : > { %v3441_v42 = vsel %vm1220_vm8, %v3438_v17, -inf }
0x20c5   : > { %3442 = vmax.xlane.f32.xlu1 %v3441_v42 }
0x20c9   : > { %v3439_v18 = vpop.f32.mrf.mxu2 }
0x20de   : > { %3454 = vrot.lane.b32.xlu1 %v6077_v5, %s6335_s7 }
0x211b   : > { %v3551_v20 = vpop.f32.mrf.mxu2 }
0x211c   : > { %v3552_v22 = vadd.f32 %v5969_v32, %v3551_v20 }
0x211e   : > { %v3555_v2 = vsel %vm1220_vm8, %v3552_v22, -inf }
0x211f   : > { %3556 = vmax.xlane.f32.xlu0 %v3555_v2 }
0x2123   : > { %v3553_v23 = vpop.f32.mrf.mxu2 }
0x212d   : > { %v3495_v25 = vpop.f32.mrf.mxu0 }
0x212e   : > { %v3496_v27 = vadd.f32 %v5969_v32, %v3495_v25  ;;  %v4632_v25 = vld [vmem:[#allocation8 + $0x18] sm:$0xff] }
0x212f   : > { %3681 = vmatpush.bf16.msrb.mxu2 %v4632_v25 }
0x2130   : > { %v3499_v28 = vsel %vm1220_vm8, %v3496_v27, -inf }
0x2131   : > { %3500 = vmax.xlane.f32.xlu2 %v3499_v28 }
0x2135   : > { %v3497_v29 = vpop.f32.mrf.mxu0 }
0x2138   : > { %v3443_v6 = vpop.xlane.xlu1 %3442 }
0x2139   : > { %v3444_v40 = vsub.f32 %v3438_v17, %v3443_v6 }
0x213b   : > { %v3445_v34 = vmul.f32 1.442695, %v3444_v40 }
0x213d   : > { %v3607_v31 = vpop.f32.mrf.mxu0  ;;  %4915 = vpow2.f32 %v3445_v34 }
0x213e   : > { %v3608_v52 = vadd.f32 %v5969_v32, %v3607_v31 }
0x2140   : > { %v3611_v33 = vsel %vm1220_vm8, %v3608_v52, -inf }
0x2141   : > { %3612 = vmax.xlane.f32.xlu0 %v3611_v33 }
0x2143   : > { %v4916_v30 = vpop.eup %4915 }
0x2144   : > { %v3447_v1 = vsel %vm1220_vm8, %v4916_v30, 0.0 }
0x2145   : > { %v3609_v48 = vpop.f32.mrf.mxu0 }
0x2150   : > { %v3455_v8 = vpop.permute.xlu1 %3454 }
0x2151   : > { %v3460_v47 = vsel %vm1257_vm7, %v3455_v8, 0 }
0x2152   : > { %3469 = vmatpush.bf16.msrb.mxu3 %v3460_v47 }
0x2155   : > { %3511 = vrot.lane.b32.xlu0 %v6077_v5, %s6336_s8  ;;  %s6346_s8 = sld [smem:[#allocation39_spill]] }
0x217f   : > { %3448 = vadd.xlane.f32.xlu0 %v3447_v1  ;;  %v4634_v1 = vld [vmem:[#allocation10 + $0x18] sm:$0xff] }
0x2192   : > { %v3557_v32 = vpop.xlane.xlu0 %3556 }
0x2193   : > { %v3558_v37 = vsub.f32 %v3552_v22, %v3557_v32  ;;  %v4636_v32 = vld [vmem:[#allocation11 + $0x18] sm:$0xff] }
0x2194   : > { %3787 = vmatpush.bf16.msra.mxu0 %v4636_v32 }
0x2195   : > { %v3559_v21 = vmul.f32 1.442695, %v3558_v37  ;;  %v4633_v37 = vld [vmem:[#allocation10 + $0x10] sm:$0xff] }
0x2197   : > { %4917 = vpow2.f32 %v3559_v21  ;;  %v4635_v21 = vld [vmem:[#allocation11 + $0x10] sm:$0xff] }
0x2198   : > { %3788 = vmatpush.bf16.msra.mxu0 %v4635_v21 }
0x219d   : > { %v4918_v38 = vpop.eup %4917 }
0x219e   : > { %v3561_v39 = vsel %vm1220_vm8, %v4918_v38, 0.0 }
0x219f   : > { %3562 = vadd.xlane.f32.xlu2 %v3561_v39 }
0x21a4   : > { %v3501_v16 = vpop.xlane.xlu2 %3500 }
0x21a5   : > { %v3502_v41 = vsub.f32 %v3496_v27, %v3501_v16  ;;  %v4631_v27 = vld [vmem:[#allocation8 + $0x10] sm:$0xff] }
0x21a6   : > { %3682 = vmatpush.bf16.msrb.mxu2 %v4631_v27 }
0x21a7   : > { %v3503_v43 = vmul.f32 1.442695, %v3502_v41 }
0x21a9   : > { %4919 = vpow2.f32 %v3503_v43 }
0x21af   : > { %v4920_v45 = vpop.eup %4919 }
0x21b0   : > { %v3505_v46 = vsel %vm1220_vm8, %v4920_v45, 0.0 }
0x21b1   : > { %3506 = vadd.xlane.f32.xlu0 %v3505_v46 }
0x21b4   : > { %v3613_v44 = vpop.xlane.xlu0 %3612 }
0x21b5   : > { %v3614_v49 = vsub.f32 %v3608_v52, %v3613_v44 }
0x21b7   : > { %v3615_v53 = vmul.f32 1.442695, %v3614_v49  ;;  %v4805_v49 = vld [vmem:[%s6343_s28 + $0x1] ss:$0 sm:$0xff] }
0x21b9   : > { %4921 = vpow2.f32 %v3615_v53 }
0x21bf   : > { %v4922_v35 = vpop.eup %4921 }
0x21c0   : > { %v3617_v54 = vsel %vm1220_vm8, %v4922_v35, 0.0 }
0x21c1   : > { %3618 = vadd.xlane.f32.xlu2 %v3617_v54 }
0x21c5   : > { %3623 = vrot.lane.b32.xlu0 %v6077_v5, %s6334_s5  ;;  %s6345_s5 = sld [smem:[#allocation21_spill]] }
0x21c7   : > { %v3512_v15 = vpop.permute.xlu0 %3511 }
0x21c8   : > { %v3517_v19 = vsel %vm1257_vm7, %v3512_v15, 0 }
0x21c9   : > { %3526 = vmatpush.bf16.msra.mxu1 %v3517_v19  ;;  %v4640_v19 = vld [vmem:[%s6344_s17 + $0x38] sm:$0xff] }
0x21cb   : > { %s1081_s9 = scalar_lea.vmem %s6345_s5, %s5587_s15  ;;  %s1057_s15 = sand.u32 1, %s5192_s16  }
0x21d9   : > { %3567 = vrot.lane.b32.xlu2 %v6077_v5, %s6338_s11  ;;  %s3940_s11 = scalar_lea.sflag [#allocation4], %s1057_s15 }
0x21f2   : > { %v3449_v3 = vpop.xlane.xlu0 %3448 }
0x21f3   : > { %4923 = vrcp.f32 %v3449_v3  ;;  %v4639_v3 = vld [vmem:[%s6344_s17 + $0x30] sm:$0xff] }
0x21f9   : > { %v4924_v55 = vpop.eup %4923 }
0x21fa   : > { %v3451_v50 = vmul.f32 %v4924_v55, %v4916_v30  ;;  %v4638_v55 = vld [vmem:[%s6344_s17 + $0x28] sm:$0xff] }
0x21fc   : > { %v3452_v4 = vpack.c.bf16 %v3451_v50, %v3451_v50  ;;  %v4637_v50 = vld [vmem:[%s6344_s17 + $0x20] sm:$0xff] }
0x21fe   : > { %4506 = vmatmul.msk.bf16.vlgmr.msrb.gmra.mxu3 %vm1220_vm8, %v3452_v4 }
0x2212   : > { %v3563_v58 = vpop.xlane.xlu2 %3562 }
0x2224   : > { %v3507_v56 = vpop.xlane.xlu0 %3506 }
0x2225   : > { %4925 = vrcp.f32 %v3507_v56 }
0x2226   : > { %4927 = vrcp.f32 %v3563_v58 }
0x222b   : > { %v4926_v36 = vpop.eup %4925 }
0x222c   : > { %v3509_v7 = vmul.f32 %v4926_v36, %v4920_v45  ;;  %v4928_v5 = vpop.eup %4927 }
0x222d   : > { %v3565_v63 = vmul.f32 %v4928_v5, %v4918_v38 }
0x222e   : > { %v3510_v9 = vpack.c.bf16 %v3509_v7, %v3509_v7 }
0x222f   : > { %v3566_v14 = vpack.c.bf16 %v3565_v63, %v3565_v63 }
0x2230   : > { %4508 = vmatmul.msk.bf16.vlgmr.msra.gmra.mxu1 %vm1220_vm8, %v3510_v9 }
0x2234   : > { %v3619_v60 = vpop.xlane.xlu2 %3618 }
0x2235   : > { %4929 = vrcp.f32 %v3619_v60 }
0x2237   : > { %v3624_v51 = vpop.permute.xlu0 %3623 }
0x2238   : > { %v3629_v61 = vsel %vm1257_vm7, %v3624_v51, 0 }
0x2239   : > { %3638 = vmatpush.bf16.msrb.mxu1 %v3629_v61 }
0x223b   : > { %v4930_v62 = vpop.eup %4929 }
0x223c   : > { %v3621_v0 = vmul.f32 %v4930_v62, %v4922_v35  ;;  %v3568_v59 = vpop.permute.xlu2 %3567 }
0x223d   : > { %v3573_v10 = vsel %vm1257_vm7, %v3568_v59, 0  ;;  %3827 = vmatpush.bf16.msra.mxu1 %v4640_v19 }
0x223e   : > { %v3622_v12 = vpack.c.bf16 %v3621_v0, %v3621_v0  ;;  %3582 = vmatpush.bf16.msra.mxu3 %v3573_v10 }
0x2240   : > { %4512 = vmatmul.msk.bf16.vlgmr.msrb.gmra.mxu1 %vm1220_vm8, %v3622_v12 }
0x2241   : > { %4510 = vmatmul.msk.bf16.vlgmr.msra.gmra.mxu3 %vm1220_vm8, %v3566_v14  ;;  %3828 = vmatpush.bf16.msra.mxu1 %v4639_v3 }
0x2242   : > { %3753 = vmatpush.bf16.msrb.mxu3 %v4634_v1  ;;  %v4806_v1 = vld [vmem:[%s6346_s8] ss:$0 sm:$0xff] }
0x2245   : > { %3829 = vmatpush.bf16.msra.mxu1 %v4638_v55 }
0x2246   : > { %3754 = vmatpush.bf16.msrb.mxu3 %v4633_v37 }
0x2249   : > { %3830 = vmatpush.bf16.msra.mxu1 %v4637_v50 }
0x2281   : > { %v3471_v57 = vpop.f32.mrf.mxu3 }
0x2289   : > { %v3473_v17 = vpop.f32.mrf.mxu3 }
0x22ad   : > { %v3528_v42 = vpop.f32.mrf.mxu1 }
0x22ae   : > { %3645 = vrot.lane.b32.xlu1 %v3528_v42, %s6328_s26  ;;  %s6347_s26 = sld [smem:[#allocation40_spill]] }
0x22b4   : > { %s3956_s23 = scalar_lea.hbm %s6347_s26, %s4578_s18 }
0x22b5   : > { %v3530_v18 = vpop.f32.mrf.mxu1  ;;  %s3960_s12 = sshll.u32 %s3956_s23, 4  ;;  %s3961_s12 = int_to_ptr.hbm [resolvable:$true] %s3960_s12 }
0x22b6   : > { %v4642_v18 = vld [vmem:[%s5400_s19 + $0x8] sm:$0xff]  ;;  %s5136_s22 = sshra.s32 %s3961_s12, 4  ;;  %s5137_s22 = int_to_ptr.hbm [resolvable:$true] %s5136_s22 }
0x22b7   : > { %3885 = vmatpush.bf16.msra.mxu2 %v4642_v18  ;;  %s5138_s5 = scalar_lea.hbm %s5137_s22, 8  ;;  %p5143_p2 = scmp.lt.s32.totalorder %s5137_s22, %s6347_s26 }
0x22b8   : > { %p5139_p9 = scmp.ne.s32.totalorder %s5137_s22, %s5138_s5 }
0x22ba   : > { %p5140_p12 = pnand %p5139_p9, %p5455_p5 }
0x22bc   : > { %p5141_p0 = pneg %p5140_p12 }
0x22bd   : > { %v3640_v20 = vpop.f32.mrf.mxu1 }
0x22be   : > { %3653 = vrot.lane.b32.xlu1 %v3640_v20, %s6330_s1  ;;  %v4641_v20 = vld [vmem:[%s5400_s19] sm:$0xff] }
0x22bf   : > { %3886 = vmatpush.bf16.msra.mxu2 %v4641_v20 }
0x22c4   : > { %v3584_v22 = vpop.f32.mrf.mxu3 }
0x22c5   : > { %v3642_v2 = vpop.f32.mrf.mxu1  ;;  %3649 = vrot.lane.b32.xlu0 %v3584_v22, %s6329_s2  ;;  %v3893_v22 = vld [vmem:[%s1081_s9] sm:$0xff]  ;;  %s4203_s2 = sshll.u32 %s1057_s15, 3  ;;  %s5142_s9 = scalar_lea.hbm %s6347_s26, 16 }
0x22c6   : > { %vm3916_vm5 = vcmp.ne.s32.totalorder %v3893_v22, 4294967196  ;;  %s1059_s7 = scalar_lea.vmem [#allocation13], %s4203_s2  ;;  %p5144_p3 = scmp.lt.s32.totalorder %s5142_s9, %s5138_s5 }
0x22c7   : > { %v6172_v2 = vsel %vm3916_vm5, 1.0, %v5241_v13  ;;  %s3958_s1 = sshll.u32 %s1059_s7, 4  ;;  %s3959_s1 = int_to_ptr.vmem [resolvable:$true] %s3958_s1 }
0x22c8   : > { %p5145_p4 = por %p5144_p3, %p5143_p2 }
0x22ca   : > { %p5146_p7 = pnand %p5145_p4, %p5141_p0 }
0x22cc   : > { %v3586_v23 = vpop.f32.mrf.mxu3 }
0x2320   : > { %v3646_v28 = vpop.permute.xlu1 %3645 }
0x2321   : > { %v3656_v29 = vsel %vm1220_vm8, %v3471_v57, %v3646_v28 }
0x2330   : > { %v3654_v52 = vpop.permute.xlu1 %3653 }
0x2337   : > { %v3650_v31 = vpop.permute.xlu0 %3649 }
0x2338   : > { %v3657_v33 = vsel %vm1455_vm9, %v3656_v29, %v3650_v31 }
0x2339   : > { %v3658_v48 = vsel %vm1457_vm10, %v3657_v33, %v3654_v52  ;;  %vm3921_vm10 = vcmask 7168  }
0x233a   : > { %v3659_v6 = vpack.c.bf16 %v3658_v48, %v3658_v48  ;;  %v3931_v25 = vsel %vm3921_vm10, %v6172_v2, 0.0 }
0x233b   : > { %v3932_v28 = vrot.slane %v3931_v25, 4 }
0x233c   : > { %4521 = vmatmul.msk.bf16.vlgmr.msrb.gmra.mxu2 %vm1151_vm2, %v3659_v6 }
0x233d   : > { %v3933_v31 = vadd.f32 %v3932_v28, %v3931_v25 }
0x233f   : > { %v3934_v52 = vrot.slane %v3933_v31, 2 }
0x2341   : > { %v3935_v33 = vadd.f32 %v3934_v52, %v3933_v31 }
0x2343   : > { %v3936_v48 = vrot.slane %v3935_v33, 1 }
0x23bf   : > { %v3684_v8 = vpop.f32.mrf.mxu2 }
0x23c0   : > { %v3688_v47 = vadd.f32 %v3684_v8, %v6101_v24  ;;  %v3937_v8 = vadd.f32 %v3936_v48, %v3935_v33 }
0x23c2   : > { %v3710_v40 = vmul.f32 %v3688_v47, %v3688_v47  ;;  %3938 = vst.msk [vmem:[%s1090_s4] sm:$0x1] %vm3929_vm6, %v3937_v8 }
0x23c4   : > { %v3711_v34 = vsel %vm1151_vm2, %v3710_v40, 0.0 }
0x23c5   : > { %3712 = vadd.xlane.f32.xlu0 %v3711_v34 }
0x23c7   : > { %v3686_v30 = vpop.f32.mrf.mxu2 }
0x2438   : > { %v3713_v38 = vpop.xlane.xlu0 %3712 }
0x2439   : > { %v3714_v39 = vmul.f32 %v3713_v38, %v5639_v26 }
0x243b   : > { %v3715_v16 = vadd.f32 1e-06, %v3714_v39 }
0x243d   : > { %4931 = vrsqrt.f32 %v3715_v16  ;;  %vm3722_vm8 = vweird.f32 %v3715_v16 }
0x2443   : > { %v4932_v24 = vpop.eup %4931 }
0x2444   : > { %v3717_v41 = vmul.f32 %v4932_v24, %v3715_v16  ;;  %vm3723_vm7 = vweird.f32 %v4932_v24 }
0x2445   : > { %vm3724_vm9 = vmor %vm3722_vm8, %vm3723_vm7 }
0x2446   : > { %v3718_v43 = vmul.f32 %v4932_v24, %v3717_v41 }
0x2448   : > { %v3719_v45 = vmul.f32 0.5, %v3718_v43 }
0x244a   : > { %v3720_v46 = vsub.f32 1.5, %v3719_v45 }
0x244c   : > { %v3721_v44 = vmul.f32 %v4932_v24, %v3720_v46 }
0x244e   : > { %v3725_v53 = vsel %vm3724_vm9, %v4932_v24, %v3721_v44 }
0x244f   : > { %v3726_v35 = vmul.f32 %v3725_v53, %v3688_v47 }
0x2451   : > { %v3730_v54 = vmul.f32 %v4805_v49, %v3726_v35 }
0x2453   : > { %v3731_v15 = vpack.c.bf16 %v3730_v54, %v3730_v54 }
0x2455   : > { %4539 = vmatmul.msk.bf16.vlgmr.msrb.gmra.mxu3 %vm1151_vm2, %v3731_v15  ;;  %4548 = vmatmul.msk.bf16.vlgmr.msra.gmra.mxu0 %vm1151_vm2, %v3731_v15 }
0x24d2   : > { %v3790_v4 = vpop.f32.mrf.mxu0 }
0x24d8   : > { %v3756_v56 = vpop.f32.mrf.mxu3 }
0x24d9   : > { %v3760_v36 = vmul.f32 %v3756_v56, %v3756_v56 }
0x24da   : > { %v3792_v58 = vpop.f32.mrf.mxu0 }
0x24db   : > { %v3761_v7 = vmul.f32 %v3760_v36, %v3756_v56 }
0x24dd   : > { %v3762_v9 = vmul.f32 0.044715, %v3761_v7 }
0x24df   : > { %v3763_v60 = vadd.f32 %v3762_v9, %v3756_v56 }
0x24e0   : > { %v3758_v51 = vpop.f32.mrf.mxu3 }
0x24e1   : > { %v3764_v5 = vmul.f32 0.7978846, %v3763_v60 }
0x24e3   : > { %4933 = vtanh.f32 %v3764_v5 }
0x24e9   : > { %v4934_v61 = vpop.eup %4933 }
0x24ea   : > { %v3766_v62 = vadd.f32 1.0, %v4934_v61 }
0x24ec   : > { %v3767_v63 = vmul.f32 0.5, %v3766_v62 }
0x24ee   : > { %v3768_v0 = vmul.f32 %v3767_v63, %v3756_v56 }
0x24f0   : > { %v3794_v59 = vmul.f32 %v3790_v4, %v3768_v0 }
0x24f2   : > { %v3795_v10 = vpack.c.bf16 %v3794_v59, %v3794_v59 }
0x24f4   : > { %4565 = vmatmul.msk.bf16.vlgmr.msra.gmra.mxu1 %vm1125_vm0, %v3795_v10 }
0x2571   : > { %v3832_v12 = vpop.f32.mrf.mxu1 }
0x2572   : > { %v3836_v14 = vadd.f32 %v3832_v12, %v3688_v47 }
0x2574   : > { %v3838_v57 = vmul.f32 %v3836_v14, %v3836_v14 }
0x2576   : > { %v3839_v17 = vsel %vm1151_vm2, %v3838_v57, 0.0 }
0x2577   : > { %3840 = vadd.xlane.f32.xlu1 %v3839_v17 }
0x2579   : > { %v3834_v42 = vpop.f32.mrf.mxu1 }
0x2590   : > { %3907 = vperm.xlu1 %4793, %v3893_v22  }
0x25ea   : > { %v3841_v23 = vpop.xlane.xlu1 %3840 }
0x25eb   : > { %v3842_v27 = vmul.f32 %v3841_v23, %v5639_v26 }
0x25ed   : > { %v3843_v29 = vadd.f32 1e-06, %v3842_v27 }
0x25ef   : > { %4935 = vrsqrt.f32 %v3843_v29  ;;  %vm3850_vm12 = vweird.f32 %v3843_v29 }
0x25f5   : > { %v4936_v6 = vpop.eup %4935 }
0x25f6   : > { %v3845_v47 = vmul.f32 %v4936_v6, %v3843_v29  ;;  %vm3851_vm11 = vweird.f32 %v4936_v6 }
0x25f7   : > { %vm3852_vm13 = vmor %vm3850_vm12, %vm3851_vm11 }
0x25f8   : > { %v3846_v40 = vmul.f32 %v4936_v6, %v3845_v47 }
0x25fa   : > { %v3847_v34 = vmul.f32 0.5, %v3846_v40 }
0x25fc   : > { %v3848_v30 = vsub.f32 1.5, %v3847_v34 }
0x25fe   : > { %v3849_v26 = vmul.f32 %v4936_v6, %v3848_v30 }
0x2600   : > { %v3853_v32 = vsel %vm3852_vm13, %v4936_v6, %v3849_v26 }
0x2601   : > { %v3854_v37 = vmul.f32 %v3853_v32, %v3836_v14 }
0x2602   : > { %v3908_v39 = vpop.permute.xlu1 %3907 }
0x2603   : > { %v3858_v21 = vmul.f32 %v4806_v1, %v3854_v37  ;;  %vm3909_vm14 = vcmp.eq.s32.totalorder %v5627_v11, %v3908_v39 }
0x2604   : > { %v4575_v41 = vsel %vm3909_vm14, 1.0, %v5241_v13 }
0x2605   : > { %v3859_v38 = vpack.c.bf16 %v3858_v21, %v3858_v21 }
0x2607   : > { %4574 = vmatmul.msk.bf16.vlgmr.msra.gmra.mxu2 %vm1151_vm2, %v3859_v38 }
0x268a   : > { %v3888_v16 = vpop.f32.mrf.mxu2 }
0x268b   : > { %v3894_v24 = vsel %vm1125_vm0, %v3888_v16, -inf  ;;  %3892 = vst.msk [vmem:[%s1059_s7] sm:$0xff] %vm1125_vm0, %v3888_v16  ;;  %v3912_v43 = vmul.f32 %v4575_v41, %v3888_v16 }
0x268c   : > { %3895 = vmax.xlane.f32.xlu2 %v3894_v24 }
0x268d   : > { %v3913_v46 = vsel %vm1125_vm0, %v3912_v43, 0.0 }
0x2692   : > { %v3890_v45 = vpop.f32.mrf.mxu2 }
0x2694   : > { %3914 = vadd.xlane.f32.xlu2 %v3913_v46 }
0x26ff   : > { %v3896_v44 = vpop.xlane.xlu2 %3895 }
0x2700   : > { %v3897_v49 = vsub.f32 %v3888_v16, %v3896_v44 }
0x2702   : > { %v3898_v53 = vmul.f32 1.442695, %v3897_v49 }
0x2704   : > { %4937 = vpow2.f32 %v3898_v53 }
0x270a   : > { %v4938_v11 = vpop.eup %4937 }
0x270b   : > { %v3900_v35 = vsel %vm1125_vm0, %v4938_v11, 0.0 }
0x270c   : > { %3901 = vadd.xlane.f32.xlu0 %v3900_v35 }
0x270d   : > { %5149 = shalt.err (!%p5146_p7)
}
0x270e   : > { %s6349_s0 = sld [smem:[#allocation41_spill]]  ;;  %v3915_v3 = vpop.xlane.xlu2 %3914 }
0x270f   : > { %4667 = dma.vmem_to_hbm [thread:$0]  (%p5455_p5), %s3959_s1, 128, %s3961_s12, %s3940_s11  }
0x2714   : > { %s1087_s8 = scalar_lea.vmem %s6349_s0, %s5584_s6 }
0x277f   : > { %v3902_v13 = vpop.xlane.xlu0 %3901 }
0x2780   : > { %4939 = vlog2.f32 %v3902_v13 }
0x2786   : > { %v4940_v54 = vpop.eup %4939 }
0x2787   : > { %v3904_v15 = vmul.f32 0.6931472, %v4940_v54 }
0x2789   : > { %v3905_v19 = vadd.f32 %v3904_v15, %v3896_v44 }
0x278b   : > { %v3919_v55 = vsub.f32 %v3905_v19, %v3915_v3 }
0x278d   : > { %v3920_v50 = vmul.f32 %v6172_v2, %v3919_v55 }
0x278f   : > { %v3922_v4 = vsel %vm3921_vm10, %v3920_v50, 0.0 }
0x2790   : > { %v3923_v56 = vrot.slane %v3922_v4, 4 }
0x2792   : > { %v3924_v36 = vadd.f32 %v3923_v56, %v3922_v4 }
0x2794   : > { %v3925_v58 = vrot.slane %v3924_v36, 2 }
0x2796   : > { %v3926_v7 = vadd.f32 %v3925_v58, %v3924_v36 }
0x2798   : > { %v3927_v9 = vrot.slane %v3926_v7, 1 }
0x279a   : > { %v3928_v60 = vadd.f32 %v3927_v9, %v3926_v7 }
0x279c   : > { %3930 = vst.msk [vmem:[%s1087_s8] sm:$0x1] %vm3929_vm6, %v3928_v60 }
0x279d PF: > { %s6350_s4 = sld [smem:[#allocation44_spill]] }
0x279e   : > { %s6351_s15 = sld [smem:[#allocation42_spill]] }
0x27a3   : > { %p4704_p5 = scmp.ge.s32.totalorder %s6350_s4, 2 }
0x27a4   : > { %s3978_s7 = sand.u32 1, %s6351_s15  }
0x27a5   : > { %p4689_p8 = pnand %p4704_p5, %p5459_p6  ;;  %s3979_s10 = scalar_lea.sflag [#allocation4], %s3978_s7 }
0x27a7   : > { %p4690_p11 = pneg %p4689_p8 }
0x27a9   : > { %5183 = dma.done.wait (%p4690_p11), %s3979_s10, 128  }
0x27aa   : > { %5185 = vsyncadd (%p4690_p11), %s3979_s10, 4294967168  ;;  %s6353_s22 = sld [smem:[#allocation45_spill]]  ;;  %s6356_s15 = smov %s5192_s16 }
0x27ab   : > { %s6354_s18 = sld [smem:[#allocation43_spill]] }
0x27ac   : > { %s6355_s23 = sld [smem:[#allocation46_spill]] }
0x27b0   : > { %p76_p13 = scmp.ge.s32.totalorder %s6353_s22, 4  }
0x27b1   : > { %s6357_s16 = smov %s6354_s18 }
0x27b2   : > { %s6358_s18 = smov %s6355_s23  ;;  %78 = sbr.rel (!%p76_p13) target bundleno = 66 (0x42), region = 273 }
0x27b7   :  { %3997 = vsyncpa [#allocation3], 1 }
0x27b8   :  { %3999 = vsyncpa [#allocation3 + $0x1], 1 }
0x27b9   :  { %4000 = vsyncpa [#allocation6], 1 }
0x27ba   :  { %4001 = vsyncpa [#allocation9], 1 }
0x27bb   :  { %4002 = vsyncpa [#allocation12], 1 }
0x27bc   :  { %4003 = vsyncpa [#allocation4], 1 }
0x27bd   :  { %4005 = vsyncpa [#allocation4 + $0x1], 1 }

</bundles_post_ra>
